<compile_context>
chip_gen: v7x
topology: tpu7x:2x2x1
jax: 0.10.0
libtpu: 0.0.40
codegen_flags: <defaults>
</compile_context>

<pallas_src>
import functools
import math

import jax
import jax.numpy as jnp
from jax import lax
from jax.experimental import pallas as pl
from jax.experimental.pallas import tpu as pltpu


# ---------------------------------------------------------------------------
# Kernel helpers (traced inside the Pallas kernel)
# ---------------------------------------------------------------------------
def _layer_norm(x, g, b, eps=1e-5):
    mu = jnp.mean(x, axis=-1, keepdims=True)
    var = jnp.mean((x - mu) ** 2, axis=-1, keepdims=True)
    return (x - mu) * lax.rsqrt(var + eps) * g + b


def _linear(x, w, b):
    return jnp.dot(x, w, preferred_element_type=jnp.float32) + b


# ---------------------------------------------------------------------------
# The Pallas kernel: full TransformerPredictor forward
# ---------------------------------------------------------------------------
def transformer_forward_kernel(
    B, S, nhead,
    # inputs -----------------------------------------------------------------
    src_ref, pe_ref,
    in_ln_g, in_ln_b, proj_w, proj_b,
    qkv_w, qkv_b, o_w, o_b,
    ln1_g, ln1_b, ff1_w, ff1_b, ff2_w, ff2_b, ln2_g, ln2_b,
    fin_g, fin_b,
    out1_w, out1_b, oln_g, oln_b, out2_w, out2_b,
    # output -----------------------------------------------------------------
    out_ref,
):
    Din = src_ref.shape[-1]
    H = proj_w.shape[1]
    L = qkv_w.shape[0]
    dh = H // nhead
    scale = 1.0 / math.sqrt(dh)
    NB = B * nhead

    src = src_ref[...]                                                  # (B*S, Din)

    # --- key padding mask, once for the whole batch --------------------------
    # torch.all(src == 0, dim=-1)  <=>  sum_i |src[row, i]| == 0
    feat_l1 = lax.dot_general(
        jnp.ones((1, Din), jnp.float32), jnp.abs(src),
        (((1,), (1,)), ((), ())), preferred_element_type=jnp.float32)   # (1, B*S)
    key_bias = jnp.where(feat_l1 == 0.0, -1e9, 0.0)                     # (1, B*S)
    # per (batch, head) additive bias over keys: (B*nhead, 1, S)   (layer-invariant)
    bias_all = jnp.stack(
        [key_bias[:, (n // nhead) * S:(n // nhead) * S + S] for n in range(NB)],
        axis=0)

    # --- input LayerNorm + input projection (Linear -> ReLU -> [Dropout=id]) --
    x = _layer_norm(src, in_ln_g[...], in_ln_b[...])
    x = jnp.maximum(_linear(x, proj_w[...], proj_b[...]), 0.0)          # (B*S, H)
    # positional encoding (pre-tiled to (B*S, H) in the wrapper)
    x = x + pe_ref[...]

    # ----- TransformerEncoder: L post-norm layers -----------------------------
    for l in range(L):
        # fused QKV projection: one lane-dense matmul for all rows
        qkv = _linear(x, qkv_w[l], qkv_b[l])                            # (B*S, 3H)

        # gather per-(batch, head) tiles into a single leading batch axis
        def heads(off):
            return jnp.stack(
                [qkv[(n // nhead) * S:(n // nhead) * S + S,
                     off + (n % nhead) * dh: off + (n % nhead) * dh + dh]
                 for n in range(NB)],
                axis=0)                                                  # (B*nhead, S, dh)

        qh = heads(0) * scale
        kh = heads(H)
        vh = heads(2 * H)

        # batched attention over all (batch, head) pairs at once
        s = jnp.einsum('nqd,nkd->nqk', qh, kh,
                       preferred_element_type=jnp.float32)               # (B*nhead, S, S)
        s = s + bias_all
        s = s - jnp.max(s, axis=-1, keepdims=True)
        e = jnp.exp(s)
        p = e * pl.reciprocal(jnp.sum(e, axis=-1, keepdims=True), approx=True)
        ctx = jnp.einsum('nqk,nkd->nqd', p, vh,
                         preferred_element_type=jnp.float32)             # (B*nhead, S, dh)

        # reassemble heads -> (B*S, H), then one dense output projection
        ctx2d = jnp.concatenate(
            [jnp.concatenate([ctx[b * nhead + h] for h in range(nhead)], axis=-1)
             for b in range(B)],
            axis=0)                                                      # (B*S, H)
        attn = _linear(ctx2d, o_w[l], o_b[l])                            # (B*S, H)
        x = _layer_norm(x + attn, ln1_g[l], ln1_b[l])                    # norm1

        ff = jnp.maximum(_linear(x, ff1_w[l], ff1_b[l]), 0.0)            # (B*S, 2H)
        ff = _linear(ff, ff2_w[l], ff2_b[l])                             # (B*S, H)
        x = _layer_norm(x + ff, ln2_g[l], ln2_b[l])                      # norm2

    # --- last token only: final encoder LN + output MLP head ------------------
    last = jnp.concatenate(
        [x[b * S + S - 1: b * S + S, :] for b in range(B)], axis=0)      # (B, H)
    last = _layer_norm(last, fin_g[...], fin_b[...])
    y = _linear(last, out1_w[...], out1_b[...])                          # (B, H/2)
    y = jnp.maximum(_layer_norm(y, oln_g[...], oln_b[...]), 0.0)
    y = _linear(y, out2_w[...], out2_b[...])                             # (B, OUT)
    out_ref[...] = y                                                     # single store


# ---------------------------------------------------------------------------
# Wrapper
# ---------------------------------------------------------------------------
def transformer_predictor_forward(src, p, nhead):
    B, S, Din = src.shape
    out_dim = p["out2_w"].shape[1]
    src_flat = src.reshape(B * S, Din)
    pe_tiled = jnp.tile(p["pe"], (B, 1))          # (B*S, H)

    args = [
        src_flat, pe_tiled,
        p["in_ln_g"], p["in_ln_b"], p["proj_w"], p["proj_b"],
        p["qkv_w"], p["qkv_b"], p["o_w"], p["o_b"],
        p["ln1_g"], p["ln1_b"], p["ff1_w"], p["ff1_b"], p["ff2_w"], p["ff2_b"],
        p["ln2_g"], p["ln2_b"],
        p["fin_g"], p["fin_b"],
        p["out1_w"], p["out1_b"], p["oln_g"], p["oln_b"], p["out2_w"], p["out2_b"],
    ]
    kernel = functools.partial(transformer_forward_kernel, B, S, nhead)
    return pl.pallas_call(
        kernel,
        out_shape=jax.ShapeDtypeStruct((B, out_dim), jnp.float32),
        # Everything is tiny -> keep all tensors fully resident in VMEM (no grid).
        in_specs=[pl.BlockSpec(memory_space=pltpu.MemorySpace.VMEM)] * len(args),
        out_specs=pl.BlockSpec(memory_space=pltpu.MemorySpace.VMEM),
    )(*args)


# ---------------------------------------------------------------------------
# Deterministic parameter construction (shapes follow the PyTorch __init__,
# with QKV pre-fused to (L, H, 3H) and the output projection as (L, H, H)).
# ---------------------------------------------------------------------------
def init_params(key, d_in, h, nhead, n_layers, d_out, seq_len):
    L, ff, hh = n_layers, 2 * h, h // 2
    keys = iter(jax.random.split(key, 64))

    def w(shape, gain=0.1):                       # xavier_uniform-style, gain=0.1
        fan_in, fan_out = shape[-2], shape[-1]
        lim = gain * math.sqrt(6.0 / (fan_in + fan_out))
        return jax.random.uniform(next(keys), shape, jnp.float32, -lim, lim)

    def bvec(shape, scale=0.02):
        return jax.random.uniform(next(keys), shape, jnp.float32, -scale, scale)

    # sinusoidal positional encoding, sliced to (seq_len, h)
    position = jnp.arange(seq_len, dtype=jnp.float32)[:, None]
    div_term = jnp.exp(jnp.arange(0, h, 2, dtype=jnp.float32) * (-math.log(10000.0) / h))
    pe = jnp.zeros((seq_len, h), jnp.float32)
    pe = pe.at[:, 0::2].set(jnp.sin(position * div_term))
    pe = pe.at[:, 1::2].set(jnp.cos(position * div_term))

    return dict(
        pe=pe,
        in_ln_g=jnp.ones((1, d_in), jnp.float32), in_ln_b=jnp.zeros((1, d_in), jnp.float32),
        proj_w=w((d_in, h)), proj_b=bvec((1, h)),
        # fused attention projections (pre-transposed): columns [0:H)=Q, [H:2H)=K, [2H:3H)=V,
        # with head h occupying the dh-wide sub-block h*dh:(h+1)*dh inside each.
        qkv_w=w((L, h, 3 * h)), qkv_b=bvec((L, 1, 3 * h)),
        o_w=w((L, h, h)), o_b=bvec((L, 1, h)),
        ln1_g=jnp.ones((L, 1, h), jnp.float32), ln1_b=jnp.zeros((L, 1, h), jnp.float32),
        ff1_w=w((L, h, ff)), ff1_b=bvec((L, 1, ff)),
        ff2_w=w((L, ff, h)), ff2_b=bvec((L, 1, h)),
        ln2_g=jnp.ones((L, 1, h), jnp.float32), ln2_b=jnp.zeros((L, 1, h), jnp.float32),
        fin_g=jnp.ones((1, h), jnp.float32), fin_b=jnp.zeros((1, h), jnp.float32),
        out1_w=w((h, hh)), out1_b=bvec((1, hh)),
        oln_g=jnp.ones((1, hh), jnp.float32), oln_b=jnp.zeros((1, hh), jnp.float32),
        out2_w=w((hh, d_out)), out2_b=bvec((1, d_out)),
    )


# ---------------------------------------------------------------------------
# Pure-JAX reference (same math, XLA-compiled) for a sanity check
# ---------------------------------------------------------------------------
def reference_forward(src, p, nhead):
    H = p["proj_w"].shape[1]
    L = p["qkv_w"].shape[0]
    dh = H // nhead
    scale = 1.0 / math.sqrt(dh)
    B, S, _ = src.shape

    def ln(x, g, b, eps=1e-5):
        mu = jnp.mean(x, -1, keepdims=True)
        var = jnp.mean((x - mu) ** 2, -1, keepdims=True)
        return (x - mu) / jnp.sqrt(var + eps) * g + b

    pad = jnp.all(src == 0.0, axis=-1)                        # (B, S)
    bias = jnp.where(pad, -1e9, 0.0)[:, None, None, :]        # (B, 1, 1, S)

    x = ln(src, p["in_ln_g"], p["in_ln_b"])
    x = jax.nn.relu(x @ p["proj_w"] + p["proj_b"])
    x = x + p["pe"][None]

    for l in range(L):
        qkv = x @ p["qkv_w"][l] + p["qkv_b"][l]               # (B, S, 3H)
        q, k, v = jnp.split(qkv, 3, axis=-1)
        q = q.reshape(B, S, nhead, dh).transpose(0, 2, 1, 3) * scale
        k = k.reshape(B, S, nhead, dh).transpose(0, 2, 1, 3)
        v = v.reshape(B, S, nhead, dh).transpose(0, 2, 1, 3)
        s = jnp.einsum("bhqd,bhkd->bhqk", q, k) + bias
        a = jax.nn.softmax(s, axis=-1)
        o = jnp.einsum("bhqk,bhkd->bhqd", a, v)
        o = o.transpose(0, 2, 1, 3).reshape(B, S, H)
        o = o @ p["o_w"][l] + p["o_b"][l]
        x = ln(x + o, p["ln1_g"][l], p["ln1_b"][l])
        ff = jax.nn.relu(x @ p["ff1_w"][l] + p["ff1_b"][l]) @ p["ff2_w"][l] + p["ff2_b"][l]
        x = ln(x + ff, p["ln2_g"][l], p["ln2_b"][l])

    x = ln(x, p["fin_g"], p["fin_b"])
    last = x[:, -1]
    y = last @ p["out1_w"] + p["out1_b"]
    y = jax.nn.relu(ln(y, p["oln_g"], p["oln_b"]))
    return y @ p["out2_w"] + p["out2_b"]


# ---------------------------------------------------------------------------
if __name__ == "__main__":
    # Small shapes consistent with the module:
    # input_size=16, hidden_size=32, nhead=4 (32 % 4 == 0), num_layers=2, output_size=8
    B, S = 2, 8
    INPUT_SIZE, HIDDEN, NHEAD, NUM_LAYERS, OUTPUT_SIZE = 16, 32, 4, 2, 8

    key = jax.random.PRNGKey(0)
    k_src, k_par = jax.random.split(key)
    src = jax.random.normal(k_src, (B, S, INPUT_SIZE), jnp.float32)
    params = init_params(k_par, INPUT_SIZE, HIDDEN, NHEAD, NUM_LAYERS, OUTPUT_SIZE, S)

    out = transformer_predictor_forward(src, params, NHEAD)
    out = jax.block_until_ready(out)

    ref = reference_forward(src, params, NHEAD)
    assert out.shape == (B, OUTPUT_SIZE)
    assert bool(jnp.allclose(out, ref, rtol=1e-2, atol=1e-3)), "Pallas kernel disagrees with JAX reference"

    print("KERNEL_OK")
</pallas_src>

<mosaic_0001>
module attributes {stable_mosaic.version = 11 : i64} {
  func.func @transformer_forward_kernel(%arg0: memref<16x16xf32, #tpu.memory_space<vmem>>, %arg1: memref<16x32xf32, #tpu.memory_space<vmem>>, %arg2: memref<1x16xf32, #tpu.memory_space<vmem>>, %arg3: memref<1x16xf32, #tpu.memory_space<vmem>>, %arg4: memref<16x32xf32, #tpu.memory_space<vmem>>, %arg5: memref<1x32xf32, #tpu.memory_space<vmem>>, %arg6: memref<2x32x96xf32, #tpu.memory_space<vmem>>, %arg7: memref<2x1x96xf32, #tpu.memory_space<vmem>>, %arg8: memref<2x32x32xf32, #tpu.memory_space<vmem>>, %arg9: memref<2x1x32xf32, #tpu.memory_space<vmem>>, %arg10: memref<2x1x32xf32, #tpu.memory_space<vmem>>, %arg11: memref<2x1x32xf32, #tpu.memory_space<vmem>>, %arg12: memref<2x32x64xf32, #tpu.memory_space<vmem>>, %arg13: memref<2x1x64xf32, #tpu.memory_space<vmem>>, %arg14: memref<2x64x32xf32, #tpu.memory_space<vmem>>, %arg15: memref<2x1x32xf32, #tpu.memory_space<vmem>>, %arg16: memref<2x1x32xf32, #tpu.memory_space<vmem>>, %arg17: memref<2x1x32xf32, #tpu.memory_space<vmem>>, %arg18: memref<1x32xf32, #tpu.memory_space<vmem>>, %arg19: memref<1x32xf32, #tpu.memory_space<vmem>>, %arg20: memref<32x16xf32, #tpu.memory_space<vmem>>, %arg21: memref<1x16xf32, #tpu.memory_space<vmem>>, %arg22: memref<1x16xf32, #tpu.memory_space<vmem>>, %arg23: memref<1x16xf32, #tpu.memory_space<vmem>>, %arg24: memref<16x8xf32, #tpu.memory_space<vmem>>, %arg25: memref<1x8xf32, #tpu.memory_space<vmem>>, %arg26: memref<2x8xf32, #tpu.memory_space<vmem>>) attributes {dimension_semantics = [], scalar_prefetch = 0 : i64, scratch_operands = 0 : i64, tpu.core_type = #tpu.core_type<tc>} {
    %c0 = arith.constant 0 : index
    %c0_0 = arith.constant 0 : index
    %0 = vector.load %arg0[%c0, %c0_0] : memref<16x16xf32, #tpu.memory_space<vmem>>, vector<16x16xf32>
    %cst = arith.constant 1.000000e+00 : f32
    %1 = vector.broadcast %cst : f32 to vector<1x16xf32>
    %2 = math.absf %0 : vector<16x16xf32>
    %cst_1 = arith.constant dense<0.000000e+00> : vector<1x16xf32>
    %3 = tpu.matmul %1, %2, %cst_1 {dimension_numbers = #tpu.dot_dimension_numbers<[1], [1], [0], [0], [0, 0, 1, 0], [], []>} : vector<1x16xf32>, vector<16x16xf32>, vector<1x16xf32> -> vector<1x16xf32>
    %cst_2 = arith.constant 0.000000e+00 : f32
    %4 = vector.broadcast %cst_2 : f32 to vector<1x16xf32>
    %5 = arith.cmpf oeq, %3, %4 : vector<1x16xf32>
    %cst_3 = arith.constant -1.000000e+09 : f32
    %cst_4 = arith.constant 0.000000e+00 : f32
    %6 = vector.broadcast %cst_3 : f32 to vector<1x16xf32>
    %7 = vector.broadcast %cst_4 : f32 to vector<1x16xf32>
    %8 = arith.select %5, %6, %7 : vector<1x16xi1>, vector<1x16xf32>
    %9 = vector.extract_strided_slice %8 {offsets = [0, 0], sizes = [1, 8], strides = [1, 1]} : vector<1x16xf32> to vector<1x8xf32>
    %10 = vector.extract_strided_slice %8 {offsets = [0, 0], sizes = [1, 8], strides = [1, 1]} : vector<1x16xf32> to vector<1x8xf32>
    %11 = vector.extract_strided_slice %8 {offsets = [0, 0], sizes = [1, 8], strides = [1, 1]} : vector<1x16xf32> to vector<1x8xf32>
    %12 = vector.extract_strided_slice %8 {offsets = [0, 0], sizes = [1, 8], strides = [1, 1]} : vector<1x16xf32> to vector<1x8xf32>
    %13 = vector.extract_strided_slice %8 {offsets = [0, 8], sizes = [1, 8], strides = [1, 1]} : vector<1x16xf32> to vector<1x8xf32>
    %14 = vector.extract_strided_slice %8 {offsets = [0, 8], sizes = [1, 8], strides = [1, 1]} : vector<1x16xf32> to vector<1x8xf32>
    %15 = vector.extract_strided_slice %8 {offsets = [0, 8], sizes = [1, 8], strides = [1, 1]} : vector<1x16xf32> to vector<1x8xf32>
    %16 = vector.extract_strided_slice %8 {offsets = [0, 8], sizes = [1, 8], strides = [1, 1]} : vector<1x16xf32> to vector<1x8xf32>
    %17 = vector.shape_cast %9 : vector<1x8xf32> to vector<1x1x8xf32>
    %18 = vector.shape_cast %10 : vector<1x8xf32> to vector<1x1x8xf32>
    %19 = vector.shape_cast %11 : vector<1x8xf32> to vector<1x1x8xf32>
    %20 = vector.shape_cast %12 : vector<1x8xf32> to vector<1x1x8xf32>
    %21 = vector.shape_cast %13 : vector<1x8xf32> to vector<1x1x8xf32>
    %22 = vector.shape_cast %14 : vector<1x8xf32> to vector<1x1x8xf32>
    %23 = vector.shape_cast %15 : vector<1x8xf32> to vector<1x1x8xf32>
    %24 = vector.shape_cast %16 : vector<1x8xf32> to vector<1x1x8xf32>
    %25 = tpu.concatenate %17, %18, %19, %20, %21, %22, %23, %24 in 0 : vector<1x1x8xf32>, vector<1x1x8xf32>, vector<1x1x8xf32>, vector<1x1x8xf32>, vector<1x1x8xf32>, vector<1x1x8xf32>, vector<1x1x8xf32>, vector<1x1x8xf32> -> vector<8x1x8xf32>
    %c0_5 = arith.constant 0 : index
    %c0_6 = arith.constant 0 : index
    %26 = vector.load %arg2[%c0_5, %c0_6] : memref<1x16xf32, #tpu.memory_space<vmem>>, vector<1x16xf32>
    %c0_7 = arith.constant 0 : index
    %c0_8 = arith.constant 0 : index
    %27 = vector.load %arg3[%c0_7, %c0_8] : memref<1x16xf32, #tpu.memory_space<vmem>>, vector<1x16xf32>
    %cst_9 = arith.constant dense<0.000000e+00> : vector<16xf32>
    %28 = vector.multi_reduction <add>, %0, %cst_9 [1] : vector<16x16xf32> to vector<16xf32>
    %29 = vector.shape_cast %28 : vector<16xf32> to vector<16x1xf32>
    %cst_10 = arith.constant 1.600000e+01 : f32
    %30 = vector.broadcast %cst_10 : f32 to vector<16x1xf32>
    %31 = arith.divf %29, %30 : vector<16x1xf32>
    %32 = vector.broadcast %31 : vector<16x1xf32> to vector<16x16xf32>
    %33 = arith.subf %0, %32 : vector<16x16xf32>
    %34 = arith.mulf %33, %33 : vector<16x16xf32>
    %cst_11 = arith.constant dense<0.000000e+00> : vector<16xf32>
    %35 = vector.multi_reduction <add>, %34, %cst_11 [1] : vector<16x16xf32> to vector<16xf32>
    %36 = vector.shape_cast %35 : vector<16xf32> to vector<16x1xf32>
    %cst_12 = arith.constant 1.600000e+01 : f32
    %37 = vector.broadcast %cst_12 : f32 to vector<16x1xf32>
    %38 = arith.divf %36, %37 : vector<16x1xf32>
    %39 = vector.broadcast %31 : vector<16x1xf32> to vector<16x16xf32>
    %40 = arith.subf %0, %39 : vector<16x16xf32>
    %cst_13 = arith.constant 9.99999974E-6 : f32
    %41 = vector.broadcast %cst_13 : f32 to vector<16x1xf32>
    %42 = arith.addf %38, %41 : vector<16x1xf32>
    %43 = math.rsqrt %42 : vector<16x1xf32>
    %44 = vector.broadcast %43 : vector<16x1xf32> to vector<16x16xf32>
    %45 = arith.mulf %40, %44 : vector<16x16xf32>
    %46 = vector.broadcast %26 : vector<1x16xf32> to vector<16x16xf32>
    %47 = arith.mulf %45, %46 : vector<16x16xf32>
    %48 = vector.broadcast %27 : vector<1x16xf32> to vector<16x16xf32>
    %49 = arith.addf %47, %48 : vector<16x16xf32>
    %c0_14 = arith.constant 0 : index
    %c0_15 = arith.constant 0 : index
    %50 = vector.load %arg4[%c0_14, %c0_15] : memref<16x32xf32, #tpu.memory_space<vmem>>, vector<16x32xf32>
    %c0_16 = arith.constant 0 : index
    %c0_17 = arith.constant 0 : index
    %51 = vector.load %arg5[%c0_16, %c0_17] : memref<1x32xf32, #tpu.memory_space<vmem>>, vector<1x32xf32>
    %cst_18 = arith.constant dense<0.000000e+00> : vector<16x32xf32>
    %52 = tpu.matmul %49, %50, %cst_18 {dimension_numbers = #tpu.dot_dimension_numbers<[1], [0], [0], [1], [0, 0, 1, 1], [], []>} : vector<16x16xf32>, vector<16x32xf32>, vector<16x32xf32> -> vector<16x32xf32>
    %53 = vector.broadcast %51 : vector<1x32xf32> to vector<16x32xf32>
    %54 = arith.addf %52, %53 : vector<16x32xf32>
    %cst_19 = arith.constant 0.000000e+00 : f32
    %55 = vector.broadcast %cst_19 : f32 to vector<16x32xf32>
    %56 = arith.maximumf %54, %55 : vector<16x32xf32>
    %c0_20 = arith.constant 0 : index
    %c0_21 = arith.constant 0 : index
    %57 = vector.load %arg1[%c0_20, %c0_21] : memref<16x32xf32, #tpu.memory_space<vmem>>, vector<16x32xf32>
    %58 = arith.addf %56, %57 : vector<16x32xf32>
    %c0_22 = arith.constant 0 : index
    %c0_23 = arith.constant 0 : index
    %c0_24 = arith.constant 0 : index
    %59 = vector.load %arg6[%c0_22, %c0_23, %c0_24] : memref<2x32x96xf32, #tpu.memory_space<vmem>>, vector<1x32x96xf32>
    %60 = vector.shape_cast %59 : vector<1x32x96xf32> to vector<32x96xf32>
    %c0_25 = arith.constant 0 : index
    %c0_26 = arith.constant 0 : index
    %c0_27 = arith.constant 0 : index
    %61 = vector.load %arg7[%c0_25, %c0_26, %c0_27] : memref<2x1x96xf32, #tpu.memory_space<vmem>>, vector<1x1x96xf32>
    %62 = vector.shape_cast %61 : vector<1x1x96xf32> to vector<1x96xf32>
    %cst_28 = arith.constant dense<0.000000e+00> : vector<16x96xf32>
    %63 = tpu.matmul %58, %60, %cst_28 {dimension_numbers = #tpu.dot_dimension_numbers<[1], [0], [0], [1], [0, 0, 1, 1], [], []>} : vector<16x32xf32>, vector<32x96xf32>, vector<16x96xf32> -> vector<16x96xf32>
    %64 = vector.broadcast %62 : vector<1x96xf32> to vector<16x96xf32>
    %65 = arith.addf %63, %64 : vector<16x96xf32>
    %66 = vector.extract_strided_slice %65 {offsets = [0, 0], sizes = [8, 8], strides = [1, 1]} : vector<16x96xf32> to vector<8x8xf32>
    %67 = vector.extract_strided_slice %65 {offsets = [0, 8], sizes = [8, 8], strides = [1, 1]} : vector<16x96xf32> to vector<8x8xf32>
    %68 = vector.extract_strided_slice %65 {offsets = [0, 16], sizes = [8, 8], strides = [1, 1]} : vector<16x96xf32> to vector<8x8xf32>
    %69 = vector.extract_strided_slice %65 {offsets = [0, 24], sizes = [8, 8], strides = [1, 1]} : vector<16x96xf32> to vector<8x8xf32>
    %70 = vector.extract_strided_slice %65 {offsets = [8, 0], sizes = [8, 8], strides = [1, 1]} : vector<16x96xf32> to vector<8x8xf32>
    %71 = vector.extract_strided_slice %65 {offsets = [8, 8], sizes = [8, 8], strides = [1, 1]} : vector<16x96xf32> to vector<8x8xf32>
    %72 = vector.extract_strided_slice %65 {offsets = [8, 16], sizes = [8, 8], strides = [1, 1]} : vector<16x96xf32> to vector<8x8xf32>
    %73 = vector.extract_strided_slice %65 {offsets = [8, 24], sizes = [8, 8], strides = [1, 1]} : vector<16x96xf32> to vector<8x8xf32>
    %74 = vector.shape_cast %66 : vector<8x8xf32> to vector<1x8x8xf32>
    %75 = vector.shape_cast %67 : vector<8x8xf32> to vector<1x8x8xf32>
    %76 = vector.shape_cast %68 : vector<8x8xf32> to vector<1x8x8xf32>
    %77 = vector.shape_cast %69 : vector<8x8xf32> to vector<1x8x8xf32>
    %78 = vector.shape_cast %70 : vector<8x8xf32> to vector<1x8x8xf32>
    %79 = vector.shape_cast %71 : vector<8x8xf32> to vector<1x8x8xf32>
    %80 = vector.shape_cast %72 : vector<8x8xf32> to vector<1x8x8xf32>
    %81 = vector.shape_cast %73 : vector<8x8xf32> to vector<1x8x8xf32>
    %82 = tpu.concatenate %74, %75, %76, %77, %78, %79, %80, %81 in 0 : vector<1x8x8xf32>, vector<1x8x8xf32>, vector<1x8x8xf32>, vector<1x8x8xf32>, vector<1x8x8xf32>, vector<1x8x8xf32>, vector<1x8x8xf32>, vector<1x8x8xf32> -> vector<8x8x8xf32>
    %cst_29 = arith.constant 0.353553385 : f32
    %83 = vector.broadcast %cst_29 : f32 to vector<8x8x8xf32>
    %84 = arith.mulf %82, %83 : vector<8x8x8xf32>
    %85 = vector.extract_strided_slice %65 {offsets = [0, 32], sizes = [8, 8], strides = [1, 1]} : vector<16x96xf32> to vector<8x8xf32>
    %86 = vector.extract_strided_slice %65 {offsets = [0, 40], sizes = [8, 8], strides = [1, 1]} : vector<16x96xf32> to vector<8x8xf32>
    %87 = vector.extract_strided_slice %65 {offsets = [0, 48], sizes = [8, 8], strides = [1, 1]} : vector<16x96xf32> to vector<8x8xf32>
    %88 = vector.extract_strided_slice %65 {offsets = [0, 56], sizes = [8, 8], strides = [1, 1]} : vector<16x96xf32> to vector<8x8xf32>
    %89 = vector.extract_strided_slice %65 {offsets = [8, 32], sizes = [8, 8], strides = [1, 1]} : vector<16x96xf32> to vector<8x8xf32>
    %90 = vector.extract_strided_slice %65 {offsets = [8, 40], sizes = [8, 8], strides = [1, 1]} : vector<16x96xf32> to vector<8x8xf32>
    %91 = vector.extract_strided_slice %65 {offsets = [8, 48], sizes = [8, 8], strides = [1, 1]} : vector<16x96xf32> to vector<8x8xf32>
    %92 = vector.extract_strided_slice %65 {offsets = [8, 56], sizes = [8, 8], strides = [1, 1]} : vector<16x96xf32> to vector<8x8xf32>
    %93 = vector.shape_cast %85 : vector<8x8xf32> to vector<1x8x8xf32>
    %94 = vector.shape_cast %86 : vector<8x8xf32> to vector<1x8x8xf32>
    %95 = vector.shape_cast %87 : vector<8x8xf32> to vector<1x8x8xf32>
    %96 = vector.shape_cast %88 : vector<8x8xf32> to vector<1x8x8xf32>
    %97 = vector.shape_cast %89 : vector<8x8xf32> to vector<1x8x8xf32>
    %98 = vector.shape_cast %90 : vector<8x8xf32> to vector<1x8x8xf32>
    %99 = vector.shape_cast %91 : vector<8x8xf32> to vector<1x8x8xf32>
    %100 = vector.shape_cast %92 : vector<8x8xf32> to vector<1x8x8xf32>
    %101 = tpu.concatenate %93, %94, %95, %96, %97, %98, %99, %100 in 0 : vector<1x8x8xf32>, vector<1x8x8xf32>, vector<1x8x8xf32>, vector<1x8x8xf32>, vector<1x8x8xf32>, vector<1x8x8xf32>, vector<1x8x8xf32>, vector<1x8x8xf32> -> vector<8x8x8xf32>
    %102 = vector.extract_strided_slice %65 {offsets = [0, 64], sizes = [8, 8], strides = [1, 1]} : vector<16x96xf32> to vector<8x8xf32>
    %103 = vector.extract_strided_slice %65 {offsets = [0, 72], sizes = [8, 8], strides = [1, 1]} : vector<16x96xf32> to vector<8x8xf32>
    %104 = vector.extract_strided_slice %65 {offsets = [0, 80], sizes = [8, 8], strides = [1, 1]} : vector<16x96xf32> to vector<8x8xf32>
    %105 = vector.extract_strided_slice %65 {offsets = [0, 88], sizes = [8, 8], strides = [1, 1]} : vector<16x96xf32> to vector<8x8xf32>
    %106 = vector.extract_strided_slice %65 {offsets = [8, 64], sizes = [8, 8], strides = [1, 1]} : vector<16x96xf32> to vector<8x8xf32>
    %107 = vector.extract_strided_slice %65 {offsets = [8, 72], sizes = [8, 8], strides = [1, 1]} : vector<16x96xf32> to vector<8x8xf32>
    %108 = vector.extract_strided_slice %65 {offsets = [8, 80], sizes = [8, 8], strides = [1, 1]} : vector<16x96xf32> to vector<8x8xf32>
    %109 = vector.extract_strided_slice %65 {offsets = [8, 88], sizes = [8, 8], strides = [1, 1]} : vector<16x96xf32> to vector<8x8xf32>
    %110 = vector.shape_cast %102 : vector<8x8xf32> to vector<1x8x8xf32>
    %111 = vector.shape_cast %103 : vector<8x8xf32> to vector<1x8x8xf32>
    %112 = vector.shape_cast %104 : vector<8x8xf32> to vector<1x8x8xf32>
    %113 = vector.shape_cast %105 : vector<8x8xf32> to vector<1x8x8xf32>
    %114 = vector.shape_cast %106 : vector<8x8xf32> to vector<1x8x8xf32>
    %115 = vector.shape_cast %107 : vector<8x8xf32> to vector<1x8x8xf32>
    %116 = vector.shape_cast %108 : vector<8x8xf32> to vector<1x8x8xf32>
    %117 = vector.shape_cast %109 : vector<8x8xf32> to vector<1x8x8xf32>
    %118 = tpu.concatenate %110, %111, %112, %113, %114, %115, %116, %117 in 0 : vector<1x8x8xf32>, vector<1x8x8xf32>, vector<1x8x8xf32>, vector<1x8x8xf32>, vector<1x8x8xf32>, vector<1x8x8xf32>, vector<1x8x8xf32>, vector<1x8x8xf32> -> vector<8x8x8xf32>
    "tpu.trace_start"() <{level = 10 : i32, message = "nqd,nkd->nqk"}> : () -> ()
    %cst_30 = arith.constant dense<0.000000e+00> : vector<8x8x8xf32>
    %119 = tpu.matmul %84, %101, %cst_30 {dimension_numbers = #tpu.dot_dimension_numbers<[2], [2], [1], [1], [0, 0, 0, 1, 1, 1], [0], [0]>} : vector<8x8x8xf32>, vector<8x8x8xf32>, vector<8x8x8xf32> -> vector<8x8x8xf32>
    "tpu.trace_stop"() : () -> ()
    %120 = vector.broadcast %25 : vector<8x1x8xf32> to vector<8x8x8xf32>
    %121 = arith.addf %119, %120 : vector<8x8x8xf32>
    %cst_31 = arith.constant dense<0xFF800000> : vector<8x8xf32>
    %122 = vector.multi_reduction <maximumf>, %121, %cst_31 [2] : vector<8x8x8xf32> to vector<8x8xf32>
    %123 = vector.shape_cast %122 : vector<8x8xf32> to vector<8x8x1xf32>
    %124 = vector.broadcast %123 : vector<8x8x1xf32> to vector<8x8x8xf32>
    %125 = arith.subf %121, %124 : vector<8x8x8xf32>
    %126 = math.exp %125 : vector<8x8x8xf32>
    %cst_32 = arith.constant dense<0.000000e+00> : vector<8x8xf32>
    %127 = vector.multi_reduction <add>, %126, %cst_32 [2] : vector<8x8x8xf32> to vector<8x8xf32>
    %128 = vector.shape_cast %127 : vector<8x8xf32> to vector<8x8x1xf32>
    %129 = tpu.reciprocal %128 {approx = true} : vector<8x8x1xf32> -> vector<8x8x1xf32>
    %130 = vector.broadcast %129 : vector<8x8x1xf32> to vector<8x8x8xf32>
    %131 = arith.mulf %126, %130 : vector<8x8x8xf32>
    "tpu.trace_start"() <{level = 10 : i32, message = "nqk,nkd->nqd"}> : () -> ()
    %cst_33 = arith.constant dense<0.000000e+00> : vector<8x8x8xf32>
    %132 = tpu.matmul %131, %118, %cst_33 {dimension_numbers = #tpu.dot_dimension_numbers<[2], [1], [1], [2], [0, 0, 0, 1, 1, 2], [0], [0]>} : vector<8x8x8xf32>, vector<8x8x8xf32>, vector<8x8x8xf32> -> vector<8x8x8xf32>
    "tpu.trace_stop"() : () -> ()
    %133 = vector.extract_strided_slice %132 {offsets = [0, 0, 0], sizes = [1, 8, 8], strides = [1, 1, 1]} : vector<8x8x8xf32> to vector<1x8x8xf32>
    %134 = vector.shape_cast %133 : vector<1x8x8xf32> to vector<8x8xf32>
    %135 = vector.extract_strided_slice %132 {offsets = [1, 0, 0], sizes = [1, 8, 8], strides = [1, 1, 1]} : vector<8x8x8xf32> to vector<1x8x8xf32>
    %136 = vector.shape_cast %135 : vector<1x8x8xf32> to vector<8x8xf32>
    %137 = vector.extract_strided_slice %132 {offsets = [2, 0, 0], sizes = [1, 8, 8], strides = [1, 1, 1]} : vector<8x8x8xf32> to vector<1x8x8xf32>
    %138 = vector.shape_cast %137 : vector<1x8x8xf32> to vector<8x8xf32>
    %139 = vector.extract_strided_slice %132 {offsets = [3, 0, 0], sizes = [1, 8, 8], strides = [1, 1, 1]} : vector<8x8x8xf32> to vector<1x8x8xf32>
    %140 = vector.shape_cast %139 : vector<1x8x8xf32> to vector<8x8xf32>
    %141 = tpu.concatenate %134, %136, %138, %140 in 1 : vector<8x8xf32>, vector<8x8xf32>, vector<8x8xf32>, vector<8x8xf32> -> vector<8x32xf32>
    %142 = vector.extract_strided_slice %132 {offsets = [4, 0, 0], sizes = [1, 8, 8], strides = [1, 1, 1]} : vector<8x8x8xf32> to vector<1x8x8xf32>
    %143 = vector.shape_cast %142 : vector<1x8x8xf32> to vector<8x8xf32>
    %144 = vector.extract_strided_slice %132 {offsets = [5, 0, 0], sizes = [1, 8, 8], strides = [1, 1, 1]} : vector<8x8x8xf32> to vector<1x8x8xf32>
    %145 = vector.shape_cast %144 : vector<1x8x8xf32> to vector<8x8xf32>
    %146 = vector.extract_strided_slice %132 {offsets = [6, 0, 0], sizes = [1, 8, 8], strides = [1, 1, 1]} : vector<8x8x8xf32> to vector<1x8x8xf32>
    %147 = vector.shape_cast %146 : vector<1x8x8xf32> to vector<8x8xf32>
    %148 = vector.extract_strided_slice %132 {offsets = [7, 0, 0], sizes = [1, 8, 8], strides = [1, 1, 1]} : vector<8x8x8xf32> to vector<1x8x8xf32>
    %149 = vector.shape_cast %148 : vector<1x8x8xf32> to vector<8x8xf32>
    %150 = tpu.concatenate %143, %145, %147, %149 in 1 : vector<8x8xf32>, vector<8x8xf32>, vector<8x8xf32>, vector<8x8xf32> -> vector<8x32xf32>
    %151 = tpu.concatenate %141, %150 in 0 : vector<8x32xf32>, vector<8x32xf32> -> vector<16x32xf32>
    %c0_34 = arith.constant 0 : index
    %c0_35 = arith.constant 0 : index
    %c0_36 = arith.constant 0 : index
    %152 = vector.load %arg8[%c0_34, %c0_35, %c0_36] : memref<2x32x32xf32, #tpu.memory_space<vmem>>, vector<1x32x32xf32>
    %153 = vector.shape_cast %152 : vector<1x32x32xf32> to vector<32x32xf32>
    %c0_37 = arith.constant 0 : index
    %c0_38 = arith.constant 0 : index
    %c0_39 = arith.constant 0 : index
    %154 = vector.load %arg9[%c0_37, %c0_38, %c0_39] : memref<2x1x32xf32, #tpu.memory_space<vmem>>, vector<1x1x32xf32>
    %155 = vector.shape_cast %154 : vector<1x1x32xf32> to vector<1x32xf32>
    %cst_40 = arith.constant dense<0.000000e+00> : vector<16x32xf32>
    %156 = tpu.matmul %151, %153, %cst_40 {dimension_numbers = #tpu.dot_dimension_numbers<[1], [0], [0], [1], [0, 0, 1, 1], [], []>} : vector<16x32xf32>, vector<32x32xf32>, vector<16x32xf32> -> vector<16x32xf32>
    %157 = vector.broadcast %155 : vector<1x32xf32> to vector<16x32xf32>
    %158 = arith.addf %156, %157 : vector<16x32xf32>
    %159 = arith.addf %58, %158 : vector<16x32xf32>
    %c0_41 = arith.constant 0 : index
    %c0_42 = arith.constant 0 : index
    %c0_43 = arith.constant 0 : index
    %160 = vector.load %arg10[%c0_41, %c0_42, %c0_43] : memref<2x1x32xf32, #tpu.memory_space<vmem>>, vector<1x1x32xf32>
    %161 = vector.shape_cast %160 : vector<1x1x32xf32> to vector<1x32xf32>
    %c0_44 = arith.constant 0 : index
    %c0_45 = arith.constant 0 : index
    %c0_46 = arith.constant 0 : index
    %162 = vector.load %arg11[%c0_44, %c0_45, %c0_46] : memref<2x1x32xf32, #tpu.memory_space<vmem>>, vector<1x1x32xf32>
    %163 = vector.shape_cast %162 : vector<1x1x32xf32> to vector<1x32xf32>
    %cst_47 = arith.constant dense<0.000000e+00> : vector<16xf32>
    %164 = vector.multi_reduction <add>, %159, %cst_47 [1] : vector<16x32xf32> to vector<16xf32>
    %165 = vector.shape_cast %164 : vector<16xf32> to vector<16x1xf32>
    %cst_48 = arith.constant 3.200000e+01 : f32
    %166 = vector.broadcast %cst_48 : f32 to vector<16x1xf32>
    %167 = arith.divf %165, %166 : vector<16x1xf32>
    %168 = vector.broadcast %167 : vector<16x1xf32> to vector<16x32xf32>
    %169 = arith.subf %159, %168 : vector<16x32xf32>
    %170 = arith.mulf %169, %169 : vector<16x32xf32>
    %cst_49 = arith.constant dense<0.000000e+00> : vector<16xf32>
    %171 = vector.multi_reduction <add>, %170, %cst_49 [1] : vector<16x32xf32> to vector<16xf32>
    %172 = vector.shape_cast %171 : vector<16xf32> to vector<16x1xf32>
    %cst_50 = arith.constant 3.200000e+01 : f32
    %173 = vector.broadcast %cst_50 : f32 to vector<16x1xf32>
    %174 = arith.divf %172, %173 : vector<16x1xf32>
    %175 = vector.broadcast %167 : vector<16x1xf32> to vector<16x32xf32>
    %176 = arith.subf %159, %175 : vector<16x32xf32>
    %cst_51 = arith.constant 9.99999974E-6 : f32
    %177 = vector.broadcast %cst_51 : f32 to vector<16x1xf32>
    %178 = arith.addf %174, %177 : vector<16x1xf32>
    %179 = math.rsqrt %178 : vector<16x1xf32>
    %180 = vector.broadcast %179 : vector<16x1xf32> to vector<16x32xf32>
    %181 = arith.mulf %176, %180 : vector<16x32xf32>
    %182 = vector.broadcast %161 : vector<1x32xf32> to vector<16x32xf32>
    %183 = arith.mulf %181, %182 : vector<16x32xf32>
    %184 = vector.broadcast %163 : vector<1x32xf32> to vector<16x32xf32>
    %185 = arith.addf %183, %184 : vector<16x32xf32>
    %c0_52 = arith.constant 0 : index
    %c0_53 = arith.constant 0 : index
    %c0_54 = arith.constant 0 : index
    %186 = vector.load %arg12[%c0_52, %c0_53, %c0_54] : memref<2x32x64xf32, #tpu.memory_space<vmem>>, vector<1x32x64xf32>
    %187 = vector.shape_cast %186 : vector<1x32x64xf32> to vector<32x64xf32>
    %c0_55 = arith.constant 0 : index
    %c0_56 = arith.constant 0 : index
    %c0_57 = arith.constant 0 : index
    %188 = vector.load %arg13[%c0_55, %c0_56, %c0_57] : memref<2x1x64xf32, #tpu.memory_space<vmem>>, vector<1x1x64xf32>
    %189 = vector.shape_cast %188 : vector<1x1x64xf32> to vector<1x64xf32>
    %cst_58 = arith.constant dense<0.000000e+00> : vector<16x64xf32>
    %190 = tpu.matmul %185, %187, %cst_58 {dimension_numbers = #tpu.dot_dimension_numbers<[1], [0], [0], [1], [0, 0, 1, 1], [], []>} : vector<16x32xf32>, vector<32x64xf32>, vector<16x64xf32> -> vector<16x64xf32>
    %191 = vector.broadcast %189 : vector<1x64xf32> to vector<16x64xf32>
    %192 = arith.addf %190, %191 : vector<16x64xf32>
    %cst_59 = arith.constant 0.000000e+00 : f32
    %193 = vector.broadcast %cst_59 : f32 to vector<16x64xf32>
    %194 = arith.maximumf %192, %193 : vector<16x64xf32>
    %c0_60 = arith.constant 0 : index
    %c0_61 = arith.constant 0 : index
    %c0_62 = arith.constant 0 : index
    %195 = vector.load %arg14[%c0_60, %c0_61, %c0_62] : memref<2x64x32xf32, #tpu.memory_space<vmem>>, vector<1x64x32xf32>
    %196 = vector.shape_cast %195 : vector<1x64x32xf32> to vector<64x32xf32>
    %c0_63 = arith.constant 0 : index
    %c0_64 = arith.constant 0 : index
    %c0_65 = arith.constant 0 : index
    %197 = vector.load %arg15[%c0_63, %c0_64, %c0_65] : memref<2x1x32xf32, #tpu.memory_space<vmem>>, vector<1x1x32xf32>
    %198 = vector.shape_cast %197 : vector<1x1x32xf32> to vector<1x32xf32>
    %cst_66 = arith.constant dense<0.000000e+00> : vector<16x32xf32>
    %199 = tpu.matmul %194, %196, %cst_66 {dimension_numbers = #tpu.dot_dimension_numbers<[1], [0], [0], [1], [0, 0, 1, 1], [], []>} : vector<16x64xf32>, vector<64x32xf32>, vector<16x32xf32> -> vector<16x32xf32>
    %200 = vector.broadcast %198 : vector<1x32xf32> to vector<16x32xf32>
    %201 = arith.addf %199, %200 : vector<16x32xf32>
    %202 = arith.addf %185, %201 : vector<16x32xf32>
    %c0_67 = arith.constant 0 : index
    %c0_68 = arith.constant 0 : index
    %c0_69 = arith.constant 0 : index
    %203 = vector.load %arg16[%c0_67, %c0_68, %c0_69] : memref<2x1x32xf32, #tpu.memory_space<vmem>>, vector<1x1x32xf32>
    %204 = vector.shape_cast %203 : vector<1x1x32xf32> to vector<1x32xf32>
    %c0_70 = arith.constant 0 : index
    %c0_71 = arith.constant 0 : index
    %c0_72 = arith.constant 0 : index
    %205 = vector.load %arg17[%c0_70, %c0_71, %c0_72] : memref<2x1x32xf32, #tpu.memory_space<vmem>>, vector<1x1x32xf32>
    %206 = vector.shape_cast %205 : vector<1x1x32xf32> to vector<1x32xf32>
    %cst_73 = arith.constant dense<0.000000e+00> : vector<16xf32>
    %207 = vector.multi_reduction <add>, %202, %cst_73 [1] : vector<16x32xf32> to vector<16xf32>
    %208 = vector.shape_cast %207 : vector<16xf32> to vector<16x1xf32>
    %cst_74 = arith.constant 3.200000e+01 : f32
    %209 = vector.broadcast %cst_74 : f32 to vector<16x1xf32>
    %210 = arith.divf %208, %209 : vector<16x1xf32>
    %211 = vector.broadcast %210 : vector<16x1xf32> to vector<16x32xf32>
    %212 = arith.subf %202, %211 : vector<16x32xf32>
    %213 = arith.mulf %212, %212 : vector<16x32xf32>
    %cst_75 = arith.constant dense<0.000000e+00> : vector<16xf32>
    %214 = vector.multi_reduction <add>, %213, %cst_75 [1] : vector<16x32xf32> to vector<16xf32>
    %215 = vector.shape_cast %214 : vector<16xf32> to vector<16x1xf32>
    %cst_76 = arith.constant 3.200000e+01 : f32
    %216 = vector.broadcast %cst_76 : f32 to vector<16x1xf32>
    %217 = arith.divf %215, %216 : vector<16x1xf32>
    %218 = vector.broadcast %210 : vector<16x1xf32> to vector<16x32xf32>
    %219 = arith.subf %202, %218 : vector<16x32xf32>
    %cst_77 = arith.constant 9.99999974E-6 : f32
    %220 = vector.broadcast %cst_77 : f32 to vector<16x1xf32>
    %221 = arith.addf %217, %220 : vector<16x1xf32>
    %222 = math.rsqrt %221 : vector<16x1xf32>
    %223 = vector.broadcast %222 : vector<16x1xf32> to vector<16x32xf32>
    %224 = arith.mulf %219, %223 : vector<16x32xf32>
    %225 = vector.broadcast %204 : vector<1x32xf32> to vector<16x32xf32>
    %226 = arith.mulf %224, %225 : vector<16x32xf32>
    %227 = vector.broadcast %206 : vector<1x32xf32> to vector<16x32xf32>
    %228 = arith.addf %226, %227 : vector<16x32xf32>
    %c1 = arith.constant 1 : index
    %c0_78 = arith.constant 0 : index
    %c0_79 = arith.constant 0 : index
    %229 = vector.load %arg6[%c1, %c0_78, %c0_79] : memref<2x32x96xf32, #tpu.memory_space<vmem>>, vector<1x32x96xf32>
    %230 = vector.shape_cast %229 : vector<1x32x96xf32> to vector<32x96xf32>
    %c1_80 = arith.constant 1 : index
    %c0_81 = arith.constant 0 : index
    %c0_82 = arith.constant 0 : index
    %231 = vector.load %arg7[%c1_80, %c0_81, %c0_82] : memref<2x1x96xf32, #tpu.memory_space<vmem>>, vector<1x1x96xf32>
    %232 = vector.shape_cast %231 : vector<1x1x96xf32> to vector<1x96xf32>
    %cst_83 = arith.constant dense<0.000000e+00> : vector<16x96xf32>
    %233 = tpu.matmul %228, %230, %cst_83 {dimension_numbers = #tpu.dot_dimension_numbers<[1], [0], [0], [1], [0, 0, 1, 1], [], []>} : vector<16x32xf32>, vector<32x96xf32>, vector<16x96xf32> -> vector<16x96xf32>
    %234 = vector.broadcast %232 : vector<1x96xf32> to vector<16x96xf32>
    %235 = arith.addf %233, %234 : vector<16x96xf32>
    %236 = vector.extract_strided_slice %235 {offsets = [0, 0], sizes = [8, 8], strides = [1, 1]} : vector<16x96xf32> to vector<8x8xf32>
    %237 = vector.extract_strided_slice %235 {offsets = [0, 8], sizes = [8, 8], strides = [1, 1]} : vector<16x96xf32> to vector<8x8xf32>
    %238 = vector.extract_strided_slice %235 {offsets = [0, 16], sizes = [8, 8], strides = [1, 1]} : vector<16x96xf32> to vector<8x8xf32>
    %239 = vector.extract_strided_slice %235 {offsets = [0, 24], sizes = [8, 8], strides = [1, 1]} : vector<16x96xf32> to vector<8x8xf32>
    %240 = vector.extract_strided_slice %235 {offsets = [8, 0], sizes = [8, 8], strides = [1, 1]} : vector<16x96xf32> to vector<8x8xf32>
    %241 = vector.extract_strided_slice %235 {offsets = [8, 8], sizes = [8, 8], strides = [1, 1]} : vector<16x96xf32> to vector<8x8xf32>
    %242 = vector.extract_strided_slice %235 {offsets = [8, 16], sizes = [8, 8], strides = [1, 1]} : vector<16x96xf32> to vector<8x8xf32>
    %243 = vector.extract_strided_slice %235 {offsets = [8, 24], sizes = [8, 8], strides = [1, 1]} : vector<16x96xf32> to vector<8x8xf32>
    %244 = vector.shape_cast %236 : vector<8x8xf32> to vector<1x8x8xf32>
    %245 = vector.shape_cast %237 : vector<8x8xf32> to vector<1x8x8xf32>
    %246 = vector.shape_cast %238 : vector<8x8xf32> to vector<1x8x8xf32>
    %247 = vector.shape_cast %239 : vector<8x8xf32> to vector<1x8x8xf32>
    %248 = vector.shape_cast %240 : vector<8x8xf32> to vector<1x8x8xf32>
    %249 = vector.shape_cast %241 : vector<8x8xf32> to vector<1x8x8xf32>
    %250 = vector.shape_cast %242 : vector<8x8xf32> to vector<1x8x8xf32>
    %251 = vector.shape_cast %243 : vector<8x8xf32> to vector<1x8x8xf32>
    %252 = tpu.concatenate %244, %245, %246, %247, %248, %249, %250, %251 in 0 : vector<1x8x8xf32>, vector<1x8x8xf32>, vector<1x8x8xf32>, vector<1x8x8xf32>, vector<1x8x8xf32>, vector<1x8x8xf32>, vector<1x8x8xf32>, vector<1x8x8xf32> -> vector<8x8x8xf32>
    %cst_84 = arith.constant 0.353553385 : f32
    %253 = vector.broadcast %cst_84 : f32 to vector<8x8x8xf32>
    %254 = arith.mulf %252, %253 : vector<8x8x8xf32>
    %255 = vector.extract_strided_slice %235 {offsets = [0, 32], sizes = [8, 8], strides = [1, 1]} : vector<16x96xf32> to vector<8x8xf32>
    %256 = vector.extract_strided_slice %235 {offsets = [0, 40], sizes = [8, 8], strides = [1, 1]} : vector<16x96xf32> to vector<8x8xf32>
    %257 = vector.extract_strided_slice %235 {offsets = [0, 48], sizes = [8, 8], strides = [1, 1]} : vector<16x96xf32> to vector<8x8xf32>
    %258 = vector.extract_strided_slice %235 {offsets = [0, 56], sizes = [8, 8], strides = [1, 1]} : vector<16x96xf32> to vector<8x8xf32>
    %259 = vector.extract_strided_slice %235 {offsets = [8, 32], sizes = [8, 8], strides = [1, 1]} : vector<16x96xf32> to vector<8x8xf32>
    %260 = vector.extract_strided_slice %235 {offsets = [8, 40], sizes = [8, 8], strides = [1, 1]} : vector<16x96xf32> to vector<8x8xf32>
    %261 = vector.extract_strided_slice %235 {offsets = [8, 48], sizes = [8, 8], strides = [1, 1]} : vector<16x96xf32> to vector<8x8xf32>
    %262 = vector.extract_strided_slice %235 {offsets = [8, 56], sizes = [8, 8], strides = [1, 1]} : vector<16x96xf32> to vector<8x8xf32>
    %263 = vector.shape_cast %255 : vector<8x8xf32> to vector<1x8x8xf32>
    %264 = vector.shape_cast %256 : vector<8x8xf32> to vector<1x8x8xf32>
    %265 = vector.shape_cast %257 : vector<8x8xf32> to vector<1x8x8xf32>
    %266 = vector.shape_cast %258 : vector<8x8xf32> to vector<1x8x8xf32>
    %267 = vector.shape_cast %259 : vector<8x8xf32> to vector<1x8x8xf32>
    %268 = vector.shape_cast %260 : vector<8x8xf32> to vector<1x8x8xf32>
    %269 = vector.shape_cast %261 : vector<8x8xf32> to vector<1x8x8xf32>
    %270 = vector.shape_cast %262 : vector<8x8xf32> to vector<1x8x8xf32>
    %271 = tpu.concatenate %263, %264, %265, %266, %267, %268, %269, %270 in 0 : vector<1x8x8xf32>, vector<1x8x8xf32>, vector<1x8x8xf32>, vector<1x8x8xf32>, vector<1x8x8xf32>, vector<1x8x8xf32>, vector<1x8x8xf32>, vector<1x8x8xf32> -> vector<8x8x8xf32>
    %272 = vector.extract_strided_slice %235 {offsets = [0, 64], sizes = [8, 8], strides = [1, 1]} : vector<16x96xf32> to vector<8x8xf32>
    %273 = vector.extract_strided_slice %235 {offsets = [0, 72], sizes = [8, 8], strides = [1, 1]} : vector<16x96xf32> to vector<8x8xf32>
    %274 = vector.extract_strided_slice %235 {offsets = [0, 80], sizes = [8, 8], strides = [1, 1]} : vector<16x96xf32> to vector<8x8xf32>
    %275 = vector.extract_strided_slice %235 {offsets = [0, 88], sizes = [8, 8], strides = [1, 1]} : vector<16x96xf32> to vector<8x8xf32>
    %276 = vector.extract_strided_slice %235 {offsets = [8, 64], sizes = [8, 8], strides = [1, 1]} : vector<16x96xf32> to vector<8x8xf32>
    %277 = vector.extract_strided_slice %235 {offsets = [8, 72], sizes = [8, 8], strides = [1, 1]} : vector<16x96xf32> to vector<8x8xf32>
    %278 = vector.extract_strided_slice %235 {offsets = [8, 80], sizes = [8, 8], strides = [1, 1]} : vector<16x96xf32> to vector<8x8xf32>
    %279 = vector.extract_strided_slice %235 {offsets = [8, 88], sizes = [8, 8], strides = [1, 1]} : vector<16x96xf32> to vector<8x8xf32>
    %280 = vector.shape_cast %272 : vector<8x8xf32> to vector<1x8x8xf32>
    %281 = vector.shape_cast %273 : vector<8x8xf32> to vector<1x8x8xf32>
    %282 = vector.shape_cast %274 : vector<8x8xf32> to vector<1x8x8xf32>
    %283 = vector.shape_cast %275 : vector<8x8xf32> to vector<1x8x8xf32>
    %284 = vector.shape_cast %276 : vector<8x8xf32> to vector<1x8x8xf32>
    %285 = vector.shape_cast %277 : vector<8x8xf32> to vector<1x8x8xf32>
    %286 = vector.shape_cast %278 : vector<8x8xf32> to vector<1x8x8xf32>
    %287 = vector.shape_cast %279 : vector<8x8xf32> to vector<1x8x8xf32>
    %288 = tpu.concatenate %280, %281, %282, %283, %284, %285, %286, %287 in 0 : vector<1x8x8xf32>, vector<1x8x8xf32>, vector<1x8x8xf32>, vector<1x8x8xf32>, vector<1x8x8xf32>, vector<1x8x8xf32>, vector<1x8x8xf32>, vector<1x8x8xf32> -> vector<8x8x8xf32>
    "tpu.trace_start"() <{level = 10 : i32, message = "nqd,nkd->nqk"}> : () -> ()
    %cst_85 = arith.constant dense<0.000000e+00> : vector<8x8x8xf32>
    %289 = tpu.matmul %254, %271, %cst_85 {dimension_numbers = #tpu.dot_dimension_numbers<[2], [2], [1], [1], [0, 0, 0, 1, 1, 1], [0], [0]>} : vector<8x8x8xf32>, vector<8x8x8xf32>, vector<8x8x8xf32> -> vector<8x8x8xf32>
    "tpu.trace_stop"() : () -> ()
    %290 = vector.broadcast %25 : vector<8x1x8xf32> to vector<8x8x8xf32>
    %291 = arith.addf %289, %290 : vector<8x8x8xf32>
    %cst_86 = arith.constant dense<0xFF800000> : vector<8x8xf32>
    %292 = vector.multi_reduction <maximumf>, %291, %cst_86 [2] : vector<8x8x8xf32> to vector<8x8xf32>
    %293 = vector.shape_cast %292 : vector<8x8xf32> to vector<8x8x1xf32>
    %294 = vector.broadcast %293 : vector<8x8x1xf32> to vector<8x8x8xf32>
    %295 = arith.subf %291, %294 : vector<8x8x8xf32>
    %296 = math.exp %295 : vector<8x8x8xf32>
    %cst_87 = arith.constant dense<0.000000e+00> : vector<8x8xf32>
    %297 = vector.multi_reduction <add>, %296, %cst_87 [2] : vector<8x8x8xf32> to vector<8x8xf32>
    %298 = vector.shape_cast %297 : vector<8x8xf32> to vector<8x8x1xf32>
    %299 = tpu.reciprocal %298 {approx = true} : vector<8x8x1xf32> -> vector<8x8x1xf32>
    %300 = vector.broadcast %299 : vector<8x8x1xf32> to vector<8x8x8xf32>
    %301 = arith.mulf %296, %300 : vector<8x8x8xf32>
    "tpu.trace_start"() <{level = 10 : i32, message = "nqk,nkd->nqd"}> : () -> ()
    %cst_88 = arith.constant dense<0.000000e+00> : vector<8x8x8xf32>
    %302 = tpu.matmul %301, %288, %cst_88 {dimension_numbers = #tpu.dot_dimension_numbers<[2], [1], [1], [2], [0, 0, 0, 1, 1, 2], [0], [0]>} : vector<8x8x8xf32>, vector<8x8x8xf32>, vector<8x8x8xf32> -> vector<8x8x8xf32>
    "tpu.trace_stop"() : () -> ()
    %303 = vector.extract_strided_slice %302 {offsets = [0, 0, 0], sizes = [1, 8, 8], strides = [1, 1, 1]} : vector<8x8x8xf32> to vector<1x8x8xf32>
    %304 = vector.shape_cast %303 : vector<1x8x8xf32> to vector<8x8xf32>
    %305 = vector.extract_strided_slice %302 {offsets = [1, 0, 0], sizes = [1, 8, 8], strides = [1, 1, 1]} : vector<8x8x8xf32> to vector<1x8x8xf32>
    %306 = vector.shape_cast %305 : vector<1x8x8xf32> to vector<8x8xf32>
    %307 = vector.extract_strided_slice %302 {offsets = [2, 0, 0], sizes = [1, 8, 8], strides = [1, 1, 1]} : vector<8x8x8xf32> to vector<1x8x8xf32>
    %308 = vector.shape_cast %307 : vector<1x8x8xf32> to vector<8x8xf32>
    %309 = vector.extract_strided_slice %302 {offsets = [3, 0, 0], sizes = [1, 8, 8], strides = [1, 1, 1]} : vector<8x8x8xf32> to vector<1x8x8xf32>
    %310 = vector.shape_cast %309 : vector<1x8x8xf32> to vector<8x8xf32>
    %311 = tpu.concatenate %304, %306, %308, %310 in 1 : vector<8x8xf32>, vector<8x8xf32>, vector<8x8xf32>, vector<8x8xf32> -> vector<8x32xf32>
    %312 = vector.extract_strided_slice %302 {offsets = [4, 0, 0], sizes = [1, 8, 8], strides = [1, 1, 1]} : vector<8x8x8xf32> to vector<1x8x8xf32>
    %313 = vector.shape_cast %312 : vector<1x8x8xf32> to vector<8x8xf32>
    %314 = vector.extract_strided_slice %302 {offsets = [5, 0, 0], sizes = [1, 8, 8], strides = [1, 1, 1]} : vector<8x8x8xf32> to vector<1x8x8xf32>
    %315 = vector.shape_cast %314 : vector<1x8x8xf32> to vector<8x8xf32>
    %316 = vector.extract_strided_slice %302 {offsets = [6, 0, 0], sizes = [1, 8, 8], strides = [1, 1, 1]} : vector<8x8x8xf32> to vector<1x8x8xf32>
    %317 = vector.shape_cast %316 : vector<1x8x8xf32> to vector<8x8xf32>
    %318 = vector.extract_strided_slice %302 {offsets = [7, 0, 0], sizes = [1, 8, 8], strides = [1, 1, 1]} : vector<8x8x8xf32> to vector<1x8x8xf32>
    %319 = vector.shape_cast %318 : vector<1x8x8xf32> to vector<8x8xf32>
    %320 = tpu.concatenate %313, %315, %317, %319 in 1 : vector<8x8xf32>, vector<8x8xf32>, vector<8x8xf32>, vector<8x8xf32> -> vector<8x32xf32>
    %321 = tpu.concatenate %311, %320 in 0 : vector<8x32xf32>, vector<8x32xf32> -> vector<16x32xf32>
    %c1_89 = arith.constant 1 : index
    %c0_90 = arith.constant 0 : index
    %c0_91 = arith.constant 0 : index
    %322 = vector.load %arg8[%c1_89, %c0_90, %c0_91] : memref<2x32x32xf32, #tpu.memory_space<vmem>>, vector<1x32x32xf32>
    %323 = vector.shape_cast %322 : vector<1x32x32xf32> to vector<32x32xf32>
    %c1_92 = arith.constant 1 : index
    %c0_93 = arith.constant 0 : index
    %c0_94 = arith.constant 0 : index
    %324 = vector.load %arg9[%c1_92, %c0_93, %c0_94] : memref<2x1x32xf32, #tpu.memory_space<vmem>>, vector<1x1x32xf32>
    %325 = vector.shape_cast %324 : vector<1x1x32xf32> to vector<1x32xf32>
    %cst_95 = arith.constant dense<0.000000e+00> : vector<16x32xf32>
    %326 = tpu.matmul %321, %323, %cst_95 {dimension_numbers = #tpu.dot_dimension_numbers<[1], [0], [0], [1], [0, 0, 1, 1], [], []>} : vector<16x32xf32>, vector<32x32xf32>, vector<16x32xf32> -> vector<16x32xf32>
    %327 = vector.broadcast %325 : vector<1x32xf32> to vector<16x32xf32>
    %328 = arith.addf %326, %327 : vector<16x32xf32>
    %329 = arith.addf %228, %328 : vector<16x32xf32>
    %c1_96 = arith.constant 1 : index
    %c0_97 = arith.constant 0 : index
    %c0_98 = arith.constant 0 : index
    %330 = vector.load %arg10[%c1_96, %c0_97, %c0_98] : memref<2x1x32xf32, #tpu.memory_space<vmem>>, vector<1x1x32xf32>
    %331 = vector.shape_cast %330 : vector<1x1x32xf32> to vector<1x32xf32>
    %c1_99 = arith.constant 1 : index
    %c0_100 = arith.constant 0 : index
    %c0_101 = arith.constant 0 : index
    %332 = vector.load %arg11[%c1_99, %c0_100, %c0_101] : memref<2x1x32xf32, #tpu.memory_space<vmem>>, vector<1x1x32xf32>
    %333 = vector.shape_cast %332 : vector<1x1x32xf32> to vector<1x32xf32>
    %cst_102 = arith.constant dense<0.000000e+00> : vector<16xf32>
    %334 = vector.multi_reduction <add>, %329, %cst_102 [1] : vector<16x32xf32> to vector<16xf32>
    %335 = vector.shape_cast %334 : vector<16xf32> to vector<16x1xf32>
    %cst_103 = arith.constant 3.200000e+01 : f32
    %336 = vector.broadcast %cst_103 : f32 to vector<16x1xf32>
    %337 = arith.divf %335, %336 : vector<16x1xf32>
    %338 = vector.broadcast %337 : vector<16x1xf32> to vector<16x32xf32>
    %339 = arith.subf %329, %338 : vector<16x32xf32>
    %340 = arith.mulf %339, %339 : vector<16x32xf32>
    %cst_104 = arith.constant dense<0.000000e+00> : vector<16xf32>
    %341 = vector.multi_reduction <add>, %340, %cst_104 [1] : vector<16x32xf32> to vector<16xf32>
    %342 = vector.shape_cast %341 : vector<16xf32> to vector<16x1xf32>
    %cst_105 = arith.constant 3.200000e+01 : f32
    %343 = vector.broadcast %cst_105 : f32 to vector<16x1xf32>
    %344 = arith.divf %342, %343 : vector<16x1xf32>
    %345 = vector.broadcast %337 : vector<16x1xf32> to vector<16x32xf32>
    %346 = arith.subf %329, %345 : vector<16x32xf32>
    %cst_106 = arith.constant 9.99999974E-6 : f32
    %347 = vector.broadcast %cst_106 : f32 to vector<16x1xf32>
    %348 = arith.addf %344, %347 : vector<16x1xf32>
    %349 = math.rsqrt %348 : vector<16x1xf32>
    %350 = vector.broadcast %349 : vector<16x1xf32> to vector<16x32xf32>
    %351 = arith.mulf %346, %350 : vector<16x32xf32>
    %352 = vector.broadcast %331 : vector<1x32xf32> to vector<16x32xf32>
    %353 = arith.mulf %351, %352 : vector<16x32xf32>
    %354 = vector.broadcast %333 : vector<1x32xf32> to vector<16x32xf32>
    %355 = arith.addf %353, %354 : vector<16x32xf32>
    %c1_107 = arith.constant 1 : index
    %c0_108 = arith.constant 0 : index
    %c0_109 = arith.constant 0 : index
    %356 = vector.load %arg12[%c1_107, %c0_108, %c0_109] : memref<2x32x64xf32, #tpu.memory_space<vmem>>, vector<1x32x64xf32>
    %357 = vector.shape_cast %356 : vector<1x32x64xf32> to vector<32x64xf32>
    %c1_110 = arith.constant 1 : index
    %c0_111 = arith.constant 0 : index
    %c0_112 = arith.constant 0 : index
    %358 = vector.load %arg13[%c1_110, %c0_111, %c0_112] : memref<2x1x64xf32, #tpu.memory_space<vmem>>, vector<1x1x64xf32>
    %359 = vector.shape_cast %358 : vector<1x1x64xf32> to vector<1x64xf32>
    %cst_113 = arith.constant dense<0.000000e+00> : vector<16x64xf32>
    %360 = tpu.matmul %355, %357, %cst_113 {dimension_numbers = #tpu.dot_dimension_numbers<[1], [0], [0], [1], [0, 0, 1, 1], [], []>} : vector<16x32xf32>, vector<32x64xf32>, vector<16x64xf32> -> vector<16x64xf32>
    %361 = vector.broadcast %359 : vector<1x64xf32> to vector<16x64xf32>
    %362 = arith.addf %360, %361 : vector<16x64xf32>
    %cst_114 = arith.constant 0.000000e+00 : f32
    %363 = vector.broadcast %cst_114 : f32 to vector<16x64xf32>
    %364 = arith.maximumf %362, %363 : vector<16x64xf32>
    %c1_115 = arith.constant 1 : index
    %c0_116 = arith.constant 0 : index
    %c0_117 = arith.constant 0 : index
    %365 = vector.load %arg14[%c1_115, %c0_116, %c0_117] : memref<2x64x32xf32, #tpu.memory_space<vmem>>, vector<1x64x32xf32>
    %366 = vector.shape_cast %365 : vector<1x64x32xf32> to vector<64x32xf32>
    %c1_118 = arith.constant 1 : index
    %c0_119 = arith.constant 0 : index
    %c0_120 = arith.constant 0 : index
    %367 = vector.load %arg15[%c1_118, %c0_119, %c0_120] : memref<2x1x32xf32, #tpu.memory_space<vmem>>, vector<1x1x32xf32>
    %368 = vector.shape_cast %367 : vector<1x1x32xf32> to vector<1x32xf32>
    %cst_121 = arith.constant dense<0.000000e+00> : vector<16x32xf32>
    %369 = tpu.matmul %364, %366, %cst_121 {dimension_numbers = #tpu.dot_dimension_numbers<[1], [0], [0], [1], [0, 0, 1, 1], [], []>} : vector<16x64xf32>, vector<64x32xf32>, vector<16x32xf32> -> vector<16x32xf32>
    %370 = vector.broadcast %368 : vector<1x32xf32> to vector<16x32xf32>
    %371 = arith.addf %369, %370 : vector<16x32xf32>
    %372 = arith.addf %355, %371 : vector<16x32xf32>
    %c1_122 = arith.constant 1 : index
    %c0_123 = arith.constant 0 : index
    %c0_124 = arith.constant 0 : index
    %373 = vector.load %arg16[%c1_122, %c0_123, %c0_124] : memref<2x1x32xf32, #tpu.memory_space<vmem>>, vector<1x1x32xf32>
    %374 = vector.shape_cast %373 : vector<1x1x32xf32> to vector<1x32xf32>
    %c1_125 = arith.constant 1 : index
    %c0_126 = arith.constant 0 : index
    %c0_127 = arith.constant 0 : index
    %375 = vector.load %arg17[%c1_125, %c0_126, %c0_127] : memref<2x1x32xf32, #tpu.memory_space<vmem>>, vector<1x1x32xf32>
    %376 = vector.shape_cast %375 : vector<1x1x32xf32> to vector<1x32xf32>
    %cst_128 = arith.constant dense<0.000000e+00> : vector<16xf32>
    %377 = vector.multi_reduction <add>, %372, %cst_128 [1] : vector<16x32xf32> to vector<16xf32>
    %378 = vector.shape_cast %377 : vector<16xf32> to vector<16x1xf32>
    %cst_129 = arith.constant 3.200000e+01 : f32
    %379 = vector.broadcast %cst_129 : f32 to vector<16x1xf32>
    %380 = arith.divf %378, %379 : vector<16x1xf32>
    %381 = vector.broadcast %380 : vector<16x1xf32> to vector<16x32xf32>
    %382 = arith.subf %372, %381 : vector<16x32xf32>
    %383 = arith.mulf %382, %382 : vector<16x32xf32>
    %cst_130 = arith.constant dense<0.000000e+00> : vector<16xf32>
    %384 = vector.multi_reduction <add>, %383, %cst_130 [1] : vector<16x32xf32> to vector<16xf32>
    %385 = vector.shape_cast %384 : vector<16xf32> to vector<16x1xf32>
    %cst_131 = arith.constant 3.200000e+01 : f32
    %386 = vector.broadcast %cst_131 : f32 to vector<16x1xf32>
    %387 = arith.divf %385, %386 : vector<16x1xf32>
    %388 = vector.broadcast %380 : vector<16x1xf32> to vector<16x32xf32>
    %389 = arith.subf %372, %388 : vector<16x32xf32>
    %cst_132 = arith.constant 9.99999974E-6 : f32
    %390 = vector.broadcast %cst_132 : f32 to vector<16x1xf32>
    %391 = arith.addf %387, %390 : vector<16x1xf32>
    %392 = math.rsqrt %391 : vector<16x1xf32>
    %393 = vector.broadcast %392 : vector<16x1xf32> to vector<16x32xf32>
    %394 = arith.mulf %389, %393 : vector<16x32xf32>
    %395 = vector.broadcast %374 : vector<1x32xf32> to vector<16x32xf32>
    %396 = arith.mulf %394, %395 : vector<16x32xf32>
    %397 = vector.broadcast %376 : vector<1x32xf32> to vector<16x32xf32>
    %398 = arith.addf %396, %397 : vector<16x32xf32>
    %399 = vector.extract_strided_slice %398 {offsets = [7, 0], sizes = [1, 32], strides = [1, 1]} : vector<16x32xf32> to vector<1x32xf32>
    %400 = vector.extract_strided_slice %398 {offsets = [15, 0], sizes = [1, 32], strides = [1, 1]} : vector<16x32xf32> to vector<1x32xf32>
    %401 = tpu.concatenate %399, %400 in 0 : vector<1x32xf32>, vector<1x32xf32> -> vector<2x32xf32>
    %c0_133 = arith.constant 0 : index
    %c0_134 = arith.constant 0 : index
    %402 = vector.load %arg18[%c0_133, %c0_134] : memref<1x32xf32, #tpu.memory_space<vmem>>, vector<1x32xf32>
    %c0_135 = arith.constant 0 : index
    %c0_136 = arith.constant 0 : index
    %403 = vector.load %arg19[%c0_135, %c0_136] : memref<1x32xf32, #tpu.memory_space<vmem>>, vector<1x32xf32>
    %cst_137 = arith.constant dense<0.000000e+00> : vector<2xf32>
    %404 = vector.multi_reduction <add>, %401, %cst_137 [1] : vector<2x32xf32> to vector<2xf32>
    %405 = vector.shape_cast %404 : vector<2xf32> to vector<2x1xf32>
    %cst_138 = arith.constant 3.200000e+01 : f32
    %406 = vector.broadcast %cst_138 : f32 to vector<2x1xf32>
    %407 = arith.divf %405, %406 : vector<2x1xf32>
    %408 = vector.broadcast %407 : vector<2x1xf32> to vector<2x32xf32>
    %409 = arith.subf %401, %408 : vector<2x32xf32>
    %410 = arith.mulf %409, %409 : vector<2x32xf32>
    %cst_139 = arith.constant dense<0.000000e+00> : vector<2xf32>
    %411 = vector.multi_reduction <add>, %410, %cst_139 [1] : vector<2x32xf32> to vector<2xf32>
    %412 = vector.shape_cast %411 : vector<2xf32> to vector<2x1xf32>
    %cst_140 = arith.constant 3.200000e+01 : f32
    %413 = vector.broadcast %cst_140 : f32 to vector<2x1xf32>
    %414 = arith.divf %412, %413 : vector<2x1xf32>
    %415 = vector.broadcast %407 : vector<2x1xf32> to vector<2x32xf32>
    %416 = arith.subf %401, %415 : vector<2x32xf32>
    %cst_141 = arith.constant 9.99999974E-6 : f32
    %417 = vector.broadcast %cst_141 : f32 to vector<2x1xf32>
    %418 = arith.addf %414, %417 : vector<2x1xf32>
    %419 = math.rsqrt %418 : vector<2x1xf32>
    %420 = vector.broadcast %419 : vector<2x1xf32> to vector<2x32xf32>
    %421 = arith.mulf %416, %420 : vector<2x32xf32>
    %422 = vector.broadcast %402 : vector<1x32xf32> to vector<2x32xf32>
    %423 = arith.mulf %421, %422 : vector<2x32xf32>
    %424 = vector.broadcast %403 : vector<1x32xf32> to vector<2x32xf32>
    %425 = arith.addf %423, %424 : vector<2x32xf32>
    %c0_142 = arith.constant 0 : index
    %c0_143 = arith.constant 0 : index
    %426 = vector.load %arg20[%c0_142, %c0_143] : memref<32x16xf32, #tpu.memory_space<vmem>>, vector<32x16xf32>
    %c0_144 = arith.constant 0 : index
    %c0_145 = arith.constant 0 : index
    %427 = vector.load %arg21[%c0_144, %c0_145] : memref<1x16xf32, #tpu.memory_space<vmem>>, vector<1x16xf32>
    %cst_146 = arith.constant dense<0.000000e+00> : vector<2x16xf32>
    %428 = tpu.matmul %425, %426, %cst_146 {dimension_numbers = #tpu.dot_dimension_numbers<[1], [0], [0], [1], [0, 0, 1, 1], [], []>} : vector<2x32xf32>, vector<32x16xf32>, vector<2x16xf32> -> vector<2x16xf32>
    %429 = vector.broadcast %427 : vector<1x16xf32> to vector<2x16xf32>
    %430 = arith.addf %428, %429 : vector<2x16xf32>
    %c0_147 = arith.constant 0 : index
    %c0_148 = arith.constant 0 : index
    %431 = vector.load %arg22[%c0_147, %c0_148] : memref<1x16xf32, #tpu.memory_space<vmem>>, vector<1x16xf32>
    %c0_149 = arith.constant 0 : index
    %c0_150 = arith.constant 0 : index
    %432 = vector.load %arg23[%c0_149, %c0_150] : memref<1x16xf32, #tpu.memory_space<vmem>>, vector<1x16xf32>
    %cst_151 = arith.constant dense<0.000000e+00> : vector<2xf32>
    %433 = vector.multi_reduction <add>, %430, %cst_151 [1] : vector<2x16xf32> to vector<2xf32>
    %434 = vector.shape_cast %433 : vector<2xf32> to vector<2x1xf32>
    %cst_152 = arith.constant 1.600000e+01 : f32
    %435 = vector.broadcast %cst_152 : f32 to vector<2x1xf32>
    %436 = arith.divf %434, %435 : vector<2x1xf32>
    %437 = vector.broadcast %436 : vector<2x1xf32> to vector<2x16xf32>
    %438 = arith.subf %430, %437 : vector<2x16xf32>
    %439 = arith.mulf %438, %438 : vector<2x16xf32>
    %cst_153 = arith.constant dense<0.000000e+00> : vector<2xf32>
    %440 = vector.multi_reduction <add>, %439, %cst_153 [1] : vector<2x16xf32> to vector<2xf32>
    %441 = vector.shape_cast %440 : vector<2xf32> to vector<2x1xf32>
    %cst_154 = arith.constant 1.600000e+01 : f32
    %442 = vector.broadcast %cst_154 : f32 to vector<2x1xf32>
    %443 = arith.divf %441, %442 : vector<2x1xf32>
    %444 = vector.broadcast %436 : vector<2x1xf32> to vector<2x16xf32>
    %445 = arith.subf %430, %444 : vector<2x16xf32>
    %cst_155 = arith.constant 9.99999974E-6 : f32
    %446 = vector.broadcast %cst_155 : f32 to vector<2x1xf32>
    %447 = arith.addf %443, %446 : vector<2x1xf32>
    %448 = math.rsqrt %447 : vector<2x1xf32>
    %449 = vector.broadcast %448 : vector<2x1xf32> to vector<2x16xf32>
    %450 = arith.mulf %445, %449 : vector<2x16xf32>
    %451 = vector.broadcast %431 : vector<1x16xf32> to vector<2x16xf32>
    %452 = arith.mulf %450, %451 : vector<2x16xf32>
    %453 = vector.broadcast %432 : vector<1x16xf32> to vector<2x16xf32>
    %454 = arith.addf %452, %453 : vector<2x16xf32>
    %cst_156 = arith.constant 0.000000e+00 : f32
    %455 = vector.broadcast %cst_156 : f32 to vector<2x16xf32>
    %456 = arith.maximumf %454, %455 : vector<2x16xf32>
    %c0_157 = arith.constant 0 : index
    %c0_158 = arith.constant 0 : index
    %457 = vector.load %arg24[%c0_157, %c0_158] : memref<16x8xf32, #tpu.memory_space<vmem>>, vector<16x8xf32>
    %c0_159 = arith.constant 0 : index
    %c0_160 = arith.constant 0 : index
    %458 = vector.load %arg25[%c0_159, %c0_160] : memref<1x8xf32, #tpu.memory_space<vmem>>, vector<1x8xf32>
    %cst_161 = arith.constant dense<0.000000e+00> : vector<2x8xf32>
    %459 = tpu.matmul %456, %457, %cst_161 {dimension_numbers = #tpu.dot_dimension_numbers<[1], [0], [0], [1], [0, 0, 1, 1], [], []>} : vector<2x16xf32>, vector<16x8xf32>, vector<2x8xf32> -> vector<2x8xf32>
    %460 = vector.broadcast %458 : vector<1x8xf32> to vector<2x8xf32>
    %461 = arith.addf %459, %460 : vector<2x8xf32>
    %c0_162 = arith.constant 0 : index
    %c0_163 = arith.constant 0 : index
    %462 = vector.load %arg26[%c0_162, %c0_163] : memref<2x8xf32, #tpu.memory_space<vmem>>, vector<2x8xf32>
    tpu.vector_store %arg26[%c0_162, %c0_163], %461 {strides = array<i32>} : memref<2x8xf32, #tpu.memory_space<vmem>>, vector<2x8xf32>,
    return
  }
}

</mosaic_0001>

<bundles_post_ra>
// kernel: tpu_custom_call.1
= control target key start
LH: loop header
LB: loop body
LE: loop exit
PB: predicated region body
PF: predicated region fallthrough
CT: control target
= control target key end

     0   :  { %s6434_s0 = inlined_call_operand.vmem [shape: f32[16,16], index: 0, kind: input, shape index: {}]   ;;  %s6435_s1 = inlined_call_operand.vmem [shape: f32[16,32], index: 1, kind: input, shape index: {}]   ;;  %s6436_s2 = inlined_call_operand.hbm [shape: f32[1,16], index: 2, kind: input, shape index: {}]   ;;  %s6437_s3 = inlined_call_operand.hbm [shape: f32[1,16], index: 3, kind: input, shape index: {}]   ;;  %s6438_s4 = inlined_call_operand.vmem [shape: f32[16,32], index: 4, kind: input, shape index: {}]   ;;  %s6439_s5 = inlined_call_operand.hbm [shape: f32[1,32], index: 5, kind: input, shape index: {}]   ;;  %s6440_s6 = inlined_call_operand.vmem [shape: f32[2,32,96], index: 6, kind: input, shape index: {}]   ;;  %s6441_s7 = inlined_call_operand.hbm [shape: f32[2,1,96], index: 7, kind: input, shape index: {}]   ;;  %s6442_s8 = inlined_call_operand.vmem [shape: f32[2,32,32], index: 8, kind: input, shape index: {}]   ;;  %s6443_s9 = inlined_call_operand.hbm [shape: f32[2,1,32], index: 9, kind: input, shape index: {}]   ;;  %s6444_s10 = inlined_call_operand.hbm [shape: f32[2,1,32], index: 10, kind: input, shape index: {}]   ;;  %s6445_s11 = inlined_call_operand.hbm [shape: f32[2,1,32], index: 11, kind: input, shape index: {}]   ;;  %s6446_s12 = inlined_call_operand.vmem [shape: f32[2,32,64], index: 12, kind: input, shape index: {}]   ;;  %s6447_s13 = inlined_call_operand.hbm [shape: f32[2,1,64], index: 13, kind: input, shape index: {}]   ;;  %s6448_s14 = inlined_call_operand.vmem [shape: f32[2,64,32], index: 14, kind: input, shape index: {}]   ;;  %s6449_s15 = inlined_call_operand.hbm [shape: f32[2,1,32], index: 15, kind: input, shape index: {}]   ;;  %s6450_s16 = inlined_call_operand.hbm [shape: f32[2,1,32], index: 16, kind: input, shape index: {}]   ;;  %s6451_s17 = inlined_call_operand.hbm [shape: f32[2,1,32], index: 17, kind: input, shape index: {}]   ;;  %s6452_s18 = inlined_call_operand.vmem [shape: f32[1,32], index: 18, kind: input, shape index: {}]   ;;  %s6453_s19 = inlined_call_operand.vmem [shape: f32[1,32], index: 19, kind: input, shape index: {}]   ;;  %s6454_s20 = inlined_call_operand.vmem [shape: f32[32,16], index: 20, kind: input, shape index: {}]   ;;  %s6455_s21 = inlined_call_operand.vmem [shape: f32[1,16], index: 21, kind: input, shape index: {}]   ;;  %s6456_s22 = inlined_call_operand.vmem [shape: f32[1,16], index: 22, kind: input, shape index: {}]   ;;  %s6457_s23 = inlined_call_operand.vmem [shape: f32[1,16], index: 23, kind: input, shape index: {}]   ;;  %s6458_s24 = inlined_call_operand.vmem [shape: f32[16,8], index: 24, kind: input, shape index: {}]   ;;  %s6459_s25 = inlined_call_operand.vmem [shape: f32[1,8], index: 25, kind: input, shape index: {}]   ;;  %s6460_s26 = inlined_call_operand.hbm [shape: f32[2,8], index: 26, kind: output, shape index: {}]  }
   0x1   :  { %6473 = sst [smem:[#allocation28_spill]] %s6434_s0 }
   0x2   :  { %6474 = sst [smem:[#allocation29_spill]] %s6435_s1 }
   0x3   :  { %6475 = sst [smem:[#allocation30_spill]] %s6436_s2 }
   0x4   :  { %6476 = sst [smem:[#allocation31_spill]] %s6437_s3 }
   0x5   :  { %6477 = sst [smem:[#allocation32_spill]] %s6438_s4 }
   0x6   :  { %6478 = sst [smem:[#allocation33_spill]] %s6439_s5 }
   0x7   :  { %6479 = sst [smem:[#allocation34_spill]] %s6440_s6 }
   0x8   :  { %6480 = sst [smem:[#allocation35_spill]] %s6441_s7 }
   0x9   :  { %6481 = sst [smem:[#allocation36_spill]] %s6442_s8 }
   0xa   :  { %6482 = sst [smem:[#allocation37_spill]] %s6443_s9 }
   0xb   :  { %6483 = sst [smem:[#allocation38_spill]] %s6444_s10 }
   0xc   :  { %6484 = sst [smem:[#allocation39_spill]] %s6457_s23 }
   0xd   :  { %6485 = sst [smem:[#allocation40_spill]] %s6459_s25 }
   0xe   :  { %6486 = sst [smem:[#allocation41_spill]] %s6460_s26 }
   0xf   :  { %31 = vsyncpa [#allocation3], 0 }
  0x10   :  { %32 = vsyncpa [#allocation6], 0 }
  0x11   :  { %33 = vsyncpa [#allocation9], 0 }
  0x12   :  { %34 = vsyncpa [#allocation12], 0 }
  0x13   :  { %35 = vsyncpa [#allocation15], 0 }
  0x14   :  { %36 = vsyncpa [#allocation18], 0 }
  0x15   :  { %37 = vsyncpa [#allocation4], 0  ;;  %s5447_s27 = smov [#allocation5]   ;;  %s5448_s7 = smov [#allocation8]  }
  0x16   :  { %s58_s3 = sshll.u32 %s5447_s27, 4  ;;  %s81_s28 = sshll.u32 %s5448_s7, 4  ;;  %s59_s3 = int_to_ptr.vmem [resolvable:$true] %s58_s3  ;;  %s5607_s28 = int_to_ptr.vmem [resolvable:$true] %s81_s28 }
  0x17   :  { %s6487_s29 = sld [smem:[#allocation31_spill]] }
  0x1d   :  { %s5169_s0 = scalar_lea.hbm %s6487_s29, 16 }
  0x1e   :  { %p5170_p0 = scmp.ne.s32.totalorder %s6487_s29, %s5169_s0  ;;  %p5173_p1 = scmp.lt.u32.totalorder %s5169_s0, %s6487_s29 }
  0x20   :  { %p5175_p2 = pnand %p5173_p1, %p5170_p0 }
  0x22   :  { %5178 = shalt.err (!%p5175_p2)
}
  0x23   :  { %s5179_s10 = scalar_lea.vmem %s59_s3, 16  ;;  %s5183_s6 = scalar_lea.vmem %s59_s3, 32 }
  0x24   :  { %p5180_p3 = scmp.ne.s32.totalorder %s59_s3, %s5179_s10  ;;  %p5184_p4 = scmp.lt.s32.totalorder %s59_s3, %s59_s3 }
  0x25   :  { %p5185_p5 = scmp.lt.s32.totalorder %s5183_s6, %s5179_s10 }
  0x27   :  { %p5186_p6 = por %p5185_p5, %p5184_p4 }
  0x29   :  { %p5187_p7 = pnand %p5186_p6, %p5180_p3 }
  0x2b   :  { %5190 = shalt.err (!%p5187_p7)
}
  0x2c   :  { %61 = dma.hbm_to_vmem [thread:$0]  %s6487_s29, 16, %s59_s3, [#allocation6]  }
  0x2d   :  { %s6488_s4 = sld [smem:[#allocation35_spill]] }
  0x33   :  { %s5191_s9 = scalar_lea.hbm %s6488_s4, 32 }
  0x34   :  { %p5192_p8 = scmp.ne.s32.totalorder %s6488_s4, %s5191_s9  ;;  %p5195_p9 = scmp.lt.u32.totalorder %s5191_s9, %s6488_s4 }
  0x36   :  { %p5197_p10 = pnand %p5195_p9, %p5192_p8 }
  0x38   :  { %5200 = shalt.err (!%p5197_p10)
}
  0x39   :  { %s5201_s10 = scalar_lea.vmem %s5607_s28, 32  ;;  %p5206_p12 = scmp.lt.s32.totalorder %s5607_s28, %s5607_s28 }
  0x3a   :  { %p5202_p11 = scmp.ne.s32.totalorder %s5607_s28, %s5201_s10  ;;  %p5207_p13 = scmp.lt.s32.totalorder %s5201_s10, %s5201_s10 }
  0x3c   :  { %p5208_p0 = por %p5207_p13, %p5206_p12 }
  0x3e   :  { %p5209_p1 = pnand %p5208_p0, %p5202_p11 }
  0x40   :  { %5212 = shalt.err (!%p5209_p1)
}
  0x41   :  { %s5449_s3 = smov 16   ;;  %s5450_s29 = smov 1  }
  0x42   :  { %87 = dma.hbm_to_vmem [thread:$0]  %s6488_s4, 32, %s5607_s28, [#allocation9], %s5449_s3, %s5449_s3, %s5450_s29  }
  0x43   :  { %s5451_s27 = smov [#allocation11]   ;;  %s5452_s8 = smov [#allocation14]  }
  0x44   :  { %s107_s7 = sshll.u32 %s5451_s27, 4  ;;  %s133_s9 = sshll.u32 %s5452_s8, 4  ;;  %s108_s7 = int_to_ptr.vmem [resolvable:$true] %s107_s7  ;;  %s5641_s9 = int_to_ptr.vmem [resolvable:$true] %s133_s9 }
  0x45   :  { %s6489_s2 = sld [smem:[#allocation38_spill]] }
  0x4b   :  { %s5213_s5 = scalar_lea.hbm %s6489_s2, 32 }
  0x4c   :  { %p5214_p2 = scmp.ne.s32.totalorder %s6489_s2, %s5213_s5  ;;  %p5217_p3 = scmp.lt.u32.totalorder %s5213_s5, %s6489_s2 }
  0x4e   :  { %p5219_p4 = pnand %p5217_p3, %p5214_p2 }
  0x50   :  { %5222 = shalt.err (!%p5219_p4)
}
  0x51   :  { %s5223_s28 = scalar_lea.vmem %s108_s7, 32  ;;  %p5228_p6 = scmp.lt.s32.totalorder %s108_s7, %s108_s7 }
  0x52   :  { %p5224_p5 = scmp.ne.s32.totalorder %s108_s7, %s5223_s28  ;;  %p5229_p7 = scmp.lt.s32.totalorder %s5223_s28, %s5223_s28 }
  0x54   :  { %p5230_p8 = por %p5229_p7, %p5228_p6 }
  0x56   :  { %p5231_p9 = pnand %p5230_p8, %p5224_p5 }
  0x58   :  { %5234 = shalt.err (!%p5231_p9)
}
  0x59   :  { %113 = dma.hbm_to_vmem [thread:$0]  %s6489_s2, 32, %s108_s7, [#allocation12], %s5449_s3, %s5449_s3, %s5450_s29  }
  0x5a   :  { %s5235_s23 = scalar_lea.hbm %s6447_s13, 32 }
  0x5b   :  { %p5236_p10 = scmp.ne.s32.totalorder %s6447_s13, %s5235_s23  ;;  %p5239_p11 = scmp.lt.u32.totalorder %s5235_s23, %s6447_s13 }
  0x5d   :  { %p5241_p12 = pnand %p5239_p11, %p5236_p10 }
  0x5f   :  { %5244 = shalt.err (!%p5241_p12)
}
  0x60   :  { %s5245_s0 = scalar_lea.vmem %s5641_s9, 32  ;;  %p5250_p0 = scmp.lt.s32.totalorder %s5641_s9, %s5641_s9 }
  0x61   :  { %p5246_p13 = scmp.ne.s32.totalorder %s5641_s9, %s5245_s0  ;;  %p5251_p1 = scmp.lt.s32.totalorder %s5245_s0, %s5245_s0 }
  0x63   :  { %p5252_p2 = por %p5251_p1, %p5250_p0 }
  0x65   :  { %p5253_p3 = pnand %p5252_p2, %p5246_p13 }
  0x67   :  { %5256 = shalt.err (!%p5253_p3)
}
  0x68   :  { %139 = dma.hbm_to_vmem [thread:$0]  %s6447_s13, 32, %s5641_s9, [#allocation15], %s5449_s3, %s5449_s3, %s5450_s29  }
  0x69   :  { %s5453_s5 = smov [#allocation17]   ;;  %s5454_s28 = smov [#allocation2]  }
  0x6a   :  { %s159_s10 = sshll.u32 %s5453_s5, 4  ;;  %s48_s4 = sshll.u32 %s5454_s28, 4  ;;  %s160_s10 = int_to_ptr.vmem [resolvable:$true] %s159_s10  ;;  %s49_s4 = int_to_ptr.vmem [resolvable:$true] %s48_s4 }
  0x6b   :  { %s5257_s1 = scalar_lea.hbm %s6450_s16, 32 }
  0x6c   :  { %p5258_p4 = scmp.ne.s32.totalorder %s6450_s16, %s5257_s1  ;;  %p5261_p5 = scmp.lt.u32.totalorder %s5257_s1, %s6450_s16 }
  0x6e   :  { %p5263_p6 = pnand %p5261_p5, %p5258_p4 }
  0x70   :  { %5266 = shalt.err (!%p5263_p6)
}
  0x71   :  { %s5267_s13 = scalar_lea.vmem %s160_s10, 32  ;;  %p5272_p8 = scmp.lt.s32.totalorder %s160_s10, %s160_s10 }
  0x72   :  { %p5268_p7 = scmp.ne.s32.totalorder %s160_s10, %s5267_s13  ;;  %p5273_p9 = scmp.lt.s32.totalorder %s5267_s13, %s5267_s13 }
  0x74   :  { %p5274_p10 = por %p5273_p9, %p5272_p8 }
  0x76   :  { %p5275_p11 = pnand %p5274_p10, %p5268_p7 }
  0x78   :  { %5278 = shalt.err (!%p5275_p11)
}
  0x79   :  { %165 = dma.hbm_to_vmem [thread:$0]  %s6450_s16, 32, %s160_s10, [#allocation18], %s5449_s3, %s5449_s3, %s5450_s29  }
  0x7a   :  { %s6490_s2 = sld [smem:[#allocation30_spill]] }
  0x80   :  { %s5279_s5 = scalar_lea.hbm %s6490_s2, 16 }
  0x81   :  { %p5280_p12 = scmp.ne.s32.totalorder %s6490_s2, %s5279_s5  ;;  %p5283_p13 = scmp.lt.u32.totalorder %s5279_s5, %s6490_s2 }
  0x83   :  { %p5285_p0 = pnand %p5283_p13, %p5280_p12 }
  0x85   :  { %5288 = shalt.err (!%p5285_p0)
}
  0x86   :  { %s5289_s23 = scalar_lea.vmem %s49_s4, 16  ;;  %s5293_s25 = scalar_lea.vmem %s49_s4, 32 }
  0x87   :  { %p5290_p1 = scmp.ne.s32.totalorder %s49_s4, %s5289_s23  ;;  %p5294_p2 = scmp.lt.s32.totalorder %s49_s4, %s49_s4 }
  0x88   :  { %p5295_p3 = scmp.lt.s32.totalorder %s5293_s25, %s5289_s23 }
  0x8a   :  { %p5296_p4 = por %p5295_p3, %p5294_p2 }
  0x8c   :  { %p5297_p5 = pnand %p5296_p4, %p5290_p1 }
  0x8e   :  { %5300 = shalt.err (!%p5297_p5)
}
  0x8f   :  { %51 = dma.hbm_to_vmem [thread:$0]  %s6490_s2, 16, %s49_s4, [#allocation3]  }
  0x90   :  { %s5455_s27 = smov [#allocation7]   ;;  %s5456_s13 = smov [#allocation10]  }
  0x91   :  { %s70_s8 = sshll.u32 %s5455_s27, 4  ;;  %s95_s9 = sshll.u32 %s5456_s13, 4  ;;  %s71_s8 = int_to_ptr.vmem [resolvable:$true] %s70_s8  ;;  %s5705_s9 = int_to_ptr.vmem [resolvable:$true] %s95_s9 }
  0x92   :  { %s6491_s7 = sld [smem:[#allocation33_spill]] }
  0x98   :  { %s5301_s5 = scalar_lea.hbm %s6491_s7, 16 }
  0x99   :  { %p5302_p6 = scmp.ne.s32.totalorder %s6491_s7, %s5301_s5  ;;  %p5305_p7 = scmp.lt.u32.totalorder %s5301_s5, %s6491_s7 }
  0x9b   :  { %p5307_p8 = pnand %p5305_p7, %p5302_p6 }
  0x9d   :  { %5310 = shalt.err (!%p5307_p8)
}
  0x9e   :  { %s5311_s4 = scalar_lea.vmem %s71_s8, 16  ;;  %s5315_s2 = scalar_lea.vmem %s71_s8, 32 }
  0x9f   :  { %p5312_p9 = scmp.ne.s32.totalorder %s71_s8, %s5311_s4  ;;  %p5316_p10 = scmp.lt.s32.totalorder %s71_s8, %s71_s8 }
  0xa0   :  { %p5317_p11 = scmp.lt.s32.totalorder %s5315_s2, %s5311_s4 }
  0xa2   :  { %p5318_p12 = por %p5317_p11, %p5316_p10 }
  0xa4   :  { %p5319_p13 = pnand %p5318_p12, %p5312_p9 }
  0xa6   :  { %5322 = shalt.err (!%p5319_p13)
}
  0xa7   :  { %73 = dma.hbm_to_vmem [thread:$0]  %s6491_s7, 16, %s71_s8, [#allocation6]  }
  0xa8   :  { %s6492_s27 = sld [smem:[#allocation37_spill]] }
  0xae   :  { %s5323_s13 = scalar_lea.hbm %s6492_s27, 32 }
  0xaf   :  { %p5324_p0 = scmp.ne.s32.totalorder %s6492_s27, %s5323_s13  ;;  %p5327_p1 = scmp.lt.u32.totalorder %s5323_s13, %s6492_s27 }
  0xb1   :  { %p5329_p2 = pnand %p5327_p1, %p5324_p0 }
  0xb3   :  { %5332 = shalt.err (!%p5329_p2)
}
  0xb4   :  { %s5333_s6 = scalar_lea.vmem %s5705_s9, 32  ;;  %p5338_p4 = scmp.lt.s32.totalorder %s5705_s9, %s5705_s9 }
  0xb5   :  { %p5334_p3 = scmp.ne.s32.totalorder %s5705_s9, %s5333_s6  ;;  %p5339_p5 = scmp.lt.s32.totalorder %s5333_s6, %s5333_s6 }
  0xb7   :  { %p5340_p6 = por %p5339_p5, %p5338_p4 }
  0xb9   :  { %p5341_p7 = pnand %p5340_p6, %p5334_p3 }
  0xbb   :  { %5344 = shalt.err (!%p5341_p7)
}
  0xbc   :  { %101 = dma.hbm_to_vmem [thread:$0]  %s6492_s27, 32, %s5705_s9, [#allocation9], %s5449_s3, %s5449_s3, %s5450_s29  }
  0xbd   :  { %s5457_s26 = smov [#allocation13]   ;;  %s5458_s4 = smov [#allocation16]  }
  0xbe   :  { %s119_s1 = sshll.u32 %s5457_s26, 4  ;;  %s147_s2 = sshll.u32 %s5458_s4, 4  ;;  %s120_s1 = int_to_ptr.vmem [resolvable:$true] %s119_s1  ;;  %s5739_s2 = int_to_ptr.vmem [resolvable:$true] %s147_s2 }
  0xbf   :  { %s5345_s16 = scalar_lea.hbm %s6445_s11, 32 }
  0xc0   :  { %p5346_p8 = scmp.ne.s32.totalorder %s6445_s11, %s5345_s16  ;;  %p5349_p9 = scmp.lt.u32.totalorder %s5345_s16, %s6445_s11 }
  0xc2   :  { %p5351_p10 = pnand %p5349_p9, %p5346_p8 }
  0xc4   :  { %5354 = shalt.err (!%p5351_p10)
}
  0xc5   :  { %s5355_s9 = scalar_lea.vmem %s120_s1, 32  ;;  %p5360_p12 = scmp.lt.s32.totalorder %s120_s1, %s120_s1 }
  0xc6   :  { %p5356_p11 = scmp.ne.s32.totalorder %s120_s1, %s5355_s9  ;;  %p5361_p13 = scmp.lt.s32.totalorder %s5355_s9, %s5355_s9 }
  0xc8   :  { %p5362_p0 = por %p5361_p13, %p5360_p12 }
  0xca   :  { %p5363_p1 = pnand %p5362_p0, %p5356_p11 }
  0xcc   :  { %5366 = shalt.err (!%p5363_p1)
}
  0xcd   :  { %125 = dma.hbm_to_vmem [thread:$0]  %s6445_s11, 32, %s120_s1, [#allocation12], %s5449_s3, %s5449_s3, %s5450_s29  }
  0xce   :  { %s5367_s8 = scalar_lea.hbm %s6449_s15, 32 }
  0xcf   :  { %p5368_p2 = scmp.ne.s32.totalorder %s6449_s15, %s5367_s8  ;;  %p5371_p3 = scmp.lt.u32.totalorder %s5367_s8, %s6449_s15 }
  0xd1   :  { %p5373_p4 = pnand %p5371_p3, %p5368_p2 }
  0xd3   :  { %5376 = shalt.err (!%p5373_p4)
}
  0xd4   :  { %s5377_s25 = scalar_lea.vmem %s5739_s2, 32  ;;  %p5382_p6 = scmp.lt.s32.totalorder %s5739_s2, %s5739_s2 }
  0xd5   :  { %p5378_p5 = scmp.ne.s32.totalorder %s5739_s2, %s5377_s25  ;;  %p5383_p7 = scmp.lt.s32.totalorder %s5377_s25, %s5377_s25 }
  0xd7   :  { %p5384_p8 = por %p5383_p7, %p5382_p6 }
  0xd9   :  { %p5385_p9 = pnand %p5384_p8, %p5378_p5 }
  0xdb   :  { %5388 = shalt.err (!%p5385_p9)
}
  0xdc   :  { %153 = dma.hbm_to_vmem [thread:$0]  %s6449_s15, 32, %s5739_s2, [#allocation15], %s5449_s3, %s5449_s3, %s5450_s29  }
  0xdd   :  { %s5459_s16 = smov [#allocation19]   ;;  %s5389_s0 = scalar_lea.hbm %s6451_s17, 32 }
  0xde   :  { %s171_s10 = sshll.u32 %s5459_s16, 4  ;;  %p5390_p10 = scmp.ne.s32.totalorder %s6451_s17, %s5389_s0  ;;  %s172_s10 = int_to_ptr.vmem [resolvable:$true] %s171_s10 }
  0xdf   :  { %p5393_p11 = scmp.lt.u32.totalorder %s5389_s0, %s6451_s17 }
  0xe1   :  { %p5395_p12 = pnand %p5393_p11, %p5390_p10 }
  0xe3   :  { %5398 = shalt.err (!%p5395_p12)
}
  0xe4   :  { %s5399_s6 = scalar_lea.vmem %s172_s10, 32  ;;  %p5404_p0 = scmp.lt.s32.totalorder %s172_s10, %s172_s10 }
  0xe5   :  { %p5400_p13 = scmp.ne.s32.totalorder %s172_s10, %s5399_s6  ;;  %p5405_p1 = scmp.lt.s32.totalorder %s5399_s6, %s5399_s6 }
  0xe7   :  { %p5406_p2 = por %p5405_p1, %p5404_p0 }
  0xe9   :  { %p5407_p3 = pnand %p5406_p2, %p5400_p13 }
  0xeb   :  { %5410 = shalt.err (!%p5407_p3)
}
  0xec   :  { %177 = dma.hbm_to_vmem [thread:$0]  %s6451_s17, 32, %s172_s10, [#allocation18], %s5449_s3, %s5449_s3, %s5450_s29  }
  0xed   :  { %5433 = dma.done.wait [#allocation3], 16  }
  0xee   :  { %5434 = vsyncadd [#allocation3], 4294967280 }
  0xef   :  { %5435 = dma.done.wait [#allocation6], 32  }
  0xf0   :  { %5436 = vsyncadd [#allocation6], 4294967264 }
  0xf1   :  { %5437 = dma.done.wait [#allocation9], 64  }
  0xf2   :  { %5438 = vsyncadd [#allocation9], 4294967232 }
  0xf3   :  { %5439 = dma.done.wait [#allocation12], 64  }
  0xf4   :  { %5440 = vsyncadd [#allocation12], 4294967232 }
  0xf5   :  { %5441 = dma.done.wait [#allocation15], 64  }
  0xf6   :  { %5442 = vsyncadd [#allocation15], 4294967232 }
  0xf7   :  { %5443 = dma.done.wait [#allocation18], 64  }
  0xf8   :  { %5444 = vsyncadd [#allocation18], 4294967232  ;;  %vm231_vm0 = vcmask 130048   ;;  %s6493_s26 = sld [smem:[#allocation28_spill]]  ;;  %s6494_s25 = sld [smem:[#allocation32_spill]]  ;;  %vm469_vm1 = vcmask 261120  }
  0xf9   :  { %v4415_v24 = vld [vmem:[#allocation2] ss:$0 sm:$0xff]  ;;  %v4416_v26 = vld [vmem:[#allocation5] ss:$0 sm:$0xff]  ;;  %s6495_s13 = sld [smem:[#allocation34_spill]]  ;;  %s6496_s2 = sld [smem:[#allocation29_spill]]  ;;  %vm4961_vm2 = vmpackc.low %vm231_vm0, %vm231_vm0 }
  0xfa   :  { %v4417_v39 = vld [vmem:[#allocation7] ss:$0 sm:$0xff]  ;;  %v5460_v53 = vmov 0.0|0.0   ;;  %vm5461_vm3 = vmmov 0   ;;  %v5462_v54 = vmov 0.0   ;;  %v5463_v55 = vmov 1.0  }
  0xfb   :  { %4959 = vmatprep.subr.bf16.mxu0 %v5460_v53  ;;  %4667 = vmatprep.mubr.msk.f32.mxu0 %vm5461_vm3, %v5462_v54  ;;  %v4420_v56 = vld [vmem:[#allocation8] ss:$0 sm:$0xff]  ;;  %s5465_s4 = smov 120   ;;  %s5466_s17 = smov 104   ;;  %vm589_vm4 = vcmask 64512   ;;  %vm1914_vm6 = vcmask 195584  }
  0xfc   :  { %s5467_s29 = smov 96   ;;  %s5468_s23 = smov 64   ;;  %vm2179_vm7 = vcmask 523264   ;;  %vm4161_vm8 = vcmask 1040384   ;;  %vm4165_vm9 = vcmask 254976   ;;  %vm4279_vm10 = vcmask 123904  }
  0xfd   :  { %s6497_s1 = sld [smem:[#allocation36_spill]]  ;;  %s5469_s30 = smov 8   ;;  %vm4390_vm11 = vcmask 58368  }
  0xfe   :  { %v5794_v0 = vld [vmem:[%s6493_s26] sm:$0xff]  ;;  %v5799_v1 = vld [vmem:[%s6493_s26 + $0x8] sm:$0xff]  ;;  %s5464_s26 = smov 112   ;;  %s5470_s28 = smov 24  }
  0xff   :  { %v319_v2 = vsel %vm231_vm0, %v5794_v0, 0.0  ;;  %v322_v3 = vsel %vm231_vm0, %v5799_v1, 0.0  ;;  %v362_v14 = vld [vmem:[%s6494_s25] sm:$0xff]  ;;  %v363_v15 = vld [vmem:[%s6494_s25 + $0x8] sm:$0xff]  ;;  %v460_v36 = vld [vmem:[%s6495_s13 + $0x10] sm:$0xff] }
 0x100   :  { %320 = vadd.xlane.f32.xlu0 %v319_v2  ;;  %v4963_v16 = vpack.c.bf16 %v363_v15, %v362_v14  ;;  %v458_v33 = vld [vmem:[%s6495_s13] sm:$0xff]  ;;  %v459_v34 = vld [vmem:[%s6495_s13 + $0x8] sm:$0xff]  ;;  %v461_v37 = vld [vmem:[%s6495_s13 + $0x18] sm:$0xff]  ;;  %v229_v50 = vand.u32 2147483647, %v5794_v0 }
 0x101   :  { %v4967_v35 = vpack.c.bf16 %v459_v34, %v458_v33  ;;  %v4971_v38 = vpack.c.bf16 %v461_v37, %v460_v36  ;;  %v454_v45 = vld [vmem:[%s6496_s2] sm:$0xff]  ;;  %v455_v46 = vld [vmem:[%s6496_s2 + $0x8] sm:$0xff]  ;;  %v230_v51 = vand.u32 2147483647, %v5799_v1 }
 0x102   :  { %4964 = vmatprep.subr.bf16.mxu1 %v4963_v16 }
 0x103   :  { %4966 = vmatpush3.bf16.msra.mxu1 %v4963_v16  ;;  %v4960_v52 = vpack.c.bf16 %v230_v51, %v229_v50 }
 0x104   :  { %323 = vadd.xlane.f32.xlu0 %v322_v3  ;;  %4968 = vmatprep.subr.bf16.mxu1 %v4967_v35 }
 0x105   :  { %4962 = vmatpush3.bf16.xpose.msk.msra.mxu0 %vm4961_vm2, %v4960_v52 }
 0x106   :  { %4688 = vmatprep.subr.mxu0 %v5462_v54 }
 0x10c   :  { %4668 = vmatmul.mubr.msk.f32.vlgmr.msra.gmra.mrb[0].mxu0 %vm231_vm0, %v5463_v55 }
 0x10d   :  { %4690 = vmatprep.mubr.msk.f32.mxu0 %vm5461_vm3, %v5462_v54 }
 0x18d   :  { %v321_v4 = vpop.xlane.xlu0 %320 }
 0x18e   :  { %v326_v5 = vmul.f32 0.0625, %v321_v4 }
 0x190   :  { %v328_v6 = vsub.f32 %v5794_v0, %v326_v5 }
 0x191   :  { %v324_v7 = vpop.xlane.xlu0 %323 }
 0x192   :  { %v327_v8 = vmul.f32 0.0625, %v324_v7  ;;  %v330_v9 = vmul.f32 %v328_v6, %v328_v6 }
 0x194   :  { %v329_v10 = vsub.f32 %v5799_v1, %v327_v8  ;;  %v332_v11 = vsel %vm231_vm0, %v330_v9, 0.0 }
 0x195   :  { %333 = vadd.xlane.f32.xlu1 %v332_v11 }
 0x196   :  { %v331_v12 = vmul.f32 %v329_v10, %v329_v10 }
 0x198   :  { %v335_v13 = vsel %vm231_vm0, %v331_v12, 0.0 }
 0x199   :  { %336 = vadd.xlane.f32.xlu1 %v335_v13 }
 0x1df   :  { %v307_v5 = vpop.f32.mrb[0].mxu0 }
 0x1e0   :  { %vm311_vm5 = vcmp.eq.f32.partialorder %v307_v5, 0.0 }
 0x1e1   :  { %v312_v7 = vsel %vm311_vm5, -1e+09, %v5462_v54 }
 0x222   :  { %v334_v17 = vpop.xlane.xlu1 %333 }
 0x223   :  { %v338_v18 = vmul.f32 0.0625, %v334_v17 }
 0x225   :  { %v340_v19 = vadd.f32 1e-05, %v338_v18 }
 0x226   :  { %v337_v20 = vpop.xlane.xlu1 %336 }
 0x227   :  { %5081 = vrsqrt.f32 %v340_v19  ;;  %v339_v21 = vmul.f32 0.0625, %v337_v20 }
 0x229   :  { %v341_v22 = vadd.f32 1e-05, %v339_v21 }
 0x22b   :  { %5083 = vrsqrt.f32 %v341_v22  ;;  %v579_v22 = vlaneseq }
 0x231   :  { %v5082_v23 = vpop.eup %5081 }
 0x232   :  { %v344_v25 = vmul.f32 %v5082_v23, %v328_v6  ;;  %v4669_v6 = vpop.f32.mrb[1].mxu0  ;;  %v580_v23 = vshrl.u32 %v579_v22, 7 }
 0x234   :  { %v352_v27 = vmul.f32 %v4415_v24, %v344_v25 }
 0x235   :  { %v5084_v28 = vpop.eup %5083 }
 0x236   :  { %v345_v29 = vmul.f32 %v5084_v28, %v329_v10  ;;  %v360_v30 = vadd.f32 %v4416_v26, %v352_v27 }
 0x238   :  { %v353_v31 = vmul.f32 %v4415_v24, %v345_v29  ;;  %4674 = vmatprep.mubr.msk.f32.mxu1 %vm231_vm0, %v360_v30  ;;  %v581_v24 = vsub.s32 0, %v580_v23 }
 0x23a   :  { %v361_v32 = vadd.f32 %v4416_v26, %v353_v31  ;;  %v5951_v25 = vrot.slane %v312_v7, %v581_v24 }
 0x23c   :  { %4675 = vmatmul.mubr.msk.f32.vlgmr.msra.gmra.mrb[0].mxu1 %vm231_vm0, %v361_v32 }
 0x23d   :  { %4970 = vmatpush3.bf16.msra.mxu1 %v4967_v35 }
 0x23e   :  { %4972 = vmatprep.subr.bf16.mxu1 %v4971_v38 }
 0x241   :  { %4974 = vmatpush3.bf16.msra.mxu1 %v4971_v38 }
 0x242   :  { %4698 = vmatprep.subr.mxu1 %v5462_v54 }
 0x30f   :  { %v4676_v40 = vpop.f32.mrb[0].mxu1 }
 0x310   :  { %v449_v41 = vadd.f32 %v4676_v40, %v4417_v39  ;;  %v443_v42 = vpop.f32.mrb[1].mxu1 }
 0x311   :  { %v444_v43 = vadd.f32 %v4417_v39, %v443_v42 }
 0x312   :  { %v453_v44 = vmax.f32 %v449_v41, 0.0 }
 0x313   :  { %v452_v47 = vmax.f32 %v444_v43, 0.0 }
 0x314   :  { %v5837_v49 = vadd.f32 %v455_v46, %v453_v44 }
 0x315   :  { %v5835_v48 = vadd.f32 %v454_v45, %v452_v47 }
 0x317   :  { %4685 = vmatprep.mubr.msk.f32.mxu1 %vm469_vm1, %v5835_v48 }
 0x318   :  { %4686 = vmatmul.mubr.msk.f32.vlgmr.msra.gmra.mrb[2].mxu1 %vm469_vm1, %v5837_v49 }
 0x319   :  { %4700 = vmatprep.mubr.msk.f32.mxu1 %vm5461_vm3, %v5462_v54 }
 0x3eb   :  { %v4687_v57 = vpop.f32.mrb[2].mxu1 }
 0x3ec   :  { %v542_v58 = vpop.f32.mrb[3].mxu1  ;;  %v5863_v60 = vadd.f32 %v4687_v57, %v4420_v56 }
 0x3ed   :  { %v5857_v59 = vadd.f32 %v4420_v56, %v542_v58 }
 0x3ee   :  { %v575_v15 = vmul.f32 0.35355338, %v5863_v60 }
 0x3ef   :  { %555 = vrot.lane.b32.xlu1 %v5857_v59, %s5464_s26  ;;  %552 = vrot.lane.b32.xlu0 %v5857_v59, %s5465_s4  ;;  %v571_v3 = vmul.f32 0.35355338, %v5857_v59 }
 0x3f3   :  { %558 = vrot.lane.b32.xlu1 %v5857_v59, %s5466_s17  ;;  %565 = vrot.lane.b32.xlu0 %v5863_v60, %s5464_s26 }
 0x3f7   :  { %562 = vrot.lane.b32.xlu1 %v5863_v60, %s5465_s4  ;;  %587 = vrot.lane.b32.xlu0 %v5857_v59, %s5467_s29 }
 0x3fb   :  { %568 = vrot.lane.b32.xlu1 %v5863_v60, %s5466_s17 }
 0x461   :  { %v5875_v61 = vpop.permute.xlu1 %555  ;;  %v5877_v62 = vpop.permute.xlu0 %552 }
 0x462   :  { %742 = vrot.lane.b32.xlu0 %v5875_v61, %s5467_s29  ;;  %665 = vrot.lane.b32.xlu1 %v5877_v62, %s5467_s29  ;;  %v573_v10 = vmul.f32 0.35355338, %v5875_v61  ;;  %v572_v11 = vmul.f32 0.35355338, %v5877_v62 }
 0x465   :  { %v5883_v63 = vpop.permute.xlu1 %558  ;;  %v5885_v0 = vpop.permute.xlu0 %565 }
 0x466   :  { %896 = vrot.lane.b32.xlu0 %v5863_v60, %s5467_s29  ;;  %819 = vrot.lane.b32.xlu1 %v5883_v63, %s5467_s29  ;;  %v574_v14 = vmul.f32 0.35355338, %v5883_v63  ;;  %v577_v18 = vmul.f32 0.35355338, %v5885_v0 }
 0x469   :  { %v5891_v1 = vpop.permute.xlu1 %562  ;;  %v588_v2 = vpop.permute.xlu0 %587 }
 0x46a   :  { %973 = vrot.lane.b32.xlu1 %v5891_v1, %s5467_s29  ;;  %1050 = vrot.lane.b32.xlu0 %v5885_v0, %s5467_s29  ;;  %v576_v19 = vmul.f32 0.35355338, %v5891_v1 }
 0x46b   :  { %4689 = vmatpush3.xpose.msk.msra.mxu0 %vm589_vm4, %v588_v2 }
 0x46c   :  { %4693 = vmatprep.subr.mxu0 %v5462_v54 }
 0x46d   :  { %v5900_v4 = vpop.permute.xlu1 %568 }
 0x46e   :  { %4691 = vmatmul.mubr.msk.f32.vlgmr.msra.gmra.mrb[2].mxu0 %vm589_vm4, %v571_v3  ;;  %1127 = vrot.lane.b32.xlu1 %v5900_v4, %s5467_s29  ;;  %v578_v21 = vmul.f32 0.35355338, %v5900_v4 }
 0x46f   :  { %4695 = vmatprep.mubr.msk.f32.mxu0 %vm5461_vm3, %v5462_v54  ;;  %314 = vrot.lane.b32.xlu0 %v312_v7, %s5465_s4 }
 0x4d4   :  { %v666_v8 = vpop.permute.xlu1 %665  ;;  %v743_v9 = vpop.permute.xlu0 %742 }
 0x4d5   :  { %4694 = vmatpush3.xpose.msk.msra.mxu0 %vm589_vm4, %v666_v8  ;;  %4699 = vmatpush3.xpose.msk.msra.mxu1 %vm589_vm4, %v743_v9 }
 0x4d6   :  { %4708 = vmatprep.subr.mxu1 %v5462_v54  ;;  %4703 = vmatprep.subr.mxu0 %v5462_v54 }
 0x4d8   :  { %v820_v12 = vpop.permute.xlu1 %819  ;;  %4701 = vmatmul.mubr.msk.f32.vlgmr.msra.gmra.mrb[4].mxu1 %vm589_vm4, %v573_v10  ;;  %v897_v13 = vpop.permute.xlu0 %896  ;;  %4696 = vmatmul.mubr.msk.f32.vlgmr.msra.gmra.mrb[4].mxu0 %vm589_vm4, %v572_v11 }
 0x4d9   :  { %4704 = vmatpush3.xpose.msk.msra.mxu0 %vm589_vm4, %v820_v12  ;;  %4709 = vmatpush3.xpose.msk.msra.mxu1 %vm589_vm4, %v897_v13 }
 0x4da   :  { %4705 = vmatprep.mubr.msk.f32.mxu0 %vm5461_vm3, %v5462_v54  ;;  %4710 = vmatprep.mubr.msk.f32.mxu1 %vm5461_vm3, %v5462_v54 }
 0x4db   :  { %4718 = vmatprep.subr.mxu1 %v5462_v54  ;;  %4713 = vmatprep.subr.mxu0 %v5462_v54 }
 0x4dc   :  { %v974_v16 = vpop.permute.xlu1 %973  ;;  %4711 = vmatmul.mubr.msk.f32.vlgmr.msra.gmra.mrb[6].mxu1 %vm589_vm4, %v575_v15  ;;  %v1051_v17 = vpop.permute.xlu0 %1050  ;;  %4706 = vmatmul.mubr.msk.f32.vlgmr.msra.gmra.mrb[6].mxu0 %vm589_vm4, %v574_v14 }
 0x4dd   :  { %4714 = vmatpush3.xpose.msk.msra.mxu0 %vm589_vm4, %v974_v16  ;;  %4719 = vmatpush3.xpose.msk.msra.mxu1 %vm589_vm4, %v1051_v17 }
 0x4de   :  { %4715 = vmatprep.mubr.msk.f32.mxu0 %vm5461_vm3, %v5462_v54  ;;  %4720 = vmatprep.mubr.msk.f32.mxu1 %vm5461_vm3, %v5462_v54 }
 0x4df   :  { %4723 = vmatprep.subr.mxu0 %v5462_v54  ;;  %4728 = vmatprep.subr.mxu1 %v5462_v54 }
 0x4e0   :  { %v1128_v20 = vpop.permute.xlu1 %1127  ;;  %4716 = vmatmul.mubr.msk.f32.vlgmr.msra.gmra.mrb[8].mxu0 %vm589_vm4, %v576_v19  ;;  %4721 = vmatmul.mubr.msk.f32.vlgmr.msra.gmra.mrb[8].mxu1 %vm589_vm4, %v577_v18 }
 0x4e1   :  { %4724 = vmatpush3.xpose.msk.msra.mxu0 %vm589_vm4, %v1128_v20  ;;  %4725 = vmatprep.mubr.msk.f32.mxu0 %vm5461_vm3, %v5462_v54  ;;  %v315_v30 = vpop.permute.xlu0 %314 }
 0x4e2   :  { %4733 = vmatprep.subr.mxu0 %v5462_v54  ;;  %4730 = vmatprep.mubr.msk.f32.mxu1 %vm5461_vm3, %v5462_v54  ;;  %v5956_v36 = vrot.slane %v315_v30, %v581_v24 }
 0x4e4   :  { %4726 = vmatmul.mubr.msk.f32.vlgmr.msra.gmra.mrb[10].mxu0 %vm589_vm4, %v578_v21 }
 0x4e5   :  { %4735 = vmatprep.mubr.msk.f32.mxu0 %vm5461_vm3, %v5462_v54 }
 0x541   :  { %v661_v26 = vpop.f32.mrb[2].mxu0 }
 0x542   :  { %v662_v27 = vadd.f32 %v661_v26, %v5951_v25  ;;  %v4692_v28 = vpop.f32.mrb[3].mxu0 }
 0x544   :  { %v1204_v29 = vsel %vm589_vm4, %v662_v27, -inf }
 0x545   :  { %1205 = vmax.xlane.f32.xlu1 %v1204_v29 }
 0x5ab   :  { %v738_v31 = vpop.f32.mrb[4].mxu0  ;;  %v815_v32 = vpop.f32.mrb[4].mxu1 }
 0x5ac   :  { %v739_v33 = vadd.f32 %v738_v31, %v5951_v25  ;;  %v4697_v34 = vpop.f32.mrb[5].mxu0  ;;  %v4702_v35 = vpop.f32.mrb[5].mxu1  ;;  %v816_v37 = vadd.f32 %v815_v32, %v5951_v25 }
 0x5ae   :  { %v1207_v38 = vsel %vm589_vm4, %v739_v33, -inf  ;;  %v1210_v46 = vsel %vm589_vm4, %v816_v37, -inf }
 0x5af   :  { %v969_v39 = vpop.f32.mrb[6].mxu1  ;;  %1208 = vmax.xlane.f32.xlu0 %v1207_v38  ;;  %v892_v40 = vpop.f32.mrb[6].mxu0 }
 0x5b0   :  { %v970_v41 = vadd.f32 %v969_v39, %v5956_v36  ;;  %v4707_v42 = vpop.f32.mrb[7].mxu0  ;;  %v4712_v43 = vpop.f32.mrb[7].mxu1  ;;  %v893_v44 = vadd.f32 %v892_v40, %v5951_v25 }
 0x5b2   :  { %v1216_v45 = vsel %vm589_vm4, %v970_v41, -inf  ;;  %v1213_v58 = vsel %vm589_vm4, %v893_v44, -inf }
 0x5b3   :  { %v1123_v47 = vpop.f32.mrb[8].mxu1  ;;  %1217 = vmax.xlane.f32.xlu1 %v1216_v45  ;;  %1211 = vmax.xlane.f32.xlu0 %v1210_v46  ;;  %v1046_v50 = vpop.f32.mrb[8].mxu0 }
 0x5b4   :  { %v1124_v51 = vadd.f32 %v1123_v47, %v5956_v36  ;;  %v4717_v52 = vpop.f32.mrb[9].mxu0  ;;  %v4722_v55 = vpop.f32.mrb[9].mxu1  ;;  %v1047_v56 = vadd.f32 %v1046_v50, %v5956_v36 }
 0x5b6   :  { %v1222_v57 = vsel %vm589_vm4, %v1124_v51, -inf  ;;  %v1219_v6 = vsel %vm589_vm4, %v1047_v56, -inf }
 0x5b7   :  { %1223 = vmax.xlane.f32.xlu1 %v1222_v57  ;;  %1214 = vmax.xlane.f32.xlu0 %v1213_v58  ;;  %v1200_v2 = vpop.f32.mrb[10].mxu0 }
 0x5b8   :  { %v4727_v3 = vpop.f32.mrb[11].mxu0  ;;  %v1201_v5 = vadd.f32 %v1200_v2, %v5956_v36 }
 0x5ba   :  { %v1225_v7 = vsel %vm589_vm4, %v1201_v5, -inf }
 0x5bb   :  { %1220 = vmax.xlane.f32.xlu0 %v1219_v6 }
 0x5bf   :  { %1226 = vmax.xlane.f32.xlu0 %v1225_v7 }
 0x5c8   :  { %1292 = vrot.lane.b32.xlu1 %v5857_v59, %s5468_s23 }
 0x5cc   :  { %1444 = vrot.lane.b32.xlu1 %v5875_v61, %s5468_s23 }
 0x5d0   :  { %1520 = vrot.lane.b32.xlu1 %v5883_v63, %s5468_s23 }
 0x5d2   :  { %v1206_v8 = vpop.xlane.xlu1 %1205 }
 0x5d3   :  { %v1228_v9 = vsub.f32 %v662_v27, %v1206_v8 }
 0x5d4   :  { %1596 = vrot.lane.b32.xlu1 %v5863_v60, %s5468_s23 }
 0x5d5   :  { %1368 = vrot.lane.b32.xlu0 %v5877_v62, %s5468_s23  ;;  %v1236_v10 = vmul.f32 1.442695, %v1228_v9 }
 0x5d7   :  { %5085 = vpow2.f32 %v1236_v10 }
 0x5d9   :  { %1672 = vrot.lane.b32.xlu0 %v5891_v1, %s5468_s23 }
 0x5e1   :  { %v5983_v59 = vpop.eup %5085 }
 0x5e2   :  { %v1252_v61 = vsel %vm589_vm4, %v5983_v59, 0.0 }
 0x5f8   :  { %1253 = vadd.xlane.f32.xlu1 %v1252_v61 }
 0x63c   :  { %v1209_v63 = vpop.xlane.xlu0 %1208 }
 0x63d   :  { %v1229_v11 = vsub.f32 %v739_v33, %v1209_v63 }
 0x63f   :  { %v1238_v12 = vmul.f32 1.442695, %v1229_v11 }
 0x640   :  { %v1218_v60 = vpop.xlane.xlu1 %1217  ;;  %v1212_v13 = vpop.xlane.xlu0 %1211 }
 0x641   :  { %5087 = vpow2.f32 %v1238_v12  ;;  %v1232_v62 = vsub.f32 %v970_v41, %v1218_v60  ;;  %v1230_v14 = vsub.f32 %v816_v37, %v1212_v13 }
 0x643   :  { %v1240_v15 = vmul.f32 1.442695, %v1230_v14  ;;  %v1244_v1 = vmul.f32 1.442695, %v1232_v62 }
 0x644   :  { %v1224_v16 = vpop.xlane.xlu1 %1223  ;;  %v1215_v17 = vpop.xlane.xlu0 %1214 }
 0x645   :  { %v1234_v18 = vsub.f32 %v1124_v51, %v1224_v16  ;;  %v1231_v19 = vsub.f32 %v893_v44, %v1215_v17  ;;  %5089 = vpow2.f32 %v1240_v15 }
 0x646   :  { %5091 = vpow2.f32 %v1244_v1 }
 0x647   :  { %v1242_v20 = vmul.f32 1.442695, %v1231_v19  ;;  %v1248_v21 = vmul.f32 1.442695, %v1234_v18  ;;  %v1931_v18 = vld [vmem:[%s6497_s1] sm:$0xff]  ;;  %v1932_v19 = vld [vmem:[%s6497_s1 + $0x8] sm:$0xff] }
 0x648   :  { %v1293_v22 = vpop.permute.xlu1 %1292  ;;  %v1221_v23 = vpop.xlane.xlu0 %1220 }
 0x649   :  { %v1233_v24 = vsub.f32 %v1047_v56, %v1221_v23  ;;  %4729 = vmatpush3.msra.mxu1 %v1293_v22  ;;  %5093 = vpow2.f32 %v1242_v20  ;;  %v4975_v20 = vpack.c.bf16 %v1932_v19, %v1931_v18  ;;  %v1933_v23 = vld [vmem:[%s6497_s1 + $0x10] sm:$0xff]  ;;  %v2167_v19 = vld [vmem:[%s6448_s14 + $0x18] sm:$0xff] }
 0x64a   :  { %4738 = vmatprep.subr.mxu1 %v5462_v54  ;;  %5095 = vpow2.f32 %v1248_v21 }
 0x64b   :  { %v5088_v26 = vpop.eup %5087  ;;  %v1246_v27 = vmul.f32 1.442695, %v1233_v24  ;;  %v1934_v24 = vld [vmem:[%s6497_s1 + $0x18] sm:$0xff] }
 0x64c   :  { %v1227_v28 = vpop.xlane.xlu0 %1226  ;;  %v1255_v29 = vsel %vm589_vm4, %v5088_v26, 0.0  ;;  %v1445_v46 = vpop.permute.xlu1 %1444 }
 0x64d   :  { %5097 = vpow2.f32 %v1246_v27  ;;  %v1235_v30 = vsub.f32 %v1201_v5, %v1227_v28  ;;  %1256 = vadd.xlane.f32.xlu0 %v1255_v29 }
 0x64f   :  { %v1250_v31 = vmul.f32 1.442695, %v1235_v30  ;;  %v5090_v32 = vpop.eup %5089 }
 0x650   :  { %v1369_v33 = vpop.permute.xlu0 %1368  ;;  %v1258_v34 = vsel %vm589_vm4, %v5090_v32, 0.0  ;;  %v5092_v35 = vpop.eup %5091 }
 0x651   :  { %5099 = vpow2.f32 %v1250_v31  ;;  %4734 = vmatpush3.msra.mxu0 %v1369_v33  ;;  %1259 = vadd.xlane.f32.xlu1 %v1258_v34  ;;  %v1264_v38 = vsel %vm589_vm4, %v5092_v35, 0.0  ;;  %v1521_v47 = vpop.permute.xlu1 %1520 }
 0x652   :  { %4743 = vmatprep.subr.mxu0 %v5462_v54 }
 0x653   :  { %v5094_v37 = vpop.eup %5093 }
 0x654   :  { %v1261_v39 = vsel %vm589_vm4, %v5094_v37, 0.0  ;;  %v5096_v40 = vpop.eup %5095 }
 0x655   :  { %1265 = vadd.xlane.f32.xlu1 %v1264_v38  ;;  %1262 = vadd.xlane.f32.xlu0 %v1261_v39  ;;  %v1270_v43 = vsel %vm589_vm4, %v5096_v40, 0.0  ;;  %v1597_v50 = vpop.permute.xlu1 %1596 }
 0x657   :  { %v5098_v41 = vpop.eup %5097 }
 0x658   :  { %v1267_v42 = vsel %vm589_vm4, %v5098_v41, 0.0 }
 0x659   :  { %1271 = vadd.xlane.f32.xlu1 %v1270_v43  ;;  %1268 = vadd.xlane.f32.xlu0 %v1267_v42 }
 0x65b   :  { %v5995_v44 = vpop.eup %5099 }
 0x65c   :  { %v1273_v45 = vsel %vm589_vm4, %v5995_v44, 0.0 }
 0x65d   :  { %1274 = vadd.xlane.f32.xlu0 %v1273_v45 }
 0x66a   :  { %1748 = vrot.lane.b32.xlu1 %v5885_v0, %s5468_s23  ;;  %v1673_v0 = vpop.permute.xlu0 %1672 }
 0x673   :  { %1824 = vrot.lane.b32.xlu0 %v5900_v4, %s5468_s23 }
 0x685   :  { %v1254_v51 = vpop.xlane.xlu1 %1253 }
 0x686   :  { %5101 = vrcp.f32 %v1254_v51 }
 0x690   :  { %v5102_v52 = vpop.eup %5101 }
 0x691   :  { %v1284_v55 = vmul.f32 %v5102_v52, %v5983_v59 }
 0x693   :  { %4731 = vmatmul.mubr.msk.f32.vlgmr.msra.gmra.mrb[10].mxu1 %vm589_vm4, %v1284_v55 }
 0x694   :  { %4739 = vmatpush3.msra.mxu1 %v1445_v46  ;;  %4740 = vmatprep.mubr.msk.f32.mxu1 %vm5461_vm3, %v5462_v54 }
 0x695   :  { %4748 = vmatprep.subr.mxu1 %v5462_v54 }
 0x6da   :  { %v1257_v56 = vpop.xlane.xlu0 %1256 }
 0x6db   :  { %5103 = vrcp.f32 %v1257_v56 }
 0x6de   :  { %v1260_v4 = vpop.xlane.xlu1 %1259 }
 0x6df   :  { %5105 = vrcp.f32 %v1260_v4 }
 0x6e2   :  { %v1266_v57 = vpop.xlane.xlu1 %1265  ;;  %v1263_v58 = vpop.xlane.xlu0 %1262 }
 0x6e3   :  { %5107 = vrcp.f32 %v1266_v57 }
 0x6e4   :  { %5109 = vrcp.f32 %v1263_v58 }
 0x6e5   :  { %v5104_v2 = vpop.eup %5103 }
 0x6e6   :  { %v1285_v3 = vmul.f32 %v5104_v2, %v5088_v26  ;;  %v1272_v5 = vpop.xlane.xlu1 %1271  ;;  %v1269_v6 = vpop.xlane.xlu0 %1268  ;;  %v4979_v26 = vpack.c.bf16 %v1934_v24, %v1933_v23 }
 0x6e7   :  { %5111 = vrcp.f32 %v1272_v5 }
 0x6e8   :  { %4736 = vmatmul.mubr.msk.f32.vlgmr.msra.gmra.mrb[12].mxu0 %vm589_vm4, %v1285_v3  ;;  %5113 = vrcp.f32 %v1269_v6 }
 0x6e9   :  { %4744 = vmatpush3.msra.mxu0 %v1521_v47  ;;  %4745 = vmatprep.mubr.msk.f32.mxu0 %vm5461_vm3, %v5462_v54  ;;  %v5106_v7 = vpop.eup %5105 }
 0x6ea   :  { %4753 = vmatprep.subr.mxu0 %v5462_v54  ;;  %v1286_v8 = vmul.f32 %v5106_v7, %v5090_v32  ;;  %v1275_v9 = vpop.xlane.xlu0 %1274  ;;  %v1749_v11 = vpop.permute.xlu1 %1748 }
 0x6eb   :  { %5115 = vrcp.f32 %v1275_v9 }
 0x6ec   :  { %4741 = vmatmul.mubr.msk.f32.vlgmr.msra.gmra.mrb[12].mxu1 %vm589_vm4, %v1286_v8 }
 0x6ed   :  { %v5108_v10 = vpop.eup %5107  ;;  %4749 = vmatpush3.msra.mxu1 %v1597_v50  ;;  %4750 = vmatprep.mubr.msk.f32.mxu1 %vm5461_vm3, %v5462_v54 }
 0x6ee   :  { %v5110_v59 = vpop.eup %5109  ;;  %v1288_v61 = vmul.f32 %v5108_v10, %v5092_v35  ;;  %4758 = vmatprep.subr.mxu1 %v5462_v54  ;;  %v1825_v15 = vpop.permute.xlu0 %1824 }
 0x6ef   :  { %v1287_v63 = vmul.f32 %v5110_v59, %v5094_v37 }
 0x6f0   :  { %4751 = vmatmul.mubr.msk.f32.vlgmr.msra.gmra.mrb[14].mxu1 %vm589_vm4, %v1288_v61 }
 0x6f1   :  { %v5112_v12 = vpop.eup %5111  ;;  %4746 = vmatmul.mubr.msk.f32.vlgmr.msra.gmra.mrb[14].mxu0 %vm589_vm4, %v1287_v63  ;;  %4759 = vmatpush3.msra.mxu1 %v1749_v11 }
 0x6f2   :  { %v5114_v60 = vpop.eup %5113  ;;  %v1290_v13 = vmul.f32 %v5112_v12, %v5096_v40  ;;  %4754 = vmatpush3.msra.mxu0 %v1673_v0  ;;  %4755 = vmatprep.mubr.msk.f32.mxu0 %vm5461_vm3, %v5462_v54  ;;  %v4447_v0 = vld [vmem:[#allocation10] ss:$0 sm:$0xff] }
 0x6f3   :  { %v1289_v62 = vmul.f32 %v5114_v60, %v5098_v41  ;;  %4760 = vmatprep.mubr.msk.f32.mxu1 %vm5461_vm3, %v5462_v54  ;;  %4763 = vmatprep.subr.mxu0 %v5462_v54  ;;  %v2071_v60 = vld [vmem:[%s6446_s12 + $0x8] sm:$0xff] }
 0x6f4   :  { %4761 = vmatmul.mubr.msk.f32.vlgmr.msra.gmra.mrb[16].mxu1 %vm589_vm4, %v1290_v13  ;;  %4976 = vmatprep.subr.bf16.mxu1 %v4975_v20 }
 0x6f5   :  { %v5116_v14 = vpop.eup %5115  ;;  %4756 = vmatmul.mubr.msk.f32.vlgmr.msra.gmra.mrb[16].mxu0 %vm589_vm4, %v1289_v62  ;;  %4978 = vmatpush3.bf16.msra.mxu1 %v4975_v20  ;;  %v2072_v62 = vld [vmem:[%s6446_s12 + $0x10] sm:$0xff] }
 0x6f6   :  { %v1291_v1 = vmul.f32 %v5116_v14, %v5995_v44  ;;  %4764 = vmatpush3.msra.mxu0 %v1825_v15  ;;  %4765 = vmatprep.mubr.msk.f32.mxu0 %vm5461_vm3, %v5462_v54  ;;  %v2073_v14 = vld [vmem:[%s6446_s12 + $0x18] sm:$0xff] }
 0x6f7   :  { %4980 = vmatprep.subr.bf16.mxu1 %v4979_v26  ;;  %v4987_v15 = vpack.c.bf16 %v2073_v14, %v2072_v62  ;;  %v4462_v62 = vld [vmem:[%s6495_s13 + $0x30] sm:$0xff]  ;;  %v4463_v14 = vld [vmem:[%s6495_s13 + $0x38] sm:$0xff] }
 0x6f9   :  { %4766 = vmatmul.mubr.msk.f32.vlgmr.msra.gmra.mrb[18].mxu0 %vm589_vm4, %v1291_v1  ;;  %4982 = vmatpush3.bf16.msra.mxu1 %v4979_v26  ;;  %v2164_v1 = vld [vmem:[%s6448_s14] sm:$0xff] }
 0x766   :  { %v1364_v16 = vpop.f32.mrb[10].mxu1 }
 0x767   :  { %v4732_v17 = vpop.f32.mrb[11].mxu1 }
 0x768   :  { %v2166_v17 = vld [vmem:[%s6448_s14 + $0x10] sm:$0xff] }
 0x769   :  { %v4995_v20 = vpack.c.bf16 %v2167_v19, %v2166_v17 }
 0x7bb   :  { %v1440_v21 = vpop.f32.mrb[12].mxu0 }
 0x7bc   :  { %1901 = vrot.lane.b32.xlu1 %v1440_v21, %s5469_s30  ;;  %v4737_v22 = vpop.f32.mrb[13].mxu0  ;;  %v2168_v21 = vld [vmem:[%s6448_s14 + $0x20] sm:$0xff] }
 0x7bd   :  { %v2169_v22 = vld [vmem:[%s6448_s14 + $0x28] sm:$0xff] }
 0x7be   :  { %v4999_v23 = vpack.c.bf16 %v2169_v22, %v2168_v21  ;;  %v4458_v22 = vld [vmem:[#allocation17] ss:$0 sm:$0xff] }
 0x7bf   :  { %v1516_v27 = vpop.f32.mrb[12].mxu1 }
 0x7c0   :  { %v4742_v28 = vpop.f32.mrb[13].mxu1  ;;  %1905 = vrot.lane.b32.xlu0 %v1516_v27, %s5449_s3 }
 0x7c3   :  { %v1668_v29 = vpop.f32.mrb[14].mxu1 }
 0x7c4   :  { %v1592_v30 = vpop.f32.mrb[14].mxu0  ;;  %v4752_v31 = vpop.f32.mrb[15].mxu1 }
 0x7c5   :  { %1909 = vrot.lane.b32.xlu0 %v1592_v30, %s5470_s28  ;;  %v4747_v32 = vpop.f32.mrb[15].mxu0 }
 0x7c6   :  { %v4450_v32 = vld [vmem:[#allocation11] ss:$0 sm:$0xff] }
 0x7c7   :  { %v1820_v33 = vpop.f32.mrb[16].mxu1 }
 0x7c8   :  { %v1744_v34 = vpop.f32.mrb[16].mxu0  ;;  %v4762_v35 = vpop.f32.mrb[17].mxu1 }
 0x7c9   :  { %1917 = vrot.lane.b32.xlu1 %v1744_v34, %s5469_s30  ;;  %v4757_v37 = vpop.f32.mrb[17].mxu0  ;;  %v4451_v34 = vld [vmem:[#allocation13] ss:$0 sm:$0xff] }
 0x7cc   :  { %v1896_v38 = vpop.f32.mrb[18].mxu0 }
 0x7cd   :  { %1921 = vrot.lane.b32.xlu1 %v1820_v33, %s5449_s3  ;;  %1925 = vrot.lane.b32.xlu0 %v1896_v38, %s5470_s28  ;;  %v4767_v39 = vpop.f32.mrb[19].mxu0 }
 0x82e   :  { %v1902_v41 = vpop.permute.xlu1 %1901 }
 0x82f   :  { %v1912_v42 = vsel %vm589_vm4, %v1364_v16, %v1902_v41  ;;  %v2165_v16 = vld [vmem:[%s6448_s14 + $0x8] sm:$0xff] }
 0x830   :  { %v4991_v18 = vpack.c.bf16 %v2165_v16, %v2164_v1 }
 0x832   :  { %v1906_v40 = vpop.permute.xlu0 %1905  ;;  %4992 = vmatprep.subr.bf16.mxu1 %v4991_v18 }
 0x833   :  { %v1913_v43 = vsel %vm231_vm0, %v1912_v42, %v1906_v40  ;;  %v2170_v42 = vld [vmem:[%s6448_s14 + $0x30] sm:$0xff] }
 0x837   :  { %v1910_v44 = vpop.permute.xlu0 %1909 }
 0x838   :  { %v1915_v45 = vsel %vm1914_vm6, %v1913_v43, %v1910_v44  ;;  %v2171_v43 = vld [vmem:[%s6448_s14 + $0x38] sm:$0xff] }
 0x839   :  { %4776 = vmatprep.mubr.msk.f32.mxu1 %vm469_vm1, %v1915_v45  ;;  %v5003_v44 = vpack.c.bf16 %v2171_v43, %v2170_v42  ;;  %v4452_v45 = vld [vmem:[#allocation14] ss:$0 sm:$0xff] }
 0x83b   :  { %v1918_v46 = vpop.permute.xlu1 %1917 }
 0x83c   :  { %v1928_v47 = vsel %vm589_vm4, %v1668_v29, %v1918_v46 }
 0x83f   :  { %v1922_v50 = vpop.permute.xlu1 %1921  ;;  %v1926_v51 = vpop.permute.xlu0 %1925 }
 0x840   :  { %v1929_v52 = vsel %vm231_vm0, %v1928_v47, %v1922_v50 }
 0x841   :  { %v1930_v55 = vsel %vm1914_vm6, %v1929_v52, %v1926_v51 }
 0x842   :  { %4777 = vmatmul.mubr.msk.f32.vlgmr.msra.gmra.mrb[18].mxu1 %vm469_vm1, %v1930_v55 }
 0x843   :  { %4994 = vmatpush3.bf16.msra.mxu1 %v4991_v18 }
 0x844   :  { %4996 = vmatprep.subr.bf16.mxu1 %v4995_v20 }
 0x847   :  { %4998 = vmatpush3.bf16.msra.mxu1 %v4995_v20 }
 0x848   :  { %5000 = vmatprep.subr.bf16.mxu1 %v4999_v23 }
 0x84b   :  { %5002 = vmatpush3.bf16.msra.mxu1 %v4999_v23 }
 0x84c   :  { %5004 = vmatprep.subr.bf16.mxu1 %v5003_v44 }
 0x84f   :  { %5006 = vmatpush3.bf16.msra.mxu1 %v5003_v44 }
 0x850   :  { %4830 = vmatprep.subr.mxu1 %v5462_v54 }
 0x915   :  { %v4778_v56 = vpop.f32.mrb[18].mxu1 }
 0x916   :  { %v2020_v4 = vadd.f32 %v4778_v56, %v4447_v0  ;;  %v2014_v57 = vpop.f32.mrb[19].mxu1 }
 0x917   :  { %v2015_v58 = vadd.f32 %v4447_v0, %v2014_v57  ;;  %v4455_v0 = vld [vmem:[#allocation16] ss:$0 sm:$0xff] }
 0x918   :  { %v2024_v2 = vadd.f32 %v2020_v4, %v5837_v49 }
 0x919   :  { %v2023_v3 = vadd.f32 %v2015_v58, %v5835_v48  ;;  %v2070_v48 = vld [vmem:[%s6446_s12] sm:$0xff] }
 0x91a   :  { %v2030_v5 = vsel %vm469_vm1, %v2024_v2, 0.0  ;;  %v4983_v13 = vpack.c.bf16 %v2071_v60, %v2070_v48  ;;  %v4460_v48 = vld [vmem:[%s6495_s13 + $0x20] sm:$0xff]  ;;  %v4461_v60 = vld [vmem:[%s6495_s13 + $0x28] sm:$0xff] }
 0x91b   :  { %2031 = vadd.xlane.f32.xlu0 %v2030_v5  ;;  %v2027_v6 = vsel %vm469_vm1, %v2023_v3, 0.0 }
 0x91c   :  { %2028 = vadd.xlane.f32.xlu1 %v2027_v6  ;;  %4984 = vmatprep.subr.bf16.mxu0 %v4983_v13 }
 0x91d   :  { %4986 = vmatpush3.bf16.msra.mxu0 %v4983_v13  ;;  %v5007_v13 = vpack.c.bf16 %v4461_v60, %v4460_v48 }
 0x91e   :  { %4988 = vmatprep.subr.bf16.mxu0 %v4987_v15 }
 0x921   :  { %4990 = vmatpush3.bf16.msra.mxu0 %v4987_v15  ;;  %v5011_v15 = vpack.c.bf16 %v4463_v14, %v4462_v62 }
 0x922   :  { %5008 = vmatprep.subr.bf16.mxu0 %v5007_v13 }
 0x9a8   :  { %v2032_v7 = vpop.xlane.xlu0 %2031 }
 0x9a9   :  { %v2035_v8 = vmul.f32 0.03125, %v2032_v7  ;;  %v2029_v9 = vpop.xlane.xlu1 %2028 }
 0x9aa   :  { %v2034_v10 = vmul.f32 0.03125, %v2029_v9 }
 0x9ab   :  { %v2037_v59 = vsub.f32 %v2024_v2, %v2035_v8 }
 0x9ac   :  { %v2036_v61 = vsub.f32 %v2023_v3, %v2034_v10 }
 0x9ad   :  { %v2039_v12 = vmul.f32 %v2037_v59, %v2037_v59 }
 0x9ae   :  { %v2038_v63 = vmul.f32 %v2036_v61, %v2036_v61 }
 0x9af   :  { %v2043_v49 = vsel %vm469_vm1, %v2039_v12, 0.0 }
 0x9b0   :  { %v2040_v11 = vsel %vm469_vm1, %v2038_v63, 0.0 }
 0x9b1   :  { %2041 = vadd.xlane.f32.xlu0 %v2040_v11 }
 0x9b5   :  { %2044 = vadd.xlane.f32.xlu0 %v2043_v49 }
 0xa3e   :  { %v2042_v24 = vpop.xlane.xlu0 %2041 }
 0xa3f   :  { %v2046_v26 = vmul.f32 0.03125, %v2042_v24 }
 0xa41   :  { %v2048_v27 = vadd.f32 1e-05, %v2046_v26 }
 0xa42   :  { %v2045_v28 = vpop.xlane.xlu0 %2044 }
 0xa43   :  { %5117 = vrsqrt.f32 %v2048_v27  ;;  %v2047_v29 = vmul.f32 0.03125, %v2045_v28  ;;  %v4459_v27 = vld [vmem:[#allocation19] ss:$0 sm:$0xff] }
 0xa45   :  { %v2049_v30 = vadd.f32 1e-05, %v2047_v29 }
 0xa47   :  { %5119 = vrsqrt.f32 %v2049_v30 }
 0xa4d   :  { %v5118_v31 = vpop.eup %5117 }
 0xa4e   :  { %v2052_v33 = vmul.f32 %v5118_v31, %v2036_v61 }
 0xa50   :  { %v2060_v35 = vmul.f32 %v4450_v32, %v2052_v33 }
 0xa51   :  { %v5120_v37 = vpop.eup %5119 }
 0xa52   :  { %v2053_v38 = vmul.f32 %v5120_v37, %v2037_v59  ;;  %v2068_v39 = vadd.f32 %v4451_v34, %v2060_v35 }
 0xa54   :  { %v2061_v40 = vmul.f32 %v4450_v32, %v2053_v38  ;;  %4787 = vmatprep.mubr.msk.f32.mxu0 %vm469_vm1, %v2068_v39  ;;  %v4464_v32 = vld [vmem:[#allocation8 + $0x1] ss:$0 sm:$0xff] }
 0xa56   :  { %v2069_v41 = vadd.f32 %v4451_v34, %v2061_v40 }
 0xa58   :  { %4788 = vmatmul.mubr.msk.f32.vlgmr.msra.gmra.mrb[20].mxu0 %vm469_vm1, %v2069_v41 }
 0xa59   :  { %5010 = vmatpush3.bf16.msra.mxu0 %v5007_v13 }
 0xa5a   :  { %5012 = vmatprep.subr.bf16.mxu0 %v5011_v15 }
 0xa5d   :  { %5014 = vmatpush3.bf16.msra.mxu0 %v5011_v15 }
 0xa5e   :  { %4820 = vmatprep.subr.mxu0 %v5462_v54 }
 0xb2b   :  { %v4789_v46 = vpop.f32.mrb[20].mxu0 }
 0xb2c   :  { %v2159_v47 = vadd.f32 %v4789_v46, %v4452_v45  ;;  %v2153_v50 = vpop.f32.mrb[21].mxu0 }
 0xb2d   :  { %v2154_v51 = vadd.f32 %v4452_v45, %v2153_v50 }
 0xb2e   :  { %v2163_v55 = vmax.f32 %v2159_v47, 0.0 }
 0xb2f   :  { %v2162_v52 = vmax.f32 %v2154_v51, 0.0 }
 0xb31   :  { %4806 = vmatprep.mubr.msk.f32.mxu1 %vm2179_vm7, %v2162_v52 }
 0xb32   :  { %4807 = vmatmul.mubr.msk.f32.vlgmr.msra.gmra.mrb[20].mxu1 %vm2179_vm7, %v2163_v55 }
 0xb33   :  { %4832 = vmatprep.mubr.msk.f32.mxu1 %vm5461_vm3, %v5462_v54 }
 0xc05   :  { %v4808_v56 = vpop.f32.mrb[20].mxu1 }
 0xc06   :  { %v2258_v4 = vadd.f32 %v4808_v56, %v4455_v0  ;;  %v2252_v57 = vpop.f32.mrb[21].mxu1 }
 0xc07   :  { %v2253_v58 = vadd.f32 %v4455_v0, %v2252_v57 }
 0xc08   :  { %v2262_v2 = vadd.f32 %v2258_v4, %v2069_v41 }
 0xc09   :  { %v2261_v3 = vadd.f32 %v2253_v58, %v2068_v39 }
 0xc0a   :  { %v2268_v5 = vsel %vm469_vm1, %v2262_v2, 0.0 }
 0xc0b   :  { %2269 = vadd.xlane.f32.xlu0 %v2268_v5  ;;  %v2265_v6 = vsel %vm469_vm1, %v2261_v3, 0.0 }
 0xc0c   :  { %2266 = vadd.xlane.f32.xlu1 %v2265_v6 }
 0xc98   :  { %v2270_v7 = vpop.xlane.xlu0 %2269 }
 0xc99   :  { %v2272_v8 = vmul.f32 0.03125, %v2270_v7  ;;  %v2267_v9 = vpop.xlane.xlu1 %2266 }
 0xc9a   :  { %v2271_v10 = vmul.f32 0.03125, %v2267_v9 }
 0xc9b   :  { %v2274_v59 = vsub.f32 %v2262_v2, %v2272_v8 }
 0xc9c   :  { %v2273_v61 = vsub.f32 %v2261_v3, %v2271_v10 }
 0xc9d   :  { %v2276_v63 = vmul.f32 %v2274_v59, %v2274_v59 }
 0xc9e   :  { %v2275_v11 = vmul.f32 %v2273_v61, %v2273_v61 }
 0xc9f   :  { %v2280_v12 = vsel %vm469_vm1, %v2276_v63, 0.0 }
 0xca0   :  { %2281 = vadd.xlane.f32.xlu0 %v2280_v12  ;;  %v2277_v49 = vsel %vm469_vm1, %v2275_v11, 0.0 }
 0xca1   :  { %2278 = vadd.xlane.f32.xlu1 %v2277_v49 }
 0xd2d   :  { %v2282_v1 = vpop.xlane.xlu0 %2281 }
 0xd2e   :  { %v2284_v16 = vmul.f32 0.03125, %v2282_v1  ;;  %v2279_v17 = vpop.xlane.xlu1 %2278 }
 0xd2f   :  { %v2283_v18 = vmul.f32 0.03125, %v2279_v17 }
 0xd30   :  { %v2286_v19 = vadd.f32 1e-05, %v2284_v16 }
 0xd31   :  { %v2285_v20 = vadd.f32 1e-05, %v2283_v18 }
 0xd32   :  { %5121 = vrsqrt.f32 %v2286_v19 }
 0xd33   :  { %5123 = vrsqrt.f32 %v2285_v20 }
 0xd3c   :  { %v5122_v21 = vpop.eup %5121 }
 0xd3d   :  { %v5124_v23 = vpop.eup %5123  ;;  %v2290_v24 = vmul.f32 %v5122_v21, %v2274_v59 }
 0xd3e   :  { %v2289_v26 = vmul.f32 %v5124_v23, %v2273_v61 }
 0xd3f   :  { %v2298_v28 = vmul.f32 %v4458_v22, %v2290_v24 }
 0xd40   :  { %v2297_v29 = vmul.f32 %v4458_v22, %v2289_v26 }
 0xd41   :  { %v6123_v31 = vadd.f32 %v4459_v27, %v2298_v28 }
 0xd42   :  { %v6121_v30 = vadd.f32 %v4459_v27, %v2297_v29 }
 0xd44   :  { %4817 = vmatprep.mubr.msk.f32.mxu0 %vm469_vm1, %v6121_v30 }
 0xd45   :  { %4818 = vmatmul.mubr.msk.f32.vlgmr.msra.gmra.mrb[22].mxu0 %vm469_vm1, %v6123_v31 }
 0xd46   :  { %4822 = vmatprep.mubr.msk.f32.mxu0 %vm5461_vm3, %v5462_v54 }
 0xe18   :  { %v4819_v33 = vpop.f32.mrb[22].mxu0 }
 0xe19   :  { %v2392_v34 = vpop.f32.mrb[23].mxu0  ;;  %v6137_v37 = vadd.f32 %v4819_v33, %v4464_v32 }
 0xe1a   :  { %v6131_v35 = vadd.f32 %v4464_v32, %v2392_v34 }
 0xe1b   :  { %v2425_v56 = vmul.f32 0.35355338, %v6137_v37 }
 0xe1c   :  { %2405 = vrot.lane.b32.xlu0 %v6131_v35, %s5464_s26  ;;  %2402 = vrot.lane.b32.xlu1 %v6131_v35, %s5465_s4  ;;  %v2421_v45 = vmul.f32 0.35355338, %v6131_v35 }
 0xe20   :  { %2418 = vrot.lane.b32.xlu0 %v6137_v37, %s5466_s17  ;;  %2408 = vrot.lane.b32.xlu1 %v6131_v35, %s5466_s17  ;;  %s6499_s17 = sld [smem:[#allocation40_spill]] }
 0xe24   :  { %2412 = vrot.lane.b32.xlu1 %v6137_v37, %s5465_s4 }
 0xe28   :  { %2415 = vrot.lane.b32.xlu1 %v6137_v37, %s5464_s26  ;;  %s6498_s26 = sld [smem:[#allocation39_spill]] }
 0xe2c   :  { %2429 = vrot.lane.b32.xlu1 %v6131_v35, %s5467_s29 }
 0xe8e   :  { %v6149_v38 = vpop.permute.xlu0 %2405  ;;  %v6151_v39 = vpop.permute.xlu1 %2402 }
 0xe8f   :  { %2583 = vrot.lane.b32.xlu1 %v6149_v38, %s5467_s29  ;;  %2506 = vrot.lane.b32.xlu0 %v6151_v39, %s5467_s29  ;;  %v2423_v50 = vmul.f32 0.35355338, %v6149_v38  ;;  %v2422_v51 = vmul.f32 0.35355338, %v6151_v39 }
 0xe92   :  { %v6157_v40 = vpop.permute.xlu1 %2408  ;;  %v6167_v42 = vpop.permute.xlu0 %2418 }
 0xe93   :  { %2737 = vrot.lane.b32.xlu1 %v6137_v37, %s5467_s29  ;;  %2660 = vrot.lane.b32.xlu0 %v6157_v40, %s5467_s29  ;;  %v2424_v0 = vmul.f32 0.35355338, %v6157_v40  ;;  %v2428_v3 = vmul.f32 0.35355338, %v6167_v42 }
 0xe96   :  { %v6163_v41 = vpop.permute.xlu1 %2412 }
 0xe97   :  { %2814 = vrot.lane.b32.xlu0 %v6163_v41, %s5467_s29  ;;  %v2426_v57 = vmul.f32 0.35355338, %v6163_v41 }
 0xe9a   :  { %v6169_v43 = vpop.permute.xlu1 %2415 }
 0xe9b   :  { %2968 = vrot.lane.b32.xlu0 %v6167_v42, %s5467_s29  ;;  %2891 = vrot.lane.b32.xlu1 %v6169_v43, %s5467_s29  ;;  %v2427_v5 = vmul.f32 0.35355338, %v6169_v43  ;;  %s5471_s29 = smov [#allocation20]  }
 0xe9e   :  { %v2430_v44 = vpop.permute.xlu1 %2429 }
 0xe9f   :  { %4821 = vmatpush3.xpose.msk.msra.mxu0 %vm589_vm4, %v2430_v44 }
 0xea0   :  { %4825 = vmatprep.subr.mxu0 %v5462_v54 }
 0xea2   :  { %4823 = vmatmul.mubr.msk.f32.vlgmr.msra.gmra.mrb[24].mxu0 %vm589_vm4, %v2421_v45 }
 0xea3   :  { %4827 = vmatprep.mubr.msk.f32.mxu0 %vm5461_vm3, %v5462_v54 }
 0xf01   :  { %v2507_v46 = vpop.permute.xlu0 %2506  ;;  %v2584_v47 = vpop.permute.xlu1 %2583 }
 0xf02   :  { %4826 = vmatpush3.xpose.msk.msra.mxu0 %vm589_vm4, %v2507_v46  ;;  %4831 = vmatpush3.xpose.msk.msra.mxu1 %vm589_vm4, %v2584_v47 }
 0xf03   :  { %4840 = vmatprep.subr.mxu1 %v5462_v54  ;;  %4835 = vmatprep.subr.mxu0 %v5462_v54 }
 0xf05   :  { %v2661_v52 = vpop.permute.xlu0 %2660  ;;  %4833 = vmatmul.mubr.msk.f32.vlgmr.msra.gmra.mrb[22].mxu1 %vm589_vm4, %v2423_v50  ;;  %v2738_v55 = vpop.permute.xlu1 %2737  ;;  %4828 = vmatmul.mubr.msk.f32.vlgmr.msra.gmra.mrb[26].mxu0 %vm589_vm4, %v2422_v51 }
 0xf06   :  { %4836 = vmatpush3.xpose.msk.msra.mxu0 %vm589_vm4, %v2661_v52  ;;  %4841 = vmatpush3.xpose.msk.msra.mxu1 %vm589_vm4, %v2738_v55 }
 0xf07   :  { %4837 = vmatprep.mubr.msk.f32.mxu0 %vm5461_vm3, %v5462_v54  ;;  %4842 = vmatprep.mubr.msk.f32.mxu1 %vm5461_vm3, %v5462_v54 }
 0xf08   :  { %4845 = vmatprep.subr.mxu0 %v5462_v54  ;;  %4850 = vmatprep.subr.mxu1 %v5462_v54 }
 0xf09   :  { %v2815_v4 = vpop.permute.xlu0 %2814  ;;  %4838 = vmatmul.mubr.msk.f32.vlgmr.msra.gmra.mrb[28].mxu0 %vm589_vm4, %v2424_v0  ;;  %4843 = vmatmul.mubr.msk.f32.vlgmr.msra.gmra.mrb[24].mxu1 %vm589_vm4, %v2425_v56 }
 0xf0a   :  { %4846 = vmatpush3.xpose.msk.msra.mxu0 %vm589_vm4, %v2815_v4  ;;  %4847 = vmatprep.mubr.msk.f32.mxu0 %vm5461_vm3, %v5462_v54 }
 0xf0b   :  { %4855 = vmatprep.subr.mxu0 %v5462_v54  ;;  %4852 = vmatprep.mubr.msk.f32.mxu1 %vm5461_vm3, %v5462_v54 }
 0xf0d   :  { %v2969_v58 = vpop.permute.xlu0 %2968  ;;  %v2892_v2 = vpop.permute.xlu1 %2891  ;;  %4848 = vmatmul.mubr.msk.f32.vlgmr.msra.gmra.mrb[30].mxu0 %vm589_vm4, %v2426_v57 }
 0xf0e   :  { %4851 = vmatpush3.xpose.msk.msra.mxu1 %vm589_vm4, %v2892_v2  ;;  %4856 = vmatpush3.xpose.msk.msra.mxu0 %vm589_vm4, %v2969_v58 }
 0xf0f   :  { %4857 = vmatprep.mubr.msk.f32.mxu0 %vm5461_vm3, %v5462_v54  ;;  %4860 = vmatprep.subr.mxu1 %v5462_v54 }
 0xf10   :  { %4865 = vmatprep.subr.mxu0 %v5462_v54 }
 0xf11   :  { %4853 = vmatmul.mubr.msk.f32.vlgmr.msra.gmra.mrb[26].mxu1 %vm589_vm4, %v2427_v5  ;;  %4858 = vmatmul.mubr.msk.f32.vlgmr.msra.gmra.mrb[32].mxu0 %vm589_vm4, %v2428_v3 }
 0xf12   :  { %4862 = vmatprep.mubr.msk.f32.mxu1 %vm5461_vm3, %v5462_v54  ;;  %4867 = vmatprep.mubr.msk.f32.mxu0 %vm5461_vm3, %v5462_v54 }
 0xf75   :  { %v2502_v6 = vpop.f32.mrb[24].mxu0 }
 0xf76   :  { %v2503_v7 = vadd.f32 %v2502_v6, %v5951_v25  ;;  %v4824_v8 = vpop.f32.mrb[25].mxu0 }
 0xf78   :  { %v3045_v9 = vsel %vm589_vm4, %v2503_v7, -inf }
 0xf79   :  { %3046 = vmax.xlane.f32.xlu1 %v3045_v9 }
 0xfd8   :  { %v2579_v10 = vpop.f32.mrb[26].mxu0  ;;  %v2656_v59 = vpop.f32.mrb[22].mxu1 }
 0xfd9   :  { %v2580_v61 = vadd.f32 %v2579_v10, %v5951_v25  ;;  %v4829_v63 = vpop.f32.mrb[27].mxu0  ;;  %v4834_v11 = vpop.f32.mrb[23].mxu1  ;;  %v2657_v12 = vadd.f32 %v2656_v59, %v5951_v25 }
 0xfdb   :  { %v3048_v49 = vsel %vm589_vm4, %v2580_v61, -inf  ;;  %v3051_v16 = vsel %vm589_vm4, %v2657_v12, -inf }
 0xfdc   :  { %v2810_v48 = vpop.f32.mrb[24].mxu1  ;;  %3049 = vmax.xlane.f32.xlu0 %v3048_v49  ;;  %v2733_v60 = vpop.f32.mrb[28].mxu0 }
 0xfdd   :  { %v2811_v13 = vadd.f32 %v2810_v48, %v5956_v36  ;;  %v4839_v62 = vpop.f32.mrb[29].mxu0  ;;  %v4844_v14 = vpop.f32.mrb[25].mxu1  ;;  %v2734_v15 = vadd.f32 %v2733_v60, %v5951_v25 }
 0xfdf   :  { %v3057_v1 = vsel %vm589_vm4, %v2811_v13, -inf  ;;  %v3054_v20 = vsel %vm589_vm4, %v2734_v15, -inf }
 0xfe0   :  { %3058 = vmax.xlane.f32.xlu1 %v3057_v1  ;;  %3052 = vmax.xlane.f32.xlu0 %v3051_v16  ;;  %v2887_v17 = vpop.f32.mrb[30].mxu0 }
 0xfe1   :  { %v4849_v18 = vpop.f32.mrb[31].mxu0  ;;  %v2888_v19 = vadd.f32 %v2887_v17, %v5956_v36 }
 0xfe3   :  { %v3060_v28 = vsel %vm589_vm4, %v2888_v19, -inf }
 0xfe4   :  { %v2964_v21 = vpop.f32.mrb[26].mxu1  ;;  %3055 = vmax.xlane.f32.xlu0 %v3054_v20  ;;  %v3041_v22 = vpop.f32.mrb[32].mxu0 }
 0xfe5   :  { %v2965_v23 = vadd.f32 %v2964_v21, %v5956_v36  ;;  %v4854_v24 = vpop.f32.mrb[27].mxu1  ;;  %v4859_v26 = vpop.f32.mrb[33].mxu0  ;;  %v3042_v25 = vadd.f32 %v3041_v22, %v5956_v36 }
 0xfe7   :  { %v3063_v27 = vsel %vm589_vm4, %v2965_v23, -inf  ;;  %v3066_v29 = vsel %vm589_vm4, %v3042_v25, -inf }
 0xfe8   :  { %3064 = vmax.xlane.f32.xlu1 %v3063_v27  ;;  %3061 = vmax.xlane.f32.xlu0 %v3060_v28 }
 0xfec   :  { %3067 = vmax.xlane.f32.xlu0 %v3066_v29 }
 0xff9   :  { %3133 = vrot.lane.b32.xlu1 %v6131_v35, %s5468_s23 }
 0xffd   :  { %3285 = vrot.lane.b32.xlu1 %v6149_v38, %s5468_s23 }
0x1001   :  { %3361 = vrot.lane.b32.xlu1 %v6157_v40, %s5468_s23 }
0x1002   :  { %3209 = vrot.lane.b32.xlu0 %v6151_v39, %s5468_s23 }
0x1005   :  { %3437 = vrot.lane.b32.xlu1 %v6137_v37, %s5468_s23 }
0x1006   :  { %3513 = vrot.lane.b32.xlu0 %v6163_v41, %s5468_s23  ;;  %v3047_v36 = vpop.xlane.xlu1 %3046 }
0x1007   :  { %v3069_v32 = vsub.f32 %v2503_v7, %v3047_v36 }
0x1009   :  { %v3077_v33 = vmul.f32 1.442695, %v3069_v32 }
0x100b   :  { %5125 = vpow2.f32 %v3077_v33 }
0x1015   :  { %v6251_v34 = vpop.eup %5125 }
0x1016   :  { %v3093_v35 = vsel %vm589_vm4, %v6251_v34, 0.0 }
0x1029   :  { %3094 = vadd.xlane.f32.xlu1 %v3093_v35 }
0x1069   :  { %v3050_v38 = vpop.xlane.xlu0 %3049 }
0x106a   :  { %v3070_v40 = vsub.f32 %v2580_v61, %v3050_v38 }
0x106c   :  { %v3079_v44 = vmul.f32 1.442695, %v3070_v40 }
0x106d   :  { %v3059_v39 = vpop.xlane.xlu1 %3058  ;;  %v3053_v45 = vpop.xlane.xlu0 %3052 }
0x106e   :  { %5127 = vpow2.f32 %v3079_v44  ;;  %v3073_v37 = vsub.f32 %v2811_v13, %v3059_v39  ;;  %v3071_v46 = vsub.f32 %v2657_v12, %v3053_v45 }
0x1070   :  { %v3081_v47 = vmul.f32 1.442695, %v3071_v46  ;;  %v3085_v41 = vmul.f32 1.442695, %v3073_v37 }
0x1071   :  { %v3056_v50 = vpop.xlane.xlu0 %3055 }
0x1072   :  { %v3072_v51 = vsub.f32 %v2734_v15, %v3056_v50  ;;  %5129 = vpow2.f32 %v3081_v47  ;;  %v4491_v50 = vld [vmem:[%s6497_s1 + $0x20] sm:$0xff] }
0x1073   :  { %5131 = vpow2.f32 %v3085_v41 }
0x1074   :  { %v3083_v52 = vmul.f32 1.442695, %v3072_v51  ;;  %v4492_v51 = vld [vmem:[%s6497_s1 + $0x28] sm:$0xff] }
0x1075   :  { %v3065_v55 = vpop.xlane.xlu1 %3064  ;;  %v3062_v0 = vpop.xlane.xlu0 %3061 }
0x1076   :  { %5133 = vpow2.f32 %v3083_v52  ;;  %v3075_v56 = vsub.f32 %v2965_v23, %v3065_v55  ;;  %v3074_v4 = vsub.f32 %v2888_v19, %v3062_v0  ;;  %v5015_v52 = vpack.c.bf16 %v4492_v51, %v4491_v50  ;;  %v4511_v51 = vld [vmem:[%s6448_s14 + $0x60] sm:$0xff] }
0x1078   :  { %v5128_v57 = vpop.eup %5127  ;;  %v3089_v58 = vmul.f32 1.442695, %v3075_v56  ;;  %v3087_v2 = vmul.f32 1.442695, %v3074_v4  ;;  %v4493_v56 = vld [vmem:[%s6497_s1 + $0x30] sm:$0xff]  ;;  %v4494_v4 = vld [vmem:[%s6497_s1 + $0x38] sm:$0xff] }
0x1079   :  { %v3134_v3 = vpop.permute.xlu1 %3133  ;;  %v3068_v5 = vpop.xlane.xlu0 %3067  ;;  %v3096_v6 = vsel %vm589_vm4, %v5128_v57, 0.0 }
0x107a   :  { %5135 = vpow2.f32 %v3089_v58  ;;  %v3076_v7 = vsub.f32 %v3042_v25, %v3068_v5  ;;  %4861 = vmatpush3.msra.mxu1 %v3134_v3  ;;  %3097 = vadd.xlane.f32.xlu0 %v3096_v6 }
0x107b   :  { %5137 = vpow2.f32 %v3087_v2  ;;  %4870 = vmatprep.subr.mxu1 %v5462_v54 }
0x107c   :  { %v3091_v8 = vmul.f32 1.442695, %v3076_v7  ;;  %v5130_v9 = vpop.eup %5129 }
0x107d   :  { %v3210_v10 = vpop.permute.xlu0 %3209  ;;  %v3099_v59 = vsel %vm589_vm4, %v5130_v9, 0.0  ;;  %v5132_v61 = vpop.eup %5131 }
0x107e   :  { %5139 = vpow2.f32 %v3091_v8  ;;  %4866 = vmatpush3.msra.mxu0 %v3210_v10  ;;  %3100 = vadd.xlane.f32.xlu1 %v3099_v59  ;;  %v3105_v12 = vsel %vm589_vm4, %v5132_v61, 0.0  ;;  %v3286_v15 = vpop.permute.xlu1 %3285 }
0x107f   :  { %4875 = vmatprep.subr.mxu0 %v5462_v54 }
0x1080   :  { %v5134_v63 = vpop.eup %5133 }
0x1081   :  { %v3102_v11 = vsel %vm589_vm4, %v5134_v63, 0.0 }
0x1082   :  { %3103 = vadd.xlane.f32.xlu0 %v3102_v11  ;;  %3106 = vadd.xlane.f32.xlu1 %v3105_v12  ;;  %v3362_v1 = vpop.permute.xlu1 %3361 }
0x1084   :  { %v5136_v49 = vpop.eup %5135 }
0x1085   :  { %v6261_v48 = vpop.eup %5137  ;;  %v3111_v60 = vsel %vm589_vm4, %v5136_v49, 0.0 }
0x1086   :  { %v3108_v13 = vsel %vm589_vm4, %v6261_v48, 0.0  ;;  %3112 = vadd.xlane.f32.xlu1 %v3111_v60  ;;  %v3438_v16 = vpop.permute.xlu1 %3437 }
0x1087   :  { %3109 = vadd.xlane.f32.xlu0 %v3108_v13 }
0x1088   :  { %v6266_v62 = vpop.eup %5139 }
0x1089   :  { %v3114_v14 = vsel %vm589_vm4, %v6266_v62, 0.0 }
0x108b   :  { %3115 = vadd.xlane.f32.xlu0 %v3114_v14 }
0x1097   :  { %3589 = vrot.lane.b32.xlu1 %v6169_v43, %s5468_s23  ;;  %v3514_v43 = vpop.permute.xlu0 %3513 }
0x10a1   :  { %3665 = vrot.lane.b32.xlu0 %v6167_v42, %s5468_s23  ;;  %s4398_s23 = sshll.u32 %s5471_s29, 4  ;;  %s4399_s23 = int_to_ptr.vmem [resolvable:$true] %s4398_s23 }
0x10a2   :  { %p5416_p5 = scmp.lt.s32.totalorder %s4399_s23, %s4399_s23 }
0x10b6   :  { %v3095_v17 = vpop.xlane.xlu1 %3094 }
0x10b7   :  { %5141 = vrcp.f32 %v3095_v17 }
0x10c1   :  { %v5142_v18 = vpop.eup %5141 }
0x10c2   :  { %v3125_v19 = vmul.f32 %v5142_v18, %v6251_v34  ;;  %v4495_v18 = vld [vmem:[#allocation10 + $0x1] ss:$0 sm:$0xff] }
0x10c4   :  { %4863 = vmatmul.mubr.msk.f32.vlgmr.msra.gmra.mrb[28].mxu1 %vm589_vm4, %v3125_v19 }
0x10c5   :  { %4871 = vmatpush3.msra.mxu1 %v3286_v15  ;;  %4872 = vmatprep.mubr.msk.f32.mxu1 %vm5461_vm3, %v5462_v54 }
0x10c6   :  { %4880 = vmatprep.subr.mxu1 %v5462_v54 }
0x1107   :  { %v3098_v20 = vpop.xlane.xlu0 %3097 }
0x1108   :  { %5143 = vrcp.f32 %v3098_v20 }
0x110b   :  { %v3101_v42 = vpop.xlane.xlu1 %3100 }
0x110c   :  { %5145 = vrcp.f32 %v3101_v42 }
0x110f   :  { %v3104_v21 = vpop.xlane.xlu0 %3103  ;;  %v3107_v22 = vpop.xlane.xlu1 %3106 }
0x1110   :  { %5147 = vrcp.f32 %v3104_v21 }
0x1111   :  { %5149 = vrcp.f32 %v3107_v22 }
0x1112   :  { %v5144_v23 = vpop.eup %5143 }
0x1113   :  { %v3126_v24 = vmul.f32 %v5144_v23, %v5128_v57  ;;  %v3113_v26 = vpop.xlane.xlu1 %3112  ;;  %v5019_v57 = vpack.c.bf16 %v4494_v4, %v4493_v56 }
0x1114   :  { %v3110_v25 = vpop.xlane.xlu0 %3109  ;;  %5151 = vrcp.f32 %v3113_v26 }
0x1115   :  { %4868 = vmatmul.mubr.msk.f32.vlgmr.msra.gmra.mrb[34].mxu0 %vm589_vm4, %v3126_v24  ;;  %5153 = vrcp.f32 %v3110_v25 }
0x1116   :  { %4876 = vmatpush3.msra.mxu0 %v3362_v1  ;;  %4877 = vmatprep.mubr.msk.f32.mxu0 %vm5461_vm3, %v5462_v54  ;;  %v5146_v27 = vpop.eup %5145 }
0x1117   :  { %4885 = vmatprep.subr.mxu0 %v5462_v54  ;;  %v3127_v28 = vmul.f32 %v5146_v27, %v5130_v9  ;;  %v3590_v35 = vpop.permute.xlu1 %3589 }
0x1118   :  { %v3116_v29 = vpop.xlane.xlu0 %3115 }
0x1119   :  { %5155 = vrcp.f32 %v3116_v29  ;;  %4873 = vmatmul.mubr.msk.f32.vlgmr.msra.gmra.mrb[30].mxu1 %vm589_vm4, %v3127_v28 }
0x111a   :  { %v5148_v36 = vpop.eup %5147  ;;  %4881 = vmatpush3.msra.mxu1 %v3438_v16  ;;  %4882 = vmatprep.mubr.msk.f32.mxu1 %vm5461_vm3, %v5462_v54 }
0x111b   :  { %v5150_v32 = vpop.eup %5149  ;;  %v3128_v33 = vmul.f32 %v5148_v36, %v5134_v63  ;;  %4890 = vmatprep.subr.mxu1 %v5462_v54 }
0x111c   :  { %v3129_v34 = vmul.f32 %v5150_v32, %v5132_v61  ;;  %v3666_v37 = vpop.permute.xlu0 %3665 }
0x111d   :  { %4878 = vmatmul.mubr.msk.f32.vlgmr.msra.gmra.mrb[36].mxu0 %vm589_vm4, %v3128_v33 }
0x111e   :  { %4883 = vmatmul.mubr.msk.f32.vlgmr.msra.gmra.mrb[32].mxu1 %vm589_vm4, %v3129_v34  ;;  %4886 = vmatpush3.msra.mxu0 %v3514_v43  ;;  %v5152_v38 = vpop.eup %5151 }
0x111f   :  { %4891 = vmatpush3.msra.mxu1 %v3590_v35  ;;  %4887 = vmatprep.mubr.msk.f32.mxu0 %vm5461_vm3, %v5462_v54  ;;  %v5154_v40 = vpop.eup %5153  ;;  %v3131_v44 = vmul.f32 %v5152_v38, %v5136_v49  ;;  %v4501_v35 = vld [vmem:[%s6446_s12 + $0x28] sm:$0xff] }
0x1120   :  { %4892 = vmatprep.mubr.msk.f32.mxu1 %vm5461_vm3, %v5462_v54  ;;  %4895 = vmatprep.subr.mxu0 %v5462_v54  ;;  %v3130_v39 = vmul.f32 %v5154_v40, %v6261_v48  ;;  %v4502_v40 = vld [vmem:[%s6446_s12 + $0x30] sm:$0xff] }
0x1121   :  { %5016 = vmatprep.subr.bf16.mxu1 %v5015_v52 }
0x1122   :  { %4893 = vmatmul.mubr.msk.f32.vlgmr.msra.gmra.mrb[34].mxu1 %vm589_vm4, %v3131_v44  ;;  %4888 = vmatmul.mubr.msk.f32.vlgmr.msra.gmra.mrb[38].mxu0 %vm589_vm4, %v3130_v39  ;;  %v4503_v44 = vld [vmem:[%s6446_s12 + $0x38] sm:$0xff] }
0x1123   :  { %v5156_v45 = vpop.eup %5155  ;;  %4896 = vmatpush3.msra.mxu0 %v3666_v37  ;;  %4897 = vmatprep.mubr.msk.f32.mxu0 %vm5461_vm3, %v5462_v54  ;;  %v5027_v39 = vpack.c.bf16 %v4503_v44, %v4502_v40  ;;  %v4508_v37 = vld [vmem:[%s6448_s14 + $0x48] sm:$0xff] }
0x1124   :  { %v3132_v46 = vmul.f32 %v5156_v45, %v6266_v62  ;;  %5018 = vmatpush3.bf16.msra.mxu1 %v5015_v52  ;;  %v4507_v45 = vld [vmem:[%s6448_s14 + $0x40] sm:$0xff]  ;;  %v4512_v52 = vld [vmem:[%s6448_s14 + $0x68] sm:$0xff] }
0x1125   :  { %5020 = vmatprep.subr.bf16.mxu1 %v5019_v57 }
0x1126   :  { %4898 = vmatmul.mubr.msk.f32.vlgmr.msra.gmra.mrb[40].mxu0 %vm589_vm4, %v3132_v46  ;;  %v4509_v46 = vld [vmem:[%s6448_s14 + $0x50] sm:$0xff] }
0x1128   :  { %5022 = vmatpush3.bf16.msra.mxu1 %v5019_v57 }
0x1197   :  { %v3205_v47 = vpop.f32.mrb[28].mxu1 }
0x1198   :  { %v4864_v41 = vpop.f32.mrb[29].mxu1 }
0x1199   :  { %v4510_v41 = vld [vmem:[%s6448_s14 + $0x58] sm:$0xff] }
0x119a   :  { %v5035_v50 = vpack.c.bf16 %v4510_v41, %v4509_v46  ;;  %v4519_v46 = vld [vmem:[#allocation19 + $0x1] ss:$0 sm:$0xff] }
0x11e8   :  { %v3281_v55 = vpop.f32.mrb[34].mxu0 }
0x11e9   :  { %3742 = vrot.lane.b32.xlu1 %v3281_v55, %s5469_s30  ;;  %v4869_v0 = vpop.f32.mrb[35].mxu0  ;;  %v5039_v55 = vpack.c.bf16 %v4512_v52, %v4511_v51 }
0x11ec   :  { %v3357_v58 = vpop.f32.mrb[30].mxu1 }
0x11ed   :  { %v4874_v2 = vpop.f32.mrb[31].mxu1  ;;  %3746 = vrot.lane.b32.xlu0 %v3357_v58, %s5449_s3 }
0x11f0   :  { %v3433_v3 = vpop.f32.mrb[36].mxu0 }
0x11f1   :  { %v3509_v5 = vpop.f32.mrb[32].mxu1  ;;  %v4879_v6 = vpop.f32.mrb[37].mxu0  ;;  %3750 = vrot.lane.b32.xlu0 %v3433_v3, %s5470_s28 }
0x11f2   :  { %v4884_v7 = vpop.f32.mrb[33].mxu1 }
0x11f3   :  { %v4499_v7 = vld [vmem:[#allocation13 + $0x1] ss:$0 sm:$0xff] }
0x11f5   :  { %v3661_v8 = vpop.f32.mrb[34].mxu1  ;;  %v3585_v9 = vpop.f32.mrb[38].mxu0 }
0x11f6   :  { %v4894_v10 = vpop.f32.mrb[35].mxu1  ;;  %3757 = vrot.lane.b32.xlu1 %v3585_v9, %s5469_s30  ;;  %v4889_v59 = vpop.f32.mrb[39].mxu0 }
0x11f9   :  { %v3737_v61 = vpop.f32.mrb[40].mxu0 }
0x11fa   :  { %3761 = vrot.lane.b32.xlu1 %v3661_v8, %s5449_s3  ;;  %3765 = vrot.lane.b32.xlu0 %v3737_v61, %s5470_s28  ;;  %v4899_v63 = vpop.f32.mrb[41].mxu0 }
0x125b   :  { %v3743_v11 = vpop.permute.xlu1 %3742 }
0x125c   :  { %v3753_v49 = vsel %vm589_vm4, %v3205_v47, %v3743_v11  ;;  %v5031_v47 = vpack.c.bf16 %v4508_v37, %v4507_v45  ;;  %v4513_v11 = vld [vmem:[%s6448_s14 + $0x70] sm:$0xff] }
0x125e   :  { %5032 = vmatprep.subr.bf16.mxu1 %v5031_v47 }
0x125f   :  { %v3747_v12 = vpop.permute.xlu0 %3746 }
0x1260   :  { %v3754_v48 = vsel %vm231_vm0, %v3753_v49, %v3747_v12  ;;  %v4514_v12 = vld [vmem:[%s6448_s14 + $0x78] sm:$0xff] }
0x1261   :  { %v5043_v49 = vpack.c.bf16 %v4514_v12, %v4513_v11 }
0x1263   :  { %v3751_v60 = vpop.permute.xlu0 %3750 }
0x1264   :  { %v3755_v13 = vsel %vm1914_vm6, %v3754_v48, %v3751_v60  ;;  %v4504_v48 = vld [vmem:[#allocation14 + $0x1] ss:$0 sm:$0xff] }
0x1265   :  { %4908 = vmatprep.mubr.msk.f32.mxu1 %vm469_vm1, %v3755_v13 }
0x1268   :  { %v3758_v62 = vpop.permute.xlu1 %3757 }
0x1269   :  { %v3768_v14 = vsel %vm589_vm4, %v3509_v5, %v3758_v62  ;;  %v4498_v5 = vld [vmem:[#allocation11 + $0x1] ss:$0 sm:$0xff] }
0x126c   :  { %v3762_v15 = vpop.permute.xlu1 %3761  ;;  %v3766_v1 = vpop.permute.xlu0 %3765 }
0x126d   :  { %v3769_v16 = vsel %vm231_vm0, %v3768_v14, %v3762_v15 }
0x126e   :  { %v3770_v17 = vsel %vm1914_vm6, %v3769_v16, %v3766_v1  ;;  %v4515_v16 = vld [vmem:[#allocation16 + $0x1] ss:$0 sm:$0xff] }
0x126f   :  { %4909 = vmatmul.mubr.msk.f32.vlgmr.msra.gmra.mrb[36].mxu1 %vm469_vm1, %v3770_v17 }
0x1270   :  { %5034 = vmatpush3.bf16.msra.mxu1 %v5031_v47 }
0x1271   :  { %5036 = vmatprep.subr.bf16.mxu1 %v5035_v50 }
0x1274   :  { %5038 = vmatpush3.bf16.msra.mxu1 %v5035_v50 }
0x1275   :  { %5040 = vmatprep.subr.bf16.mxu1 %v5039_v55 }
0x1278   :  { %5042 = vmatpush3.bf16.msra.mxu1 %v5039_v55 }
0x1279   :  { %5044 = vmatprep.subr.bf16.mxu1 %v5043_v49 }
0x127c   :  { %5046 = vmatpush3.bf16.msra.mxu1 %v5043_v49  ;;  %v4520_v49 = vld [vmem:[%s6452_s18] ss:$0 sm:$0xff] }
0x1342   :  { %v4910_v19 = vpop.f32.mrb[36].mxu1 }
0x1343   :  { %v3862_v43 = vadd.f32 %v4910_v19, %v4495_v18  ;;  %v3856_v20 = vpop.f32.mrb[37].mxu1 }
0x1344   :  { %v3857_v42 = vadd.f32 %v4495_v18, %v3856_v20 }
0x1345   :  { %v3866_v21 = vadd.f32 %v3862_v43, %v6123_v31 }
0x1346   :  { %v3865_v22 = vadd.f32 %v3857_v42, %v6121_v30  ;;  %v4500_v30 = vld [vmem:[%s6446_s12 + $0x20] sm:$0xff] }
0x1347   :  { %v3874_v23 = vsel %vm469_vm1, %v3866_v21, 0.0  ;;  %v5023_v38 = vpack.c.bf16 %v4501_v35, %v4500_v30 }
0x1348   :  { %3875 = vadd.xlane.f32.xlu0 %v3874_v23  ;;  %v3871_v24 = vsel %vm469_vm1, %v3865_v22, 0.0 }
0x1349   :  { %3872 = vadd.xlane.f32.xlu1 %v3871_v24  ;;  %5024 = vmatprep.subr.bf16.mxu0 %v5023_v38 }
0x134a   :  { %5026 = vmatpush3.bf16.msra.mxu0 %v5023_v38 }
0x134b   :  { %5028 = vmatprep.subr.bf16.mxu0 %v5027_v39 }
0x134e   :  { %5030 = vmatpush3.bf16.msra.mxu0 %v5027_v39  ;;  %v4518_v39 = vld [vmem:[#allocation17 + $0x1] ss:$0 sm:$0xff] }
0x134f   :  { %5047 = vmatprep.subr.bf16.mxu0 %v5460_v53 }
0x13d5   :  { %v3876_v26 = vpop.xlane.xlu0 %3875 }
0x13d6   :  { %v3878_v25 = vmul.f32 0.03125, %v3876_v26  ;;  %v3873_v27 = vpop.xlane.xlu1 %3872 }
0x13d7   :  { %v3877_v28 = vmul.f32 0.03125, %v3873_v27 }
0x13d8   :  { %v3880_v29 = vsub.f32 %v3866_v21, %v3878_v25 }
0x13d9   :  { %v3879_v36 = vsub.f32 %v3865_v22, %v3877_v28 }
0x13da   :  { %v3882_v34 = vmul.f32 %v3880_v29, %v3880_v29 }
0x13db   :  { %v3881_v32 = vmul.f32 %v3879_v36, %v3879_v36 }
0x13dc   :  { %v3886_v31 = vsel %vm469_vm1, %v3882_v34, 0.0 }
0x13dd   :  { %v3883_v33 = vsel %vm469_vm1, %v3881_v32, 0.0 }
0x13de   :  { %3884 = vadd.xlane.f32.xlu0 %v3883_v33 }
0x13e2   :  { %3887 = vadd.xlane.f32.xlu0 %v3886_v31 }
0x146b   :  { %v3885_v0 = vpop.xlane.xlu0 %3884 }
0x146c   :  { %v3889_v56 = vmul.f32 0.03125, %v3885_v0 }
0x146e   :  { %v3891_v4 = vadd.f32 1e-05, %v3889_v56 }
0x146f   :  { %v3888_v57 = vpop.xlane.xlu0 %3887 }
0x1470   :  { %5157 = vrsqrt.f32 %v3891_v4  ;;  %v3890_v58 = vmul.f32 0.03125, %v3888_v57 }
0x1472   :  { %v3892_v2 = vadd.f32 1e-05, %v3890_v58 }
0x1474   :  { %5159 = vrsqrt.f32 %v3892_v2 }
0x147a   :  { %v5158_v3 = vpop.eup %5157 }
0x147b   :  { %v3895_v6 = vmul.f32 %v5158_v3, %v3879_v36 }
0x147d   :  { %v3903_v8 = vmul.f32 %v4498_v5, %v3895_v6  ;;  %v4193_v6 = vld [vmem:[%s6454_s20] sm:$0xff] }
0x147e   :  { %v5160_v9 = vpop.eup %5159 }
0x147f   :  { %v3896_v10 = vmul.f32 %v5160_v9, %v3880_v29  ;;  %v3911_v59 = vadd.f32 %v4499_v7, %v3903_v8  ;;  %v4195_v9 = vld [vmem:[%s6454_s20 + $0x10] sm:$0xff] }
0x1481   :  { %v3904_v61 = vmul.f32 %v4498_v5, %v3896_v10  ;;  %4919 = vmatprep.mubr.msk.f32.mxu0 %vm469_vm1, %v3911_v59  ;;  %v4196_v10 = vld [vmem:[%s6454_s20 + $0x18] sm:$0xff] }
0x1483   :  { %v3912_v63 = vadd.f32 %v4499_v7, %v3904_v61  ;;  %v4194_v7 = vld [vmem:[%s6454_s20 + $0x8] sm:$0xff] }
0x1484   :  { %v5048_v8 = vpack.c.bf16 %v4194_v7, %v4193_v6 }
0x1485   :  { %4920 = vmatmul.mubr.msk.f32.vlgmr.msra.gmra.mrb[42].mxu0 %vm469_vm1, %v3912_v63 }
0x1486   :  { %4949 = vmatprep.mubr.msk.f32.mxu0 %vm5461_vm3, %v5462_v54  ;;  %5049 = vmatpush3.bf16.msra.mxu0 %v5048_v8 }
0x1487   :  { %5050 = vmatprep.subr.bf16.mxu0 %v5460_v53 }
0x1558   :  { %v4921_v60 = vpop.f32.mrb[42].mxu0 }
0x1559   :  { %v4004_v13 = vadd.f32 %v4921_v60, %v4504_v48  ;;  %v3998_v62 = vpop.f32.mrb[43].mxu0  ;;  %v4521_v60 = vld [vmem:[%s6453_s19] ss:$0 sm:$0xff] }
0x155a   :  { %v3999_v14 = vadd.f32 %v4504_v48, %v3998_v62 }
0x155b   :  { %v4008_v1 = vmax.f32 %v4004_v13, 0.0 }
0x155c   :  { %v4007_v15 = vmax.f32 %v3999_v14, 0.0 }
0x155e   :  { %4938 = vmatprep.mubr.msk.f32.mxu1 %vm2179_vm7, %v4007_v15 }
0x155f   :  { %4939 = vmatmul.mubr.msk.f32.vlgmr.msra.gmra.mrb[38].mxu1 %vm2179_vm7, %v4008_v1 }
0x1632   :  { %v4940_v17 = vpop.f32.mrb[38].mxu1 }
0x1633   :  { %v4104_v18 = vadd.f32 %v4940_v17, %v4515_v16  ;;  %v4098_v19 = vpop.f32.mrb[39].mxu1 }
0x1634   :  { %v4099_v43 = vadd.f32 %v4515_v16, %v4098_v19 }
0x1635   :  { %v4108_v20 = vadd.f32 %v4104_v18, %v3912_v63 }
0x1636   :  { %v4107_v42 = vadd.f32 %v4099_v43, %v3911_v59  ;;  %v5051_v59 = vpack.c.bf16 %v4196_v10, %v4195_v9 }
0x1637   :  { %v4116_v21 = vsel %vm469_vm1, %v4108_v20, 0.0 }
0x1638   :  { %4117 = vadd.xlane.f32.xlu0 %v4116_v21  ;;  %v4113_v22 = vsel %vm469_vm1, %v4107_v42, 0.0  ;;  %5052 = vmatpush3.bf16.msra.mxu0 %v5051_v59 }
0x1639   :  { %4114 = vadd.xlane.f32.xlu1 %v4113_v22  ;;  %5053 = vmatprep.subr.bf16.mxu0 %v5460_v53  ;;  %v4522_v53 = vld [vmem:[%s6455_s21] ss:$0 sm:$0xff] }
0x16c5   :  { %v4118_v23 = vpop.xlane.xlu0 %4117 }
0x16c6   :  { %v4120_v24 = vmul.f32 0.03125, %v4118_v23  ;;  %v4115_v26 = vpop.xlane.xlu1 %4114 }
0x16c7   :  { %v4119_v25 = vmul.f32 0.03125, %v4115_v26 }
0x16c8   :  { %v4122_v27 = vsub.f32 %v4108_v20, %v4120_v24 }
0x16c9   :  { %v4121_v28 = vsub.f32 %v4107_v42, %v4119_v25  ;;  %v4309_v42 = vld [vmem:[%s6458_s24 + $0x8] sm:$0xff]  ;;  %v4524_v25 = vld [vmem:[%s6456_s22] ss:$0 sm:$0xff]  ;;  %s5411_s22 = scalar_lea.vmem %s4399_s23, 32 }
0x16ca   :  { %v4124_v29 = vmul.f32 %v4122_v27, %v4122_v27  ;;  %p5412_p4 = scmp.ne.s32.totalorder %s4399_s23, %s5411_s22  ;;  %p5417_p6 = scmp.lt.s32.totalorder %s5411_s22, %s5411_s22 }
0x16cb   :  { %v4123_v36 = vmul.f32 %v4121_v28, %v4121_v28 }
0x16cc   :  { %v4128_v32 = vsel %vm469_vm1, %v4124_v29, 0.0  ;;  %p5418_p7 = por %p5417_p6, %p5416_p5 }
0x16cd   :  { %4129 = vadd.xlane.f32.xlu0 %v4128_v32  ;;  %v4125_v33 = vsel %vm469_vm1, %v4123_v36, 0.0 }
0x16ce   :  { %4126 = vadd.xlane.f32.xlu1 %v4125_v33  ;;  %v4526_v33 = vld [vmem:[%s6499_s17] ss:$0 sm:$0xff]  ;;  %p5419_p8 = pnand %p5418_p7, %p5412_p4 }
0x175a   :  { %v4130_v34 = vpop.xlane.xlu0 %4129 }
0x175b   :  { %v4132_v31 = vmul.f32 0.03125, %v4130_v34  ;;  %v4127_v30 = vpop.xlane.xlu1 %4126 }
0x175c   :  { %v4131_v35 = vmul.f32 0.03125, %v4127_v30 }
0x175d   :  { %v4134_v38 = vadd.f32 1e-05, %v4132_v31 }
0x175e   :  { %v4133_v40 = vadd.f32 1e-05, %v4131_v35 }
0x175f   :  { %5161 = vrsqrt.f32 %v4134_v38 }
0x1760   :  { %5163 = vrsqrt.f32 %v4133_v40 }
0x1769   :  { %v5162_v44 = vpop.eup %5161 }
0x176a   :  { %v5164_v45 = vpop.eup %5163  ;;  %v4138_v37 = vmul.f32 %v5162_v44, %v4122_v27 }
0x176b   :  { %v4137_v47 = vmul.f32 %v5164_v45, %v4121_v28  ;;  %v4525_v28 = vld [vmem:[%s6498_s26] ss:$0 sm:$0xff] }
0x176c   :  { %v4146_v41 = vmul.f32 %v4518_v39, %v4138_v37 }
0x176d   :  { %v4145_v50 = vmul.f32 %v4518_v39, %v4137_v47 }
0x176e   :  { %v4154_v51 = vadd.f32 %v4519_v46, %v4146_v41 }
0x176f   :  { %v4153_v52 = vadd.f32 %v4519_v46, %v4145_v50 }
0x1770   :  { %v4159_v55 = vrot.slane %v4154_v51, 6 }
0x1771   :  { %v4156_v0 = vrot.slane %v4153_v52, 7 }
0x1773   :  { %v4162_v56 = vsel %vm4161_vm8, %v4156_v0, %v4159_v55 }
0x1774   :  { %v4166_v4 = vsel %vm4165_vm9, %v4162_v56, 0.0 }
0x1775   :  { %4167 = vadd.xlane.f32.xlu1 %v4166_v4 }
0x1802   :  { %v4168_v57 = vpop.xlane.xlu1 %4167 }
0x1803   :  { %v4169_v58 = vmul.f32 0.03125, %v4168_v57 }
0x1805   :  { %v4170_v2 = vsub.f32 %v4162_v56, %v4169_v58 }
0x1807   :  { %v4171_v3 = vmul.f32 %v4170_v2, %v4170_v2 }
0x1809   :  { %v4172_v5 = vsel %vm4165_vm9, %v4171_v3, 0.0 }
0x180a   :  { %4173 = vadd.xlane.f32.xlu0 %v4172_v5 }
0x1897   :  { %v4174_v61 = vpop.xlane.xlu0 %4173 }
0x1898   :  { %v4175_v63 = vmul.f32 0.03125, %v4174_v61 }
0x189a   :  { %v4176_v11 = vadd.f32 1e-05, %v4175_v63 }
0x189c   :  { %5165 = vrsqrt.f32 %v4176_v11 }
0x18a6   :  { %v5166_v12 = vpop.eup %5165 }
0x18a7   :  { %v4178_v48 = vmul.f32 %v5166_v12, %v4170_v2 }
0x18a9   :  { %v4185_v13 = vmul.f32 %v4520_v49, %v4178_v48 }
0x18ab   :  { %v4192_v62 = vadd.f32 %v4521_v60, %v4185_v13 }
0x18ad   :  { %4950 = vmatmul.mubr.msk.f32.vlgmr.msra.gmra.mrb[44].mxu0 %vm469_vm1, %v4192_v62 }
0x18ae   :  { %4956 = vmatprep.mubr.msk.f32.mxu0 %vm5461_vm3, %v5462_v54  ;;  %v4308_v54 = vld [vmem:[%s6458_s24] sm:$0xff] }
0x18af   :  { %v5054_v21 = vpack.c.bf16 %v4309_v42, %v4308_v54 }
0x18b1   :  { %5055 = vmatpush3.bf16.msra.mxu0 %v5054_v21 }
0x1980   :  { %v4273_v14 = vpop.f32.mrb[44].mxu0 }
0x1981   :  { %v4274_v15 = vadd.f32 %v4522_v53, %v4273_v14  ;;  %v4951_v1 = vpop.f32.mrb[45].mxu0 }
0x1983   :  { %v4280_v16 = vsel %vm4279_vm10, %v4274_v15, 0.0 }
0x1984   :  { %4281 = vadd.xlane.f32.xlu1 %v4280_v16 }
0x1a11   :  { %v4282_v17 = vpop.xlane.xlu1 %4281 }
0x1a12   :  { %v4283_v18 = vmul.f32 0.0625, %v4282_v17 }
0x1a14   :  { %v4284_v19 = vsub.f32 %v4274_v15, %v4283_v18 }
0x1a16   :  { %v4285_v43 = vmul.f32 %v4284_v19, %v4284_v19 }
0x1a18   :  { %v4286_v20 = vsel %vm4279_vm10, %v4285_v43, 0.0 }
0x1a19   :  { %4287 = vadd.xlane.f32.xlu0 %v4286_v20 }
0x1aa6   :  { %v4288_v22 = vpop.xlane.xlu0 %4287 }
0x1aa7   :  { %v4289_v23 = vmul.f32 0.0625, %v4288_v22 }
0x1aa9   :  { %v4290_v24 = vadd.f32 1e-05, %v4289_v23 }
0x1aab   :  { %5167 = vrsqrt.f32 %v4290_v24 }
0x1ab5   :  { %v5168_v26 = vpop.eup %5167 }
0x1ab6   :  { %v4292_v27 = vmul.f32 %v5168_v26, %v4284_v19 }
0x1ab8   :  { %v4299_v29 = vmul.f32 %v4524_v25, %v4292_v27 }
0x1aba   :  { %v4306_v36 = vadd.f32 %v4525_v28, %v4299_v29 }
0x1abc   :  { %v4307_v32 = vmax.f32 %v4306_v36, 0.0 }
0x1abe   :  { %4957 = vmatmul.mubr.msk.f32.vlgmr.msra.gmra.mrb[46].mxu0 %vm231_vm0, %v4307_v32 }
0x1b91   :  { %v4386_v34 = vpop.f32.mrb[46].mxu0 }
0x1b92   :  { %v4387_v31 = vadd.f32 %v4526_v33, %v4386_v34  ;;  %v4958_v30 = vpop.f32.mrb[47].mxu0 }
0x1b94   :  { %4391 = vst.msk [vmem:[#allocation20] sm:$0x3] %vm4390_vm11, %v4387_v31 }
0x1b95   :  { %5422 = shalt.err (!%p5419_p8)
}
0x1b96   :  { %s6500_s14 = sld [smem:[#allocation41_spill]] }
0x1b9c   :  { %s5423_s3 = scalar_lea.hbm %s6500_s14, 32 }
0x1b9d   :  { %p5424_p9 = scmp.ne.s32.totalorder %s6500_s14, %s5423_s3  ;;  %p5427_p10 = scmp.lt.u32.totalorder %s5423_s3, %s6500_s14 }
0x1b9f   :  { %p5429_p11 = pnand %p5427_p10, %p5424_p9 }
0x1ba1   :  { %5432 = shalt.err (!%p5429_p11)
}
0x1ba2   :  { %4401 = dma.vmem_to_hbm [thread:$0]  %s4399_s23, 32, %s6500_s14, [#allocation4]  }
0x1ba3   :  { %5445 = dma.done.wait [#allocation4], 32  }
0x1ba4   :  { %5446 = vsyncadd [#allocation4], 4294967264 }
0x1ba5   :  { %4405 = vsyncpa [#allocation3], 1 }
0x1ba6   :  { %4406 = vsyncpa [#allocation6], 1 }
0x1ba7   :  { %4407 = vsyncpa [#allocation9], 1 }
0x1ba8   :  { %4408 = vsyncpa [#allocation12], 1 }
0x1ba9   :  { %4409 = vsyncpa [#allocation15], 1 }
0x1baa   :  { %4410 = vsyncpa [#allocation18], 1 }
0x1bab   :  { %4411 = vsyncpa [#allocation4], 1 }

</bundles_post_ra>
